<compile_context>
chip_gen: v7x
topology: tpu7x:2x2x1
jax: 0.10.0
libtpu: 0.0.40
codegen_flags: <defaults>
</compile_context>

<pallas_src>
import functools

import numpy as np
import jax
import jax.numpy as jnp
from jax.experimental import pallas as pl
from jax.experimental.pallas import tpu as pltpu

BN_EPS = 1e-5
# Inter-stage activation storage dtype. jnp.bfloat16 halves HBM traffic of the
# dominant (N,32,H,W) tensors (kernels always compute in f32); kept at f32 here
# so the self-check tolerance stays tight.
ACT_DTYPE = jnp.float32
_VMEM_LIMIT = 32 * 1024 * 1024          # safe on v5e/v6e/v7x; working set << limit

_SMEM = pl.BlockSpec(memory_space=pltpu.MemorySpace.SMEM)


def _compiler_params():
    return pltpu.CompilerParams(
        dimension_semantics=("parallel", "parallel"),   # megacore-shardable (v7x)
        vmem_limit_bytes=_VMEM_LIMIT)


# ----------------------------------------------------------------------------
# Kernels
# ----------------------------------------------------------------------------
def _dw_kernel(x_ref, w_ref, b_ref, scale_ref, shift_ref,
               y_ref, sum_ref, sq_ref, pad_ref, *, k, apply_act):
    """Depthwise kxk conv (+bias) of one (n, c) spatial plane.

    Optionally folds the *previous* stage's BatchNorm+ReLU (per-channel affine,
    passed as SMEM scalars) into the load.  Emits this plane's (sum, sumsq) so
    the BN of *this* stage can be finalized outside the grid (two-pass BN).
    Halo padding is built in a VMEM scratch (no HBM pad copy); the interior is
    written at a (sublane, lane)-aligned offset (8, 128).
    """
    H, W = y_ref.shape[2], y_ref.shape[3]
    p = (k - 1) // 2
    MT, ML = 8, 128                                    # aligned scratch offsets
    c = pl.program_id(1)

    x = x_ref[0, 0].astype(jnp.float32)                # (H, W), spatial on lanes
    if apply_act:                                      # previous BN+ReLU folded in
        x = jnp.maximum(x * scale_ref[c] + shift_ref[c], 0.0)

    pad_ref[...] = jnp.zeros(pad_ref.shape, jnp.float32)
    pad_ref[MT:MT + H, ML:ML + W] = x                  # aligned interior write

    acc = jnp.zeros((H, W), jnp.float32)
    base = c * (k * k)
    for dy in range(k):
        for dx in range(k):
            tap = w_ref[base + dy * k + dx]            # SMEM scalar
            acc = acc + tap * pad_ref[MT - p + dy:MT - p + dy + H,
                                      ML - p + dx:ML - p + dx + W]
    y = acc + b_ref[c]
    y_ref[0, 0] = y.astype(y_ref.dtype)

    # partial BN statistics (single pass: sum & sum-of-squares, f32)
    rs = jnp.sum(y, axis=1, keepdims=True)             # (H, 1)
    rq = jnp.sum(y * y, axis=1, keepdims=True)
    sum_ref[...] = jnp.sum(rs, axis=0, keepdims=True).reshape(1, 1, 1, 1)
    sq_ref[...] = jnp.sum(rq, axis=0, keepdims=True).reshape(1, 1, 1, 1)


def _pw_kernel(x_ref, scale_ref, shift_ref, w_ref, b_ref, *out_refs,
               apply_act, want_stats, use_mxu):
    """1x1 conv over a lane-dense (Cin, TS) spatial slab.

    Folds the previous stage's BN+ReLU into the load.  use_mxu=True maps the
    channel contraction to the MXU ((Cout,Cin) x (Cin,TS)); use_mxu=False does a
    VPU broadcast-MAC (used for the 1-channel head).  Optionally emits partial
    (sum, sumsq) of its own pre-BN output.
    """
    y_ref = out_refs[0]
    x = x_ref[0].astype(jnp.float32)                   # (Cin, TS)
    if apply_act:
        x = jnp.maximum(x * scale_ref[...] + shift_ref[...], 0.0)
    if use_mxu:
        y = jnp.dot(w_ref[...], x, preferred_element_type=jnp.float32)  # (Cout, TS)
    else:
        y = jnp.sum(x * w_ref[...], axis=0, keepdims=True)              # (1, TS)
    y = y + b_ref[...]
    y_ref[0] = y.astype(y_ref.dtype)
    if want_stats:
        out_refs[1][...] = jnp.sum(y, axis=1, keepdims=True).reshape(1, 1, -1, 1)
        out_refs[2][...] = jnp.sum(y * y, axis=1, keepdims=True).reshape(1, 1, -1, 1)


# ----------------------------------------------------------------------------
# pallas_call wrappers
# ----------------------------------------------------------------------------
def depthwise_conv(x, w, b, scale, shift, k, *, apply_act):
    """x: (N, C, H, W) -> (conv+bias output (N,C,H,W), per-(n,c) sum, sumsq)."""
    N, C, H, W = x.shape
    kern = functools.partial(_dw_kernel, k=k, apply_act=apply_act)
    y, s, q = pl.pallas_call(
        kern,
        grid=(N, C),
        in_specs=[
            pl.BlockSpec((1, 1, H, W), lambda n, c: (n, c, 0, 0)),
            _SMEM,                       # flattened (C*k*k,) depthwise weights
            _SMEM,                       # (C,) conv bias
            _SMEM,                       # (C,) folded previous-BN scale
            _SMEM,                       # (C,) folded previous-BN shift
        ],
        out_specs=[
            pl.BlockSpec((1, 1, H, W), lambda n, c: (n, c, 0, 0)),
            pl.BlockSpec((1, 1, 1, 1), lambda n, c: (n, c, 0, 0)),
            pl.BlockSpec((1, 1, 1, 1), lambda n, c: (n, c, 0, 0)),
        ],
        out_shape=[
            jax.ShapeDtypeStruct((N, C, H, W), ACT_DTYPE),
            jax.ShapeDtypeStruct((N, C, 1, 1), jnp.float32),
            jax.ShapeDtypeStruct((N, C, 1, 1), jnp.float32),
        ],
        # halo scratch: 8 rows / 128 cols left margin (aligned write), >=p right/bottom
        scratch_shapes=[pltpu.VMEM((H + 16, W + 136), jnp.float32)],
        compiler_params=_compiler_params(),
    )(x, w.reshape(-1), b, scale, shift)
    return y, s, q


def _pick_ts(S, cap=4096):
    """Largest multiple-of-128 divisor of S (<= cap); fall back to full S."""
    best = None
    t = 128
    while t <= min(S, cap):
        if S % t == 0:
            best = t
        t += 128
    return best if best is not None else S


def pointwise_conv(x3, scale, shift, w, b, *, apply_act, want_stats, use_mxu):
    """x3: (N, Cin, S) -> 1x1 conv output (N, Cout, S) [+ partial stats]."""
    N, Cin, S = x3.shape
    Cout = w.shape[0] if use_mxu else w.shape[1]
    ts = _pick_ts(S)
    sb = S // ts
    out_dtype = ACT_DTYPE if want_stats else jnp.float32
    out_shape = [jax.ShapeDtypeStruct((N, Cout, S), out_dtype)]
    out_specs = [pl.BlockSpec((1, Cout, ts), lambda n, s: (n, 0, s))]
    if want_stats:
        out_shape += [jax.ShapeDtypeStruct((N, sb, Cout, 1), jnp.float32),
                      jax.ShapeDtypeStruct((N, sb, Cout, 1), jnp.float32)]
        out_specs += [pl.BlockSpec((1, 1, Cout, 1), lambda n, s: (n, s, 0, 0)),
                      pl.BlockSpec((1, 1, Cout, 1), lambda n, s: (n, s, 0, 0))]
    kern = functools.partial(_pw_kernel, apply_act=apply_act,
                             want_stats=want_stats, use_mxu=use_mxu)
    res = pl.pallas_call(
        kern,
        grid=(N, sb),
        in_specs=[
            pl.BlockSpec((1, Cin, ts), lambda n, s: (n, 0, s)),
            pl.BlockSpec((Cin, 1), lambda n, s: (0, 0)),
            pl.BlockSpec((Cin, 1), lambda n, s: (0, 0)),
            pl.BlockSpec(w.shape, lambda n, s: (0, 0)),
            pl.BlockSpec((Cout, 1), lambda n, s: (0, 0)),
        ],
        out_specs=out_specs,
        out_shape=out_shape,
        compiler_params=_compiler_params(),
    )(x3, scale.reshape(Cin, 1), shift.reshape(Cin, 1), w, b.reshape(Cout, 1))
    if want_stats:
        return res[0], res[1], res[2]
    return res[0]


def _bn_fold(total_sum, total_sq, count, gamma, beta):
    """Fold training-mode BN (biased var) into a per-channel scale/shift."""
    mean = total_sum / count
    var = jnp.maximum(total_sq / count - mean * mean, 0.0)
    scale = gamma * jax.lax.rsqrt(var + BN_EPS)
    shift = beta - mean * scale
    return scale, shift


# ----------------------------------------------------------------------------
# Parameters (deterministic, PyTorch-style init)
# ----------------------------------------------------------------------------
def init_params(key, in_dim, embed_dim):
    ks = jax.random.split(key, 10)

    def kaiming(k, shape, fan_out):      # kaiming_normal_, mode='fan_out', relu
        return jax.random.normal(k, shape, jnp.float32) * np.sqrt(2.0 / fan_out)

    def unif(k, shape, fan_in):          # default Conv2d bias init
        b = 1.0 / np.sqrt(fan_in)
        return jax.random.uniform(k, shape, jnp.float32, -b, b)

    p = {}
    p['l1_dw_w'] = kaiming(ks[0], (in_dim, 5, 5), in_dim * 25)     # (C, kH, kW)
    p['l1_dw_b'] = unif(ks[1], (in_dim,), 25)
    p['l1_pw_w'] = kaiming(ks[2], (embed_dim, in_dim), embed_dim)  # (Cout, Cin)
    p['l1_pw_b'] = unif(ks[3], (embed_dim,), in_dim)
    p['l2_dw_w'] = kaiming(ks[4], (embed_dim, 3, 3), embed_dim * 9)
    p['l2_dw_b'] = unif(ks[5], (embed_dim,), 9)
    p['l2_pw_w'] = kaiming(ks[6], (embed_dim, embed_dim), embed_dim)
    p['l2_pw_b'] = unif(ks[7], (embed_dim,), embed_dim)
    p['head_w'] = kaiming(ks[8], (embed_dim, 1), 1)                # (Cin, 1) column
    p['head_b'] = unif(ks[9], (1,), embed_dim)
    for name, c in (('l1_bn1', in_dim), ('l1_bn2', embed_dim),
                    ('l2_bn1', embed_dim), ('l2_bn2', embed_dim)):
        p[name + '_g'] = jnp.ones((c,), jnp.float32)
        p[name + '_b'] = jnp.zeros((c,), jnp.float32)
    return p


# ----------------------------------------------------------------------------
# Full forward (Pallas pipeline, NCHW in / NCHW out)
# ----------------------------------------------------------------------------
def local_refine_forward(x_nchw, p):
    x = x_nchw.astype(jnp.float32)
    N, Cin, H, W = x.shape
    S = H * W
    E = p['l1_pw_w'].shape[0]
    cnt = float(N * H * W)

    one_c = jnp.ones((Cin,), jnp.float32)
    zero_c = jnp.zeros((Cin,), jnp.float32)

    # ---- layer1: depthwise 5x5 (pass 1 of two-pass BN1) --------------------
    y1, s1, q1 = depthwise_conv(x, p['l1_dw_w'], p['l1_dw_b'],
                                one_c, zero_c, 5, apply_act=False)
    sc1, sh1 = _bn_fold(jnp.sum(s1, axis=(0, 2, 3)), jnp.sum(q1, axis=(0, 2, 3)),
                        cnt, p['l1_bn1_g'], p['l1_bn1_b'])

    # ---- layer1: 1x1 conv (BN1+ReLU folded into the load) ------------------
    y2, s2, q2 = pointwise_conv(y1.reshape(N, Cin, S), sc1, sh1,
                                p['l1_pw_w'], p['l1_pw_b'],
                                apply_act=True, want_stats=True, use_mxu=True)
    sc2, sh2 = _bn_fold(jnp.sum(s2, axis=(0, 1, 3)), jnp.sum(q2, axis=(0, 1, 3)),
                        cnt, p['l1_bn2_g'], p['l1_bn2_b'])

    # ---- layer2: depthwise 3x3 (BN2+ReLU folded into the load) -------------
    y3, s3, q3 = depthwise_conv(y2.reshape(N, E, H, W), p['l2_dw_w'], p['l2_dw_b'],
                                sc2, sh2, 3, apply_act=True)
    sc3, sh3 = _bn_fold(jnp.sum(s3, axis=(0, 2, 3)), jnp.sum(q3, axis=(0, 2, 3)),
                        cnt, p['l2_bn1_g'], p['l2_bn1_b'])

    # ---- layer2: 1x1 conv (BN3+ReLU folded) --------------------------------
    y4, s4, q4 = pointwise_conv(y3.reshape(N, E, S), sc3, sh3,
                                p['l2_pw_w'], p['l2_pw_b'],
                                apply_act=True, want_stats=True, use_mxu=True)
    sc4, sh4 = _bn_fold(jnp.sum(s4, axis=(0, 1, 3)), jnp.sum(q4, axis=(0, 1, 3)),
                        cnt, p['l2_bn2_g'], p['l2_bn2_b'])

    # ---- head: 1x1 conv -> 1 channel (BN4+ReLU folded, VPU contraction) ----
    # TODO(synk): the head cannot be fused into the layer-2 pointwise call
    # (training-mode BN4 statistics are only available after that call ends).
    out = pointwise_conv(y4, sc4, sh4, p['head_w'], p['head_b'],
                         apply_act=True, want_stats=False, use_mxu=False)
    return out.reshape(N, 1, H, W)


# ----------------------------------------------------------------------------
# Pure-JAX reference (PyTorch semantics, for correctness check)
# ----------------------------------------------------------------------------
def _ref_forward(x_nchw, p):
    hi = jax.lax.Precision.HIGHEST
    x = x_nchw.astype(jnp.float32)

    def bn(y, g, b):
        m = jnp.mean(y, axis=(0, 2, 3), keepdims=True)
        v = jnp.mean((y - m) ** 2, axis=(0, 2, 3), keepdims=True)
        return ((y - m) * jax.lax.rsqrt(v + BN_EPS)
                * g[None, :, None, None] + b[None, :, None, None])

    def dw(x, w, bias, g, be, k):
        C = x.shape[1]
        y = jax.lax.conv_general_dilated(
            x, w.reshape(C, 1, k, k), (1, 1), 'SAME',
            dimension_numbers=('NCHW', 'OIHW', 'NCHW'),
            feature_group_count=C, precision=hi) + bias[None, :, None, None]
        return jnp.maximum(bn(y, g, be), 0.0)

    def pw(x, w, bias, g, be, use_bn, relu):
        y = jnp.einsum('oc,nchw->nohw', w, x, precision=hi) + bias[None, :, None, None]
        if use_bn:
            y = bn(y, g, be)
        if relu:
            y = jnp.maximum(y, 0.0)
        return y

    x = dw(x, p['l1_dw_w'], p['l1_dw_b'], p['l1_bn1_g'], p['l1_bn1_b'], 5)
    x = pw(x, p['l1_pw_w'], p['l1_pw_b'], p['l1_bn2_g'], p['l1_bn2_b'], True, True)
    x = dw(x, p['l2_dw_w'], p['l2_dw_b'], p['l2_bn1_g'], p['l2_bn1_b'], 3)
    x = pw(x, p['l2_pw_w'], p['l2_pw_b'], p['l2_bn2_g'], p['l2_bn2_b'], True, True)
    y = pw(x, p['head_w'].T, p['head_b'], None, None, False, False)
    return y


if __name__ == "__main__":
    in_dim, embed_dim = 5, 32        # MODEL_SEMANTIC_EMBEDDING_DIM+1, small head dim
    key = jax.random.PRNGKey(0)
    kx, kp = jax.random.split(key)
    x = jax.random.normal(kx, (2, in_dim, 16, 16), jnp.float32)   # NCHW, like PyTorch
    params = init_params(kp, in_dim, embed_dim)

    fwd = jax.jit(local_refine_forward)
    out = jax.block_until_ready(fwd(x, params))
    ref = jax.block_until_ready(_ref_forward(x, params))

    assert out.shape == (2, 1, 16, 16), out.shape
    np.testing.assert_allclose(np.asarray(out, np.float32), np.asarray(ref, np.float32),
                               rtol=2e-2, atol=2e-2)
    print("KERNEL_OK")
</pallas_src>

<mosaic_0001>
module attributes {stable_mosaic.version = 11 : i64} {
  func.func @_dw_kernel(%arg0: i32, %arg1: i32, %arg2: memref<1x1x16x16xf32, #tpu.memory_space<vmem>>, %arg3: memref<125xf32, #tpu.memory_space<smem>>, %arg4: memref<5xf32, #tpu.memory_space<smem>>, %arg5: memref<5xf32, #tpu.memory_space<smem>>, %arg6: memref<5xf32, #tpu.memory_space<smem>>, %arg7: memref<1x1x16x16xf32, #tpu.memory_space<vmem>>, %arg8: memref<1x1x1x1xf32, #tpu.memory_space<vmem>>, %arg9: memref<1x1x1x1xf32, #tpu.memory_space<vmem>>, %arg10: memref<32x152xf32, #tpu.memory_space<vmem>>) attributes {dimension_semantics = [#tpu.dimension_semantics<parallel>, #tpu.dimension_semantics<parallel>], iteration_bounds = array<i64: 2, 5>, scalar_prefetch = 0 : i64, scratch_operands = 1 : i64, tpu.core_type = #tpu.core_type<tc>, window_params = [{transform_indices = @transform_0, window_bounds = array<i64: 1, 1, 16, 16>}, {transform_indices = @transform_1, window_bounds = array<i64: 125>}, {transform_indices = @transform_2, window_bounds = array<i64: 5>}, {transform_indices = @transform_3, window_bounds = array<i64: 5>}, {transform_indices = @transform_4, window_bounds = array<i64: 5>}, {transform_indices = @transform_5, window_bounds = array<i64: 1, 1, 16, 16>}, {transform_indices = @transform_6, window_bounds = array<i64: 1, 1, 1, 1>}, {transform_indices = @transform_7, window_bounds = array<i64: 1, 1, 1, 1>}]} {
    %c0 = arith.constant 0 : index
    %c0_0 = arith.constant 0 : index
    %c0_1 = arith.constant 0 : index
    %c0_2 = arith.constant 0 : index
    %0 = vector.load %arg2[%c0, %c0_0, %c0_1, %c0_2] : memref<1x1x16x16xf32, #tpu.memory_space<vmem>>, vector<1x1x16x16xf32>
    %1 = vector.shape_cast %0 : vector<1x1x16x16xf32> to vector<16x16xf32>
    %cst = arith.constant 0.000000e+00 : f32
    %2 = vector.broadcast %cst : f32 to vector<32x152xf32>
    %c0_3 = arith.constant 0 : index
    %c0_4 = arith.constant 0 : index
    %3 = vector.load %arg10[%c0_3, %c0_4] : memref<32x152xf32, #tpu.memory_space<vmem>>, vector<32x152xf32>
    tpu.vector_store %arg10[%c0_3, %c0_4], %2 {strides = array<i32>} : memref<32x152xf32, #tpu.memory_space<vmem>>, vector<32x152xf32>,
    %c8 = arith.constant 8 : index
    %c128 = arith.constant 128 : index
    %4 = vector.load %arg10[%c8, %c128] : memref<32x152xf32, #tpu.memory_space<vmem>>, vector<16x16xf32>
    tpu.vector_store %arg10[%c8, %c128], %1 {strides = array<i32>} : memref<32x152xf32, #tpu.memory_space<vmem>>, vector<16x16xf32>,
    %cst_5 = arith.constant 0.000000e+00 : f32
    %5 = vector.broadcast %cst_5 : f32 to vector<16x16xf32>
    %c25_i32 = arith.constant 25 : i32
    %6 = arith.muli %arg1, %c25_i32 : i32
    %c0_i32 = arith.constant 0 : i32
    %7 = arith.addi %6, %c0_i32 : i32
    %c0_i32_6 = arith.constant 0 : i32
    %8 = arith.addi %7, %c0_i32_6 : i32
    %9 = arith.index_cast %8 : i32 to index
    %10 = memref.load %arg3[%9] : memref<125xf32, #tpu.memory_space<smem>>
    %c6 = arith.constant 6 : index
    %c126 = arith.constant 126 : index
    %11 = vector.load %arg10[%c6, %c126] : memref<32x152xf32, #tpu.memory_space<vmem>>, vector<16x16xf32>
    %12 = vector.broadcast %10 : f32 to vector<16x16xf32>
    %13 = arith.mulf %12, %11 : vector<16x16xf32>
    %14 = arith.addf %5, %13 : vector<16x16xf32>
    %c0_i32_7 = arith.constant 0 : i32
    %15 = arith.addi %6, %c0_i32_7 : i32
    %c1_i32 = arith.constant 1 : i32
    %16 = arith.addi %15, %c1_i32 : i32
    %17 = arith.index_cast %16 : i32 to index
    %18 = memref.load %arg3[%17] : memref<125xf32, #tpu.memory_space<smem>>
    %c6_8 = arith.constant 6 : index
    %c127 = arith.constant 127 : index
    %19 = vector.load %arg10[%c6_8, %c127] : memref<32x152xf32, #tpu.memory_space<vmem>>, vector<16x16xf32>
    %20 = vector.broadcast %18 : f32 to vector<16x16xf32>
    %21 = arith.mulf %20, %19 : vector<16x16xf32>
    %22 = arith.addf %14, %21 : vector<16x16xf32>
    %c0_i32_9 = arith.constant 0 : i32
    %23 = arith.addi %6, %c0_i32_9 : i32
    %c2_i32 = arith.constant 2 : i32
    %24 = arith.addi %23, %c2_i32 : i32
    %25 = arith.index_cast %24 : i32 to index
    %26 = memref.load %arg3[%25] : memref<125xf32, #tpu.memory_space<smem>>
    %c6_10 = arith.constant 6 : index
    %c128_11 = arith.constant 128 : index
    %27 = vector.load %arg10[%c6_10, %c128_11] : memref<32x152xf32, #tpu.memory_space<vmem>>, vector<16x16xf32>
    %28 = vector.broadcast %26 : f32 to vector<16x16xf32>
    %29 = arith.mulf %28, %27 : vector<16x16xf32>
    %30 = arith.addf %22, %29 : vector<16x16xf32>
    %c0_i32_12 = arith.constant 0 : i32
    %31 = arith.addi %6, %c0_i32_12 : i32
    %c3_i32 = arith.constant 3 : i32
    %32 = arith.addi %31, %c3_i32 : i32
    %33 = arith.index_cast %32 : i32 to index
    %34 = memref.load %arg3[%33] : memref<125xf32, #tpu.memory_space<smem>>
    %c6_13 = arith.constant 6 : index
    %c129 = arith.constant 129 : index
    %35 = vector.load %arg10[%c6_13, %c129] : memref<32x152xf32, #tpu.memory_space<vmem>>, vector<16x16xf32>
    %36 = vector.broadcast %34 : f32 to vector<16x16xf32>
    %37 = arith.mulf %36, %35 : vector<16x16xf32>
    %38 = arith.addf %30, %37 : vector<16x16xf32>
    %c0_i32_14 = arith.constant 0 : i32
    %39 = arith.addi %6, %c0_i32_14 : i32
    %c4_i32 = arith.constant 4 : i32
    %40 = arith.addi %39, %c4_i32 : i32
    %41 = arith.index_cast %40 : i32 to index
    %42 = memref.load %arg3[%41] : memref<125xf32, #tpu.memory_space<smem>>
    %c6_15 = arith.constant 6 : index
    %c130 = arith.constant 130 : index
    %43 = vector.load %arg10[%c6_15, %c130] : memref<32x152xf32, #tpu.memory_space<vmem>>, vector<16x16xf32>
    %44 = vector.broadcast %42 : f32 to vector<16x16xf32>
    %45 = arith.mulf %44, %43 : vector<16x16xf32>
    %46 = arith.addf %38, %45 : vector<16x16xf32>
    %c5_i32 = arith.constant 5 : i32
    %47 = arith.addi %6, %c5_i32 : i32
    %c0_i32_16 = arith.constant 0 : i32
    %48 = arith.addi %47, %c0_i32_16 : i32
    %49 = arith.index_cast %48 : i32 to index
    %50 = memref.load %arg3[%49] : memref<125xf32, #tpu.memory_space<smem>>
    %c7 = arith.constant 7 : index
    %c126_17 = arith.constant 126 : index
    %51 = vector.load %arg10[%c7, %c126_17] : memref<32x152xf32, #tpu.memory_space<vmem>>, vector<16x16xf32>
    %52 = vector.broadcast %50 : f32 to vector<16x16xf32>
    %53 = arith.mulf %52, %51 : vector<16x16xf32>
    %54 = arith.addf %46, %53 : vector<16x16xf32>
    %c5_i32_18 = arith.constant 5 : i32
    %55 = arith.addi %6, %c5_i32_18 : i32
    %c1_i32_19 = arith.constant 1 : i32
    %56 = arith.addi %55, %c1_i32_19 : i32
    %57 = arith.index_cast %56 : i32 to index
    %58 = memref.load %arg3[%57] : memref<125xf32, #tpu.memory_space<smem>>
    %c7_20 = arith.constant 7 : index
    %c127_21 = arith.constant 127 : index
    %59 = vector.load %arg10[%c7_20, %c127_21] : memref<32x152xf32, #tpu.memory_space<vmem>>, vector<16x16xf32>
    %60 = vector.broadcast %58 : f32 to vector<16x16xf32>
    %61 = arith.mulf %60, %59 : vector<16x16xf32>
    %62 = arith.addf %54, %61 : vector<16x16xf32>
    %c5_i32_22 = arith.constant 5 : i32
    %63 = arith.addi %6, %c5_i32_22 : i32
    %c2_i32_23 = arith.constant 2 : i32
    %64 = arith.addi %63, %c2_i32_23 : i32
    %65 = arith.index_cast %64 : i32 to index
    %66 = memref.load %arg3[%65] : memref<125xf32, #tpu.memory_space<smem>>
    %c7_24 = arith.constant 7 : index
    %c128_25 = arith.constant 128 : index
    %67 = vector.load %arg10[%c7_24, %c128_25] : memref<32x152xf32, #tpu.memory_space<vmem>>, vector<16x16xf32>
    %68 = vector.broadcast %66 : f32 to vector<16x16xf32>
    %69 = arith.mulf %68, %67 : vector<16x16xf32>
    %70 = arith.addf %62, %69 : vector<16x16xf32>
    %c5_i32_26 = arith.constant 5 : i32
    %71 = arith.addi %6, %c5_i32_26 : i32
    %c3_i32_27 = arith.constant 3 : i32
    %72 = arith.addi %71, %c3_i32_27 : i32
    %73 = arith.index_cast %72 : i32 to index
    %74 = memref.load %arg3[%73] : memref<125xf32, #tpu.memory_space<smem>>
    %c7_28 = arith.constant 7 : index
    %c129_29 = arith.constant 129 : index
    %75 = vector.load %arg10[%c7_28, %c129_29] : memref<32x152xf32, #tpu.memory_space<vmem>>, vector<16x16xf32>
    %76 = vector.broadcast %74 : f32 to vector<16x16xf32>
    %77 = arith.mulf %76, %75 : vector<16x16xf32>
    %78 = arith.addf %70, %77 : vector<16x16xf32>
    %c5_i32_30 = arith.constant 5 : i32
    %79 = arith.addi %6, %c5_i32_30 : i32
    %c4_i32_31 = arith.constant 4 : i32
    %80 = arith.addi %79, %c4_i32_31 : i32
    %81 = arith.index_cast %80 : i32 to index
    %82 = memref.load %arg3[%81] : memref<125xf32, #tpu.memory_space<smem>>
    %c7_32 = arith.constant 7 : index
    %c130_33 = arith.constant 130 : index
    %83 = vector.load %arg10[%c7_32, %c130_33] : memref<32x152xf32, #tpu.memory_space<vmem>>, vector<16x16xf32>
    %84 = vector.broadcast %82 : f32 to vector<16x16xf32>
    %85 = arith.mulf %84, %83 : vector<16x16xf32>
    %86 = arith.addf %78, %85 : vector<16x16xf32>
    %c10_i32 = arith.constant 10 : i32
    %87 = arith.addi %6, %c10_i32 : i32
    %c0_i32_34 = arith.constant 0 : i32
    %88 = arith.addi %87, %c0_i32_34 : i32
    %89 = arith.index_cast %88 : i32 to index
    %90 = memref.load %arg3[%89] : memref<125xf32, #tpu.memory_space<smem>>
    %c8_35 = arith.constant 8 : index
    %c126_36 = arith.constant 126 : index
    %91 = vector.load %arg10[%c8_35, %c126_36] : memref<32x152xf32, #tpu.memory_space<vmem>>, vector<16x16xf32>
    %92 = vector.broadcast %90 : f32 to vector<16x16xf32>
    %93 = arith.mulf %92, %91 : vector<16x16xf32>
    %94 = arith.addf %86, %93 : vector<16x16xf32>
    %c10_i32_37 = arith.constant 10 : i32
    %95 = arith.addi %6, %c10_i32_37 : i32
    %c1_i32_38 = arith.constant 1 : i32
    %96 = arith.addi %95, %c1_i32_38 : i32
    %97 = arith.index_cast %96 : i32 to index
    %98 = memref.load %arg3[%97] : memref<125xf32, #tpu.memory_space<smem>>
    %c8_39 = arith.constant 8 : index
    %c127_40 = arith.constant 127 : index
    %99 = vector.load %arg10[%c8_39, %c127_40] : memref<32x152xf32, #tpu.memory_space<vmem>>, vector<16x16xf32>
    %100 = vector.broadcast %98 : f32 to vector<16x16xf32>
    %101 = arith.mulf %100, %99 : vector<16x16xf32>
    %102 = arith.addf %94, %101 : vector<16x16xf32>
    %c10_i32_41 = arith.constant 10 : i32
    %103 = arith.addi %6, %c10_i32_41 : i32
    %c2_i32_42 = arith.constant 2 : i32
    %104 = arith.addi %103, %c2_i32_42 : i32
    %105 = arith.index_cast %104 : i32 to index
    %106 = memref.load %arg3[%105] : memref<125xf32, #tpu.memory_space<smem>>
    %c8_43 = arith.constant 8 : index
    %c128_44 = arith.constant 128 : index
    %107 = vector.load %arg10[%c8_43, %c128_44] : memref<32x152xf32, #tpu.memory_space<vmem>>, vector<16x16xf32>
    %108 = vector.broadcast %106 : f32 to vector<16x16xf32>
    %109 = arith.mulf %108, %107 : vector<16x16xf32>
    %110 = arith.addf %102, %109 : vector<16x16xf32>
    %c10_i32_45 = arith.constant 10 : i32
    %111 = arith.addi %6, %c10_i32_45 : i32
    %c3_i32_46 = arith.constant 3 : i32
    %112 = arith.addi %111, %c3_i32_46 : i32
    %113 = arith.index_cast %112 : i32 to index
    %114 = memref.load %arg3[%113] : memref<125xf32, #tpu.memory_space<smem>>
    %c8_47 = arith.constant 8 : index
    %c129_48 = arith.constant 129 : index
    %115 = vector.load %arg10[%c8_47, %c129_48] : memref<32x152xf32, #tpu.memory_space<vmem>>, vector<16x16xf32>
    %116 = vector.broadcast %114 : f32 to vector<16x16xf32>
    %117 = arith.mulf %116, %115 : vector<16x16xf32>
    %118 = arith.addf %110, %117 : vector<16x16xf32>
    %c10_i32_49 = arith.constant 10 : i32
    %119 = arith.addi %6, %c10_i32_49 : i32
    %c4_i32_50 = arith.constant 4 : i32
    %120 = arith.addi %119, %c4_i32_50 : i32
    %121 = arith.index_cast %120 : i32 to index
    %122 = memref.load %arg3[%121] : memref<125xf32, #tpu.memory_space<smem>>
    %c8_51 = arith.constant 8 : index
    %c130_52 = arith.constant 130 : index
    %123 = vector.load %arg10[%c8_51, %c130_52] : memref<32x152xf32, #tpu.memory_space<vmem>>, vector<16x16xf32>
    %124 = vector.broadcast %122 : f32 to vector<16x16xf32>
    %125 = arith.mulf %124, %123 : vector<16x16xf32>
    %126 = arith.addf %118, %125 : vector<16x16xf32>
    %c15_i32 = arith.constant 15 : i32
    %127 = arith.addi %6, %c15_i32 : i32
    %c0_i32_53 = arith.constant 0 : i32
    %128 = arith.addi %127, %c0_i32_53 : i32
    %129 = arith.index_cast %128 : i32 to index
    %130 = memref.load %arg3[%129] : memref<125xf32, #tpu.memory_space<smem>>
    %c9 = arith.constant 9 : index
    %c126_54 = arith.constant 126 : index
    %131 = vector.load %arg10[%c9, %c126_54] : memref<32x152xf32, #tpu.memory_space<vmem>>, vector<16x16xf32>
    %132 = vector.broadcast %130 : f32 to vector<16x16xf32>
    %133 = arith.mulf %132, %131 : vector<16x16xf32>
    %134 = arith.addf %126, %133 : vector<16x16xf32>
    %c15_i32_55 = arith.constant 15 : i32
    %135 = arith.addi %6, %c15_i32_55 : i32
    %c1_i32_56 = arith.constant 1 : i32
    %136 = arith.addi %135, %c1_i32_56 : i32
    %137 = arith.index_cast %136 : i32 to index
    %138 = memref.load %arg3[%137] : memref<125xf32, #tpu.memory_space<smem>>
    %c9_57 = arith.constant 9 : index
    %c127_58 = arith.constant 127 : index
    %139 = vector.load %arg10[%c9_57, %c127_58] : memref<32x152xf32, #tpu.memory_space<vmem>>, vector<16x16xf32>
    %140 = vector.broadcast %138 : f32 to vector<16x16xf32>
    %141 = arith.mulf %140, %139 : vector<16x16xf32>
    %142 = arith.addf %134, %141 : vector<16x16xf32>
    %c15_i32_59 = arith.constant 15 : i32
    %143 = arith.addi %6, %c15_i32_59 : i32
    %c2_i32_60 = arith.constant 2 : i32
    %144 = arith.addi %143, %c2_i32_60 : i32
    %145 = arith.index_cast %144 : i32 to index
    %146 = memref.load %arg3[%145] : memref<125xf32, #tpu.memory_space<smem>>
    %c9_61 = arith.constant 9 : index
    %c128_62 = arith.constant 128 : index
    %147 = vector.load %arg10[%c9_61, %c128_62] : memref<32x152xf32, #tpu.memory_space<vmem>>, vector<16x16xf32>
    %148 = vector.broadcast %146 : f32 to vector<16x16xf32>
    %149 = arith.mulf %148, %147 : vector<16x16xf32>
    %150 = arith.addf %142, %149 : vector<16x16xf32>
    %c15_i32_63 = arith.constant 15 : i32
    %151 = arith.addi %6, %c15_i32_63 : i32
    %c3_i32_64 = arith.constant 3 : i32
    %152 = arith.addi %151, %c3_i32_64 : i32
    %153 = arith.index_cast %152 : i32 to index
    %154 = memref.load %arg3[%153] : memref<125xf32, #tpu.memory_space<smem>>
    %c9_65 = arith.constant 9 : index
    %c129_66 = arith.constant 129 : index
    %155 = vector.load %arg10[%c9_65, %c129_66] : memref<32x152xf32, #tpu.memory_space<vmem>>, vector<16x16xf32>
    %156 = vector.broadcast %154 : f32 to vector<16x16xf32>
    %157 = arith.mulf %156, %155 : vector<16x16xf32>
    %158 = arith.addf %150, %157 : vector<16x16xf32>
    %c15_i32_67 = arith.constant 15 : i32
    %159 = arith.addi %6, %c15_i32_67 : i32
    %c4_i32_68 = arith.constant 4 : i32
    %160 = arith.addi %159, %c4_i32_68 : i32
    %161 = arith.index_cast %160 : i32 to index
    %162 = memref.load %arg3[%161] : memref<125xf32, #tpu.memory_space<smem>>
    %c9_69 = arith.constant 9 : index
    %c130_70 = arith.constant 130 : index
    %163 = vector.load %arg10[%c9_69, %c130_70] : memref<32x152xf32, #tpu.memory_space<vmem>>, vector<16x16xf32>
    %164 = vector.broadcast %162 : f32 to vector<16x16xf32>
    %165 = arith.mulf %164, %163 : vector<16x16xf32>
    %166 = arith.addf %158, %165 : vector<16x16xf32>
    %c20_i32 = arith.constant 20 : i32
    %167 = arith.addi %6, %c20_i32 : i32
    %c0_i32_71 = arith.constant 0 : i32
    %168 = arith.addi %167, %c0_i32_71 : i32
    %169 = arith.index_cast %168 : i32 to index
    %170 = memref.load %arg3[%169] : memref<125xf32, #tpu.memory_space<smem>>
    %c10 = arith.constant 10 : index
    %c126_72 = arith.constant 126 : index
    %171 = vector.load %arg10[%c10, %c126_72] : memref<32x152xf32, #tpu.memory_space<vmem>>, vector<16x16xf32>
    %172 = vector.broadcast %170 : f32 to vector<16x16xf32>
    %173 = arith.mulf %172, %171 : vector<16x16xf32>
    %174 = arith.addf %166, %173 : vector<16x16xf32>
    %c20_i32_73 = arith.constant 20 : i32
    %175 = arith.addi %6, %c20_i32_73 : i32
    %c1_i32_74 = arith.constant 1 : i32
    %176 = arith.addi %175, %c1_i32_74 : i32
    %177 = arith.index_cast %176 : i32 to index
    %178 = memref.load %arg3[%177] : memref<125xf32, #tpu.memory_space<smem>>
    %c10_75 = arith.constant 10 : index
    %c127_76 = arith.constant 127 : index
    %179 = vector.load %arg10[%c10_75, %c127_76] : memref<32x152xf32, #tpu.memory_space<vmem>>, vector<16x16xf32>
    %180 = vector.broadcast %178 : f32 to vector<16x16xf32>
    %181 = arith.mulf %180, %179 : vector<16x16xf32>
    %182 = arith.addf %174, %181 : vector<16x16xf32>
    %c20_i32_77 = arith.constant 20 : i32
    %183 = arith.addi %6, %c20_i32_77 : i32
    %c2_i32_78 = arith.constant 2 : i32
    %184 = arith.addi %183, %c2_i32_78 : i32
    %185 = arith.index_cast %184 : i32 to index
    %186 = memref.load %arg3[%185] : memref<125xf32, #tpu.memory_space<smem>>
    %c10_79 = arith.constant 10 : index
    %c128_80 = arith.constant 128 : index
    %187 = vector.load %arg10[%c10_79, %c128_80] : memref<32x152xf32, #tpu.memory_space<vmem>>, vector<16x16xf32>
    %188 = vector.broadcast %186 : f32 to vector<16x16xf32>
    %189 = arith.mulf %188, %187 : vector<16x16xf32>
    %190 = arith.addf %182, %189 : vector<16x16xf32>
    %c20_i32_81 = arith.constant 20 : i32
    %191 = arith.addi %6, %c20_i32_81 : i32
    %c3_i32_82 = arith.constant 3 : i32
    %192 = arith.addi %191, %c3_i32_82 : i32
    %193 = arith.index_cast %192 : i32 to index
    %194 = memref.load %arg3[%193] : memref<125xf32, #tpu.memory_space<smem>>
    %c10_83 = arith.constant 10 : index
    %c129_84 = arith.constant 129 : index
    %195 = vector.load %arg10[%c10_83, %c129_84] : memref<32x152xf32, #tpu.memory_space<vmem>>, vector<16x16xf32>
    %196 = vector.broadcast %194 : f32 to vector<16x16xf32>
    %197 = arith.mulf %196, %195 : vector<16x16xf32>
    %198 = arith.addf %190, %197 : vector<16x16xf32>
    %c20_i32_85 = arith.constant 20 : i32
    %199 = arith.addi %6, %c20_i32_85 : i32
    %c4_i32_86 = arith.constant 4 : i32
    %200 = arith.addi %199, %c4_i32_86 : i32
    %201 = arith.index_cast %200 : i32 to index
    %202 = memref.load %arg3[%201] : memref<125xf32, #tpu.memory_space<smem>>
    %c10_87 = arith.constant 10 : index
    %c130_88 = arith.constant 130 : index
    %203 = vector.load %arg10[%c10_87, %c130_88] : memref<32x152xf32, #tpu.memory_space<vmem>>, vector<16x16xf32>
    %204 = vector.broadcast %202 : f32 to vector<16x16xf32>
    %205 = arith.mulf %204, %203 : vector<16x16xf32>
    %206 = arith.addf %198, %205 : vector<16x16xf32>
    %207 = arith.index_cast %arg1 : i32 to index
    %208 = memref.load %arg4[%207] : memref<5xf32, #tpu.memory_space<smem>>
    %209 = vector.broadcast %208 : f32 to vector<16x16xf32>
    %210 = arith.addf %206, %209 : vector<16x16xf32>
    %c0_89 = arith.constant 0 : index
    %c0_90 = arith.constant 0 : index
    %c0_91 = arith.constant 0 : index
    %c0_92 = arith.constant 0 : index
    %211 = vector.load %arg7[%c0_89, %c0_90, %c0_91, %c0_92] : memref<1x1x16x16xf32, #tpu.memory_space<vmem>>, vector<1x1x16x16xf32>
    %212 = vector.shape_cast %211 : vector<1x1x16x16xf32> to vector<16x16xf32>
    %213 = vector.shape_cast %210 : vector<16x16xf32> to vector<1x1x16x16xf32>
    tpu.vector_store %arg7[%c0_89, %c0_90, %c0_91, %c0_92], %213 {strides = array<i32>} : memref<1x1x16x16xf32, #tpu.memory_space<vmem>>, vector<1x1x16x16xf32>,
    %cst_93 = arith.constant dense<0.000000e+00> : vector<16xf32>
    %214 = vector.multi_reduction <add>, %210, %cst_93 [1] : vector<16x16xf32> to vector<16xf32>
    %215 = vector.shape_cast %214 : vector<16xf32> to vector<16x1xf32>
    %216 = arith.mulf %210, %210 : vector<16x16xf32>
    %cst_94 = arith.constant dense<0.000000e+00> : vector<16xf32>
    %217 = vector.multi_reduction <add>, %216, %cst_94 [1] : vector<16x16xf32> to vector<16xf32>
    %218 = vector.shape_cast %217 : vector<16xf32> to vector<16x1xf32>
    %cst_95 = arith.constant dense<0.000000e+00> : vector<1xf32>
    %219 = vector.multi_reduction <add>, %215, %cst_95 [0] : vector<16x1xf32> to vector<1xf32>
    %220 = vector.shape_cast %219 : vector<1xf32> to vector<1x1xf32>
    %221 = vector.shape_cast %220 : vector<1x1xf32> to vector<1x1x1x1xf32>
    %c0_96 = arith.constant 0 : index
    %c0_97 = arith.constant 0 : index
    %c0_98 = arith.constant 0 : index
    %c0_99 = arith.constant 0 : index
    %222 = vector.load %arg8[%c0_96, %c0_97, %c0_98, %c0_99] : memref<1x1x1x1xf32, #tpu.memory_space<vmem>>, vector<1x1x1x1xf32>
    tpu.vector_store %arg8[%c0_96, %c0_97, %c0_98, %c0_99], %221 {strides = array<i32>} : memref<1x1x1x1xf32, #tpu.memory_space<vmem>>, vector<1x1x1x1xf32>,
    %cst_100 = arith.constant dense<0.000000e+00> : vector<1xf32>
    %223 = vector.multi_reduction <add>, %218, %cst_100 [0] : vector<16x1xf32> to vector<1xf32>
    %224 = vector.shape_cast %223 : vector<1xf32> to vector<1x1xf32>
    %225 = vector.shape_cast %224 : vector<1x1xf32> to vector<1x1x1x1xf32>
    %c0_101 = arith.constant 0 : index
    %c0_102 = arith.constant 0 : index
    %c0_103 = arith.constant 0 : index
    %c0_104 = arith.constant 0 : index
    %226 = vector.load %arg9[%c0_101, %c0_102, %c0_103, %c0_104] : memref<1x1x1x1xf32, #tpu.memory_space<vmem>>, vector<1x1x1x1xf32>
    tpu.vector_store %arg9[%c0_101, %c0_102, %c0_103, %c0_104], %225 {strides = array<i32>} : memref<1x1x1x1xf32, #tpu.memory_space<vmem>>, vector<1x1x1x1xf32>,
    return
  }
  func.func @transform_0(%arg0: i32, %arg1: i32) -> (i32, i32, i32, i32) {
    %c0_i32 = arith.constant 0 : i32
    %c0_i32_0 = arith.constant 0 : i32
    %c0_i32_1 = arith.constant 0 : i32
    return %arg0, %arg1, %c0_i32, %c0_i32_0 : i32, i32, i32, i32
  }
  func.func @transform_1(%arg0: i32, %arg1: i32) -> i32 {
    %c0_i32 = arith.constant 0 : i32
    %c0_i32_0 = arith.constant 0 : i32
    return %c0_i32 : i32
  }
  func.func @transform_2(%arg0: i32, %arg1: i32) -> i32 {
    %c0_i32 = arith.constant 0 : i32
    %c0_i32_0 = arith.constant 0 : i32
    return %c0_i32 : i32
  }
  func.func @transform_3(%arg0: i32, %arg1: i32) -> i32 {
    %c0_i32 = arith.constant 0 : i32
    %c0_i32_0 = arith.constant 0 : i32
    return %c0_i32 : i32
  }
  func.func @transform_4(%arg0: i32, %arg1: i32) -> i32 {
    %c0_i32 = arith.constant 0 : i32
    %c0_i32_0 = arith.constant 0 : i32
    return %c0_i32 : i32
  }
  func.func @transform_5(%arg0: i32, %arg1: i32) -> (i32, i32, i32, i32) {
    %c0_i32 = arith.constant 0 : i32
    %c0_i32_0 = arith.constant 0 : i32
    %c0_i32_1 = arith.constant 0 : i32
    return %arg0, %arg1, %c0_i32, %c0_i32_0 : i32, i32, i32, i32
  }
  func.func @transform_6(%arg0: i32, %arg1: i32) -> (i32, i32, i32, i32) {
    %c0_i32 = arith.constant 0 : i32
    %c0_i32_0 = arith.constant 0 : i32
    %c0_i32_1 = arith.constant 0 : i32
    return %arg0, %arg1, %c0_i32, %c0_i32_0 : i32, i32, i32, i32
  }
  func.func @transform_7(%arg0: i32, %arg1: i32) -> (i32, i32, i32, i32) {
    %c0_i32 = arith.constant 0 : i32
    %c0_i32_0 = arith.constant 0 : i32
    %c0_i32_1 = arith.constant 0 : i32
    return %arg0, %arg1, %c0_i32, %c0_i32_0 : i32, i32, i32, i32
  }
}

module attributes {stable_mosaic.version = 11 : i64} {
  func.func @_pw_kernel(%arg0: i32, %arg1: i32, %arg2: memref<1x5x256xf32, #tpu.memory_space<vmem>>, %arg3: memref<5x1xf32, #tpu.memory_space<vmem>>, %arg4: memref<5x1xf32, #tpu.memory_space<vmem>>, %arg5: memref<32x5xf32, #tpu.memory_space<vmem>>, %arg6: memref<32x1xf32, #tpu.memory_space<vmem>>, %arg7: memref<1x32x256xf32, #tpu.memory_space<vmem>>, %arg8: memref<1x1x32x1xf32, #tpu.memory_space<vmem>>, %arg9: memref<1x1x32x1xf32, #tpu.memory_space<vmem>>) attributes {dimension_semantics = [#tpu.dimension_semantics<parallel>, #tpu.dimension_semantics<parallel>], iteration_bounds = array<i64: 2, 1>, scalar_prefetch = 0 : i64, scratch_operands = 0 : i64, tpu.core_type = #tpu.core_type<tc>, window_params = [{transform_indices = @transform_0, window_bounds = array<i64: 1, 5, 256>}, {pipeline_mode = #tpu.pipeline_mode<synchronous>, transform_indices = @transform_1, window_bounds = array<i64: 5, 1>}, {pipeline_mode = #tpu.pipeline_mode<synchronous>, transform_indices = @transform_2, window_bounds = array<i64: 5, 1>}, {pipeline_mode = #tpu.pipeline_mode<synchronous>, transform_indices = @transform_3, window_bounds = array<i64: 32, 5>}, {pipeline_mode = #tpu.pipeline_mode<synchronous>, transform_indices = @transform_4, window_bounds = array<i64: 32, 1>}, {transform_indices = @transform_5, window_bounds = array<i64: 1, 32, 256>}, {transform_indices = @transform_6, window_bounds = array<i64: 1, 1, 32, 1>}, {transform_indices = @transform_7, window_bounds = array<i64: 1, 1, 32, 1>}]} {
    %c0 = arith.constant 0 : index
    %c0_0 = arith.constant 0 : index
    %c0_1 = arith.constant 0 : index
    %0 = vector.load %arg2[%c0, %c0_0, %c0_1] : memref<1x5x256xf32, #tpu.memory_space<vmem>>, vector<1x5x256xf32>
    %1 = vector.shape_cast %0 : vector<1x5x256xf32> to vector<5x256xf32>
    %c0_2 = arith.constant 0 : index
    %c0_3 = arith.constant 0 : index
    %2 = vector.load %arg3[%c0_2, %c0_3] : memref<5x1xf32, #tpu.memory_space<vmem>>, vector<5x1xf32>
    %3 = vector.broadcast %2 : vector<5x1xf32> to vector<5x256xf32>
    %4 = arith.mulf %1, %3 : vector<5x256xf32>
    %c0_4 = arith.constant 0 : index
    %c0_5 = arith.constant 0 : index
    %5 = vector.load %arg4[%c0_4, %c0_5] : memref<5x1xf32, #tpu.memory_space<vmem>>, vector<5x1xf32>
    %6 = vector.broadcast %5 : vector<5x1xf32> to vector<5x256xf32>
    %7 = arith.addf %4, %6 : vector<5x256xf32>
    %cst = arith.constant 0.000000e+00 : f32
    %8 = vector.broadcast %cst : f32 to vector<5x256xf32>
    %9 = arith.maximumf %7, %8 : vector<5x256xf32>
    %c0_6 = arith.constant 0 : index
    %c0_7 = arith.constant 0 : index
    %10 = vector.load %arg5[%c0_6, %c0_7] : memref<32x5xf32, #tpu.memory_space<vmem>>, vector<32x5xf32>
    %cst_8 = arith.constant dense<0.000000e+00> : vector<32x256xf32>
    %11 = tpu.matmul %10, %9, %cst_8 {dimension_numbers = #tpu.dot_dimension_numbers<[1], [0], [0], [1], [0, 0, 1, 1], [], []>} : vector<32x5xf32>, vector<5x256xf32>, vector<32x256xf32> -> vector<32x256xf32>
    %c0_9 = arith.constant 0 : index
    %c0_10 = arith.constant 0 : index
    %12 = vector.load %arg6[%c0_9, %c0_10] : memref<32x1xf32, #tpu.memory_space<vmem>>, vector<32x1xf32>
    %13 = vector.broadcast %12 : vector<32x1xf32> to vector<32x256xf32>
    %14 = arith.addf %11, %13 : vector<32x256xf32>
    %c0_11 = arith.constant 0 : index
    %c0_12 = arith.constant 0 : index
    %c0_13 = arith.constant 0 : index
    %15 = vector.load %arg7[%c0_11, %c0_12, %c0_13] : memref<1x32x256xf32, #tpu.memory_space<vmem>>, vector<1x32x256xf32>
    %16 = vector.shape_cast %15 : vector<1x32x256xf32> to vector<32x256xf32>
    %17 = vector.shape_cast %14 : vector<32x256xf32> to vector<1x32x256xf32>
    tpu.vector_store %arg7[%c0_11, %c0_12, %c0_13], %17 {strides = array<i32>} : memref<1x32x256xf32, #tpu.memory_space<vmem>>, vector<1x32x256xf32>,
    %cst_14 = arith.constant dense<0.000000e+00> : vector<32xf32>
    %18 = vector.multi_reduction <add>, %14, %cst_14 [1] : vector<32x256xf32> to vector<32xf32>
    %19 = vector.shape_cast %18 : vector<32xf32> to vector<32x1xf32>
    %20 = vector.shape_cast %19 : vector<32x1xf32> to vector<1x1x32x1xf32>
    %c0_15 = arith.constant 0 : index
    %c0_16 = arith.constant 0 : index
    %c0_17 = arith.constant 0 : index
    %c0_18 = arith.constant 0 : index
    %21 = vector.load %arg8[%c0_15, %c0_16, %c0_17, %c0_18] : memref<1x1x32x1xf32, #tpu.memory_space<vmem>>, vector<1x1x32x1xf32>
    tpu.vector_store %arg8[%c0_15, %c0_16, %c0_17, %c0_18], %20 {strides = array<i32>} : memref<1x1x32x1xf32, #tpu.memory_space<vmem>>, vector<1x1x32x1xf32>,
    %22 = arith.mulf %14, %14 : vector<32x256xf32>
    %cst_19 = arith.constant dense<0.000000e+00> : vector<32xf32>
    %23 = vector.multi_reduction <add>, %22, %cst_19 [1] : vector<32x256xf32> to vector<32xf32>
    %24 = vector.shape_cast %23 : vector<32xf32> to vector<32x1xf32>
    %25 = vector.shape_cast %24 : vector<32x1xf32> to vector<1x1x32x1xf32>
    %c0_20 = arith.constant 0 : index
    %c0_21 = arith.constant 0 : index
    %c0_22 = arith.constant 0 : index
    %c0_23 = arith.constant 0 : index
    %26 = vector.load %arg9[%c0_20, %c0_21, %c0_22, %c0_23] : memref<1x1x32x1xf32, #tpu.memory_space<vmem>>, vector<1x1x32x1xf32>
    tpu.vector_store %arg9[%c0_20, %c0_21, %c0_22, %c0_23], %25 {strides = array<i32>} : memref<1x1x32x1xf32, #tpu.memory_space<vmem>>, vector<1x1x32x1xf32>,
    return
  }
  func.func @transform_0(%arg0: i32, %arg1: i32) -> (i32, i32, i32) {
    %c0_i32 = arith.constant 0 : i32
    %c0_i32_0 = arith.constant 0 : i32
    return %arg0, %c0_i32, %arg1 : i32, i32, i32
  }
  func.func @transform_1(%arg0: i32, %arg1: i32) -> (i32, i32) {
    %c0_i32 = arith.constant 0 : i32
    %c0_i32_0 = arith.constant 0 : i32
    %c0_i32_1 = arith.constant 0 : i32
    return %c0_i32, %c0_i32_0 : i32, i32
  }
  func.func @transform_2(%arg0: i32, %arg1: i32) -> (i32, i32) {
    %c0_i32 = arith.constant 0 : i32
    %c0_i32_0 = arith.constant 0 : i32
    %c0_i32_1 = arith.constant 0 : i32
    return %c0_i32, %c0_i32_0 : i32, i32
  }
  func.func @transform_3(%arg0: i32, %arg1: i32) -> (i32, i32) {
    %c0_i32 = arith.constant 0 : i32
    %c0_i32_0 = arith.constant 0 : i32
    %c0_i32_1 = arith.constant 0 : i32
    return %c0_i32, %c0_i32_0 : i32, i32
  }
  func.func @transform_4(%arg0: i32, %arg1: i32) -> (i32, i32) {
    %c0_i32 = arith.constant 0 : i32
    %c0_i32_0 = arith.constant 0 : i32
    %c0_i32_1 = arith.constant 0 : i32
    return %c0_i32, %c0_i32_0 : i32, i32
  }
  func.func @transform_5(%arg0: i32, %arg1: i32) -> (i32, i32, i32) {
    %c0_i32 = arith.constant 0 : i32
    %c0_i32_0 = arith.constant 0 : i32
    return %arg0, %c0_i32, %arg1 : i32, i32, i32
  }
  func.func @transform_6(%arg0: i32, %arg1: i32) -> (i32, i32, i32, i32) {
    %c0_i32 = arith.constant 0 : i32
    %c0_i32_0 = arith.constant 0 : i32
    %c0_i32_1 = arith.constant 0 : i32
    return %arg0, %arg1, %c0_i32, %c0_i32_0 : i32, i32, i32, i32
  }
  func.func @transform_7(%arg0: i32, %arg1: i32) -> (i32, i32, i32, i32) {
    %c0_i32 = arith.constant 0 : i32
    %c0_i32_0 = arith.constant 0 : i32
    %c0_i32_1 = arith.constant 0 : i32
    return %arg0, %arg1, %c0_i32, %c0_i32_0 : i32, i32, i32, i32
  }
}

module attributes {stable_mosaic.version = 11 : i64} {
  func.func @_dw_kernel(%arg0: i32, %arg1: i32, %arg2: memref<1x1x16x16xf32, #tpu.memory_space<vmem>>, %arg3: memref<288xf32, #tpu.memory_space<smem>>, %arg4: memref<32xf32, #tpu.memory_space<smem>>, %arg5: memref<32xf32, #tpu.memory_space<smem>>, %arg6: memref<32xf32, #tpu.memory_space<smem>>, %arg7: memref<1x1x16x16xf32, #tpu.memory_space<vmem>>, %arg8: memref<1x1x1x1xf32, #tpu.memory_space<vmem>>, %arg9: memref<1x1x1x1xf32, #tpu.memory_space<vmem>>, %arg10: memref<32x152xf32, #tpu.memory_space<vmem>>) attributes {dimension_semantics = [#tpu.dimension_semantics<parallel>, #tpu.dimension_semantics<parallel>], iteration_bounds = array<i64: 2, 32>, scalar_prefetch = 0 : i64, scratch_operands = 1 : i64, tpu.core_type = #tpu.core_type<tc>, window_params = [{transform_indices = @transform_0, window_bounds = array<i64: 1, 1, 16, 16>}, {transform_indices = @transform_1, window_bounds = array<i64: 288>}, {transform_indices = @transform_2, window_bounds = array<i64: 32>}, {transform_indices = @transform_3, window_bounds = array<i64: 32>}, {transform_indices = @transform_4, window_bounds = array<i64: 32>}, {transform_indices = @transform_5, window_bounds = array<i64: 1, 1, 16, 16>}, {transform_indices = @transform_6, window_bounds = array<i64: 1, 1, 1, 1>}, {transform_indices = @transform_7, window_bounds = array<i64: 1, 1, 1, 1>}]} {
    %c0 = arith.constant 0 : index
    %c0_0 = arith.constant 0 : index
    %c0_1 = arith.constant 0 : index
    %c0_2 = arith.constant 0 : index
    %0 = vector.load %arg2[%c0, %c0_0, %c0_1, %c0_2] : memref<1x1x16x16xf32, #tpu.memory_space<vmem>>, vector<1x1x16x16xf32>
    %1 = vector.shape_cast %0 : vector<1x1x16x16xf32> to vector<16x16xf32>
    %2 = arith.index_cast %arg1 : i32 to index
    %3 = memref.load %arg5[%2] : memref<32xf32, #tpu.memory_space<smem>>
    %4 = vector.broadcast %3 : f32 to vector<16x16xf32>
    %5 = arith.mulf %1, %4 : vector<16x16xf32>
    %6 = arith.index_cast %arg1 : i32 to index
    %7 = memref.load %arg6[%6] : memref<32xf32, #tpu.memory_space<smem>>
    %8 = vector.broadcast %7 : f32 to vector<16x16xf32>
    %9 = arith.addf %5, %8 : vector<16x16xf32>
    %cst = arith.constant 0.000000e+00 : f32
    %10 = vector.broadcast %cst : f32 to vector<16x16xf32>
    %11 = arith.maximumf %9, %10 : vector<16x16xf32>
    %cst_3 = arith.constant 0.000000e+00 : f32
    %12 = vector.broadcast %cst_3 : f32 to vector<32x152xf32>
    %c0_4 = arith.constant 0 : index
    %c0_5 = arith.constant 0 : index
    %13 = vector.load %arg10[%c0_4, %c0_5] : memref<32x152xf32, #tpu.memory_space<vmem>>, vector<32x152xf32>
    tpu.vector_store %arg10[%c0_4, %c0_5], %12 {strides = array<i32>} : memref<32x152xf32, #tpu.memory_space<vmem>>, vector<32x152xf32>,
    %c8 = arith.constant 8 : index
    %c128 = arith.constant 128 : index
    %14 = vector.load %arg10[%c8, %c128] : memref<32x152xf32, #tpu.memory_space<vmem>>, vector<16x16xf32>
    tpu.vector_store %arg10[%c8, %c128], %11 {strides = array<i32>} : memref<32x152xf32, #tpu.memory_space<vmem>>, vector<16x16xf32>,
    %cst_6 = arith.constant 0.000000e+00 : f32
    %15 = vector.broadcast %cst_6 : f32 to vector<16x16xf32>
    %c9_i32 = arith.constant 9 : i32
    %16 = arith.muli %arg1, %c9_i32 : i32
    %c0_i32 = arith.constant 0 : i32
    %17 = arith.addi %16, %c0_i32 : i32
    %c0_i32_7 = arith.constant 0 : i32
    %18 = arith.addi %17, %c0_i32_7 : i32
    %19 = arith.index_cast %18 : i32 to index
    %20 = memref.load %arg3[%19] : memref<288xf32, #tpu.memory_space<smem>>
    %c7 = arith.constant 7 : index
    %c127 = arith.constant 127 : index
    %21 = vector.load %arg10[%c7, %c127] : memref<32x152xf32, #tpu.memory_space<vmem>>, vector<16x16xf32>
    %22 = vector.broadcast %20 : f32 to vector<16x16xf32>
    %23 = arith.mulf %22, %21 : vector<16x16xf32>
    %24 = arith.addf %15, %23 : vector<16x16xf32>
    %c0_i32_8 = arith.constant 0 : i32
    %25 = arith.addi %16, %c0_i32_8 : i32
    %c1_i32 = arith.constant 1 : i32
    %26 = arith.addi %25, %c1_i32 : i32
    %27 = arith.index_cast %26 : i32 to index
    %28 = memref.load %arg3[%27] : memref<288xf32, #tpu.memory_space<smem>>
    %c7_9 = arith.constant 7 : index
    %c128_10 = arith.constant 128 : index
    %29 = vector.load %arg10[%c7_9, %c128_10] : memref<32x152xf32, #tpu.memory_space<vmem>>, vector<16x16xf32>
    %30 = vector.broadcast %28 : f32 to vector<16x16xf32>
    %31 = arith.mulf %30, %29 : vector<16x16xf32>
    %32 = arith.addf %24, %31 : vector<16x16xf32>
    %c0_i32_11 = arith.constant 0 : i32
    %33 = arith.addi %16, %c0_i32_11 : i32
    %c2_i32 = arith.constant 2 : i32
    %34 = arith.addi %33, %c2_i32 : i32
    %35 = arith.index_cast %34 : i32 to index
    %36 = memref.load %arg3[%35] : memref<288xf32, #tpu.memory_space<smem>>
    %c7_12 = arith.constant 7 : index
    %c129 = arith.constant 129 : index
    %37 = vector.load %arg10[%c7_12, %c129] : memref<32x152xf32, #tpu.memory_space<vmem>>, vector<16x16xf32>
    %38 = vector.broadcast %36 : f32 to vector<16x16xf32>
    %39 = arith.mulf %38, %37 : vector<16x16xf32>
    %40 = arith.addf %32, %39 : vector<16x16xf32>
    %c3_i32 = arith.constant 3 : i32
    %41 = arith.addi %16, %c3_i32 : i32
    %c0_i32_13 = arith.constant 0 : i32
    %42 = arith.addi %41, %c0_i32_13 : i32
    %43 = arith.index_cast %42 : i32 to index
    %44 = memref.load %arg3[%43] : memref<288xf32, #tpu.memory_space<smem>>
    %c8_14 = arith.constant 8 : index
    %c127_15 = arith.constant 127 : index
    %45 = vector.load %arg10[%c8_14, %c127_15] : memref<32x152xf32, #tpu.memory_space<vmem>>, vector<16x16xf32>
    %46 = vector.broadcast %44 : f32 to vector<16x16xf32>
    %47 = arith.mulf %46, %45 : vector<16x16xf32>
    %48 = arith.addf %40, %47 : vector<16x16xf32>
    %c3_i32_16 = arith.constant 3 : i32
    %49 = arith.addi %16, %c3_i32_16 : i32
    %c1_i32_17 = arith.constant 1 : i32
    %50 = arith.addi %49, %c1_i32_17 : i32
    %51 = arith.index_cast %50 : i32 to index
    %52 = memref.load %arg3[%51] : memref<288xf32, #tpu.memory_space<smem>>
    %c8_18 = arith.constant 8 : index
    %c128_19 = arith.constant 128 : index
    %53 = vector.load %arg10[%c8_18, %c128_19] : memref<32x152xf32, #tpu.memory_space<vmem>>, vector<16x16xf32>
    %54 = vector.broadcast %52 : f32 to vector<16x16xf32>
    %55 = arith.mulf %54, %53 : vector<16x16xf32>
    %56 = arith.addf %48, %55 : vector<16x16xf32>
    %c3_i32_20 = arith.constant 3 : i32
    %57 = arith.addi %16, %c3_i32_20 : i32
    %c2_i32_21 = arith.constant 2 : i32
    %58 = arith.addi %57, %c2_i32_21 : i32
    %59 = arith.index_cast %58 : i32 to index
    %60 = memref.load %arg3[%59] : memref<288xf32, #tpu.memory_space<smem>>
    %c8_22 = arith.constant 8 : index
    %c129_23 = arith.constant 129 : index
    %61 = vector.load %arg10[%c8_22, %c129_23] : memref<32x152xf32, #tpu.memory_space<vmem>>, vector<16x16xf32>
    %62 = vector.broadcast %60 : f32 to vector<16x16xf32>
    %63 = arith.mulf %62, %61 : vector<16x16xf32>
    %64 = arith.addf %56, %63 : vector<16x16xf32>
    %c6_i32 = arith.constant 6 : i32
    %65 = arith.addi %16, %c6_i32 : i32
    %c0_i32_24 = arith.constant 0 : i32
    %66 = arith.addi %65, %c0_i32_24 : i32
    %67 = arith.index_cast %66 : i32 to index
    %68 = memref.load %arg3[%67] : memref<288xf32, #tpu.memory_space<smem>>
    %c9 = arith.constant 9 : index
    %c127_25 = arith.constant 127 : index
    %69 = vector.load %arg10[%c9, %c127_25] : memref<32x152xf32, #tpu.memory_space<vmem>>, vector<16x16xf32>
    %70 = vector.broadcast %68 : f32 to vector<16x16xf32>
    %71 = arith.mulf %70, %69 : vector<16x16xf32>
    %72 = arith.addf %64, %71 : vector<16x16xf32>
    %c6_i32_26 = arith.constant 6 : i32
    %73 = arith.addi %16, %c6_i32_26 : i32
    %c1_i32_27 = arith.constant 1 : i32
    %74 = arith.addi %73, %c1_i32_27 : i32
    %75 = arith.index_cast %74 : i32 to index
    %76 = memref.load %arg3[%75] : memref<288xf32, #tpu.memory_space<smem>>
    %c9_28 = arith.constant 9 : index
    %c128_29 = arith.constant 128 : index
    %77 = vector.load %arg10[%c9_28, %c128_29] : memref<32x152xf32, #tpu.memory_space<vmem>>, vector<16x16xf32>
    %78 = vector.broadcast %76 : f32 to vector<16x16xf32>
    %79 = arith.mulf %78, %77 : vector<16x16xf32>
    %80 = arith.addf %72, %79 : vector<16x16xf32>
    %c6_i32_30 = arith.constant 6 : i32
    %81 = arith.addi %16, %c6_i32_30 : i32
    %c2_i32_31 = arith.constant 2 : i32
    %82 = arith.addi %81, %c2_i32_31 : i32
    %83 = arith.index_cast %82 : i32 to index
    %84 = memref.load %arg3[%83] : memref<288xf32, #tpu.memory_space<smem>>
    %c9_32 = arith.constant 9 : index
    %c129_33 = arith.constant 129 : index
    %85 = vector.load %arg10[%c9_32, %c129_33] : memref<32x152xf32, #tpu.memory_space<vmem>>, vector<16x16xf32>
    %86 = vector.broadcast %84 : f32 to vector<16x16xf32>
    %87 = arith.mulf %86, %85 : vector<16x16xf32>
    %88 = arith.addf %80, %87 : vector<16x16xf32>
    %89 = arith.index_cast %arg1 : i32 to index
    %90 = memref.load %arg4[%89] : memref<32xf32, #tpu.memory_space<smem>>
    %91 = vector.broadcast %90 : f32 to vector<16x16xf32>
    %92 = arith.addf %88, %91 : vector<16x16xf32>
    %c0_34 = arith.constant 0 : index
    %c0_35 = arith.constant 0 : index
    %c0_36 = arith.constant 0 : index
    %c0_37 = arith.constant 0 : index
    %93 = vector.load %arg7[%c0_34, %c0_35, %c0_36, %c0_37] : memref<1x1x16x16xf32, #tpu.memory_space<vmem>>, vector<1x1x16x16xf32>
    %94 = vector.shape_cast %93 : vector<1x1x16x16xf32> to vector<16x16xf32>
    %95 = vector.shape_cast %92 : vector<16x16xf32> to vector<1x1x16x16xf32>
    tpu.vector_store %arg7[%c0_34, %c0_35, %c0_36, %c0_37], %95 {strides = array<i32>} : memref<1x1x16x16xf32, #tpu.memory_space<vmem>>, vector<1x1x16x16xf32>,
    %cst_38 = arith.constant dense<0.000000e+00> : vector<16xf32>
    %96 = vector.multi_reduction <add>, %92, %cst_38 [1] : vector<16x16xf32> to vector<16xf32>
    %97 = vector.shape_cast %96 : vector<16xf32> to vector<16x1xf32>
    %98 = arith.mulf %92, %92 : vector<16x16xf32>
    %cst_39 = arith.constant dense<0.000000e+00> : vector<16xf32>
    %99 = vector.multi_reduction <add>, %98, %cst_39 [1] : vector<16x16xf32> to vector<16xf32>
    %100 = vector.shape_cast %99 : vector<16xf32> to vector<16x1xf32>
    %cst_40 = arith.constant dense<0.000000e+00> : vector<1xf32>
    %101 = vector.multi_reduction <add>, %97, %cst_40 [0] : vector<16x1xf32> to vector<1xf32>
    %102 = vector.shape_cast %101 : vector<1xf32> to vector<1x1xf32>
    %103 = vector.shape_cast %102 : vector<1x1xf32> to vector<1x1x1x1xf32>
    %c0_41 = arith.constant 0 : index
    %c0_42 = arith.constant 0 : index
    %c0_43 = arith.constant 0 : index
    %c0_44 = arith.constant 0 : index
    %104 = vector.load %arg8[%c0_41, %c0_42, %c0_43, %c0_44] : memref<1x1x1x1xf32, #tpu.memory_space<vmem>>, vector<1x1x1x1xf32>
    tpu.vector_store %arg8[%c0_41, %c0_42, %c0_43, %c0_44], %103 {strides = array<i32>} : memref<1x1x1x1xf32, #tpu.memory_space<vmem>>, vector<1x1x1x1xf32>,
    %cst_45 = arith.constant dense<0.000000e+00> : vector<1xf32>
    %105 = vector.multi_reduction <add>, %100, %cst_45 [0] : vector<16x1xf32> to vector<1xf32>
    %106 = vector.shape_cast %105 : vector<1xf32> to vector<1x1xf32>
    %107 = vector.shape_cast %106 : vector<1x1xf32> to vector<1x1x1x1xf32>
    %c0_46 = arith.constant 0 : index
    %c0_47 = arith.constant 0 : index
    %c0_48 = arith.constant 0 : index
    %c0_49 = arith.constant 0 : index
    %108 = vector.load %arg9[%c0_46, %c0_47, %c0_48, %c0_49] : memref<1x1x1x1xf32, #tpu.memory_space<vmem>>, vector<1x1x1x1xf32>
    tpu.vector_store %arg9[%c0_46, %c0_47, %c0_48, %c0_49], %107 {strides = array<i32>} : memref<1x1x1x1xf32, #tpu.memory_space<vmem>>, vector<1x1x1x1xf32>,
    return
  }
  func.func @transform_0(%arg0: i32, %arg1: i32) -> (i32, i32, i32, i32) {
    %c0_i32 = arith.constant 0 : i32
    %c0_i32_0 = arith.constant 0 : i32
    %c0_i32_1 = arith.constant 0 : i32
    return %arg0, %arg1, %c0_i32, %c0_i32_0 : i32, i32, i32, i32
  }
  func.func @transform_1(%arg0: i32, %arg1: i32) -> i32 {
    %c0_i32 = arith.constant 0 : i32
    %c0_i32_0 = arith.constant 0 : i32
    return %c0_i32 : i32
  }
  func.func @transform_2(%arg0: i32, %arg1: i32) -> i32 {
    %c0_i32 = arith.constant 0 : i32
    %c0_i32_0 = arith.constant 0 : i32
    return %c0_i32 : i32
  }
  func.func @transform_3(%arg0: i32, %arg1: i32) -> i32 {
    %c0_i32 = arith.constant 0 : i32
    %c0_i32_0 = arith.constant 0 : i32
    return %c0_i32 : i32
  }
  func.func @transform_4(%arg0: i32, %arg1: i32) -> i32 {
    %c0_i32 = arith.constant 0 : i32
    %c0_i32_0 = arith.constant 0 : i32
    return %c0_i32 : i32
  }
  func.func @transform_5(%arg0: i32, %arg1: i32) -> (i32, i32, i32, i32) {
    %c0_i32 = arith.constant 0 : i32
    %c0_i32_0 = arith.constant 0 : i32
    %c0_i32_1 = arith.constant 0 : i32
    return %arg0, %arg1, %c0_i32, %c0_i32_0 : i32, i32, i32, i32
  }
  func.func @transform_6(%arg0: i32, %arg1: i32) -> (i32, i32, i32, i32) {
    %c0_i32 = arith.constant 0 : i32
    %c0_i32_0 = arith.constant 0 : i32
    %c0_i32_1 = arith.constant 0 : i32
    return %arg0, %arg1, %c0_i32, %c0_i32_0 : i32, i32, i32, i32
  }
  func.func @transform_7(%arg0: i32, %arg1: i32) -> (i32, i32, i32, i32) {
    %c0_i32 = arith.constant 0 : i32
    %c0_i32_0 = arith.constant 0 : i32
    %c0_i32_1 = arith.constant 0 : i32
    return %arg0, %arg1, %c0_i32, %c0_i32_0 : i32, i32, i32, i32
  }
}

module attributes {stable_mosaic.version = 11 : i64} {
  func.func @_pw_kernel(%arg0: i32, %arg1: i32, %arg2: memref<1x32x256xf32, #tpu.memory_space<vmem>>, %arg3: memref<32x1xf32, #tpu.memory_space<vmem>>, %arg4: memref<32x1xf32, #tpu.memory_space<vmem>>, %arg5: memref<32x32xf32, #tpu.memory_space<vmem>>, %arg6: memref<32x1xf32, #tpu.memory_space<vmem>>, %arg7: memref<1x32x256xf32, #tpu.memory_space<vmem>>, %arg8: memref<1x1x32x1xf32, #tpu.memory_space<vmem>>, %arg9: memref<1x1x32x1xf32, #tpu.memory_space<vmem>>) attributes {dimension_semantics = [#tpu.dimension_semantics<parallel>, #tpu.dimension_semantics<parallel>], iteration_bounds = array<i64: 2, 1>, scalar_prefetch = 0 : i64, scratch_operands = 0 : i64, tpu.core_type = #tpu.core_type<tc>, window_params = [{transform_indices = @transform_0, window_bounds = array<i64: 1, 32, 256>}, {pipeline_mode = #tpu.pipeline_mode<synchronous>, transform_indices = @transform_1, window_bounds = array<i64: 32, 1>}, {pipeline_mode = #tpu.pipeline_mode<synchronous>, transform_indices = @transform_2, window_bounds = array<i64: 32, 1>}, {pipeline_mode = #tpu.pipeline_mode<synchronous>, transform_indices = @transform_3, window_bounds = array<i64: 32, 32>}, {pipeline_mode = #tpu.pipeline_mode<synchronous>, transform_indices = @transform_4, window_bounds = array<i64: 32, 1>}, {transform_indices = @transform_5, window_bounds = array<i64: 1, 32, 256>}, {transform_indices = @transform_6, window_bounds = array<i64: 1, 1, 32, 1>}, {transform_indices = @transform_7, window_bounds = array<i64: 1, 1, 32, 1>}]} {
    %c0 = arith.constant 0 : index
    %c0_0 = arith.constant 0 : index
    %c0_1 = arith.constant 0 : index
    %0 = vector.load %arg2[%c0, %c0_0, %c0_1] : memref<1x32x256xf32, #tpu.memory_space<vmem>>, vector<1x32x256xf32>
    %1 = vector.shape_cast %0 : vector<1x32x256xf32> to vector<32x256xf32>
    %c0_2 = arith.constant 0 : index
    %c0_3 = arith.constant 0 : index
    %2 = vector.load %arg3[%c0_2, %c0_3] : memref<32x1xf32, #tpu.memory_space<vmem>>, vector<32x1xf32>
    %3 = vector.broadcast %2 : vector<32x1xf32> to vector<32x256xf32>
    %4 = arith.mulf %1, %3 : vector<32x256xf32>
    %c0_4 = arith.constant 0 : index
    %c0_5 = arith.constant 0 : index
    %5 = vector.load %arg4[%c0_4, %c0_5] : memref<32x1xf32, #tpu.memory_space<vmem>>, vector<32x1xf32>
    %6 = vector.broadcast %5 : vector<32x1xf32> to vector<32x256xf32>
    %7 = arith.addf %4, %6 : vector<32x256xf32>
    %cst = arith.constant 0.000000e+00 : f32
    %8 = vector.broadcast %cst : f32 to vector<32x256xf32>
    %9 = arith.maximumf %7, %8 : vector<32x256xf32>
    %c0_6 = arith.constant 0 : index
    %c0_7 = arith.constant 0 : index
    %10 = vector.load %arg5[%c0_6, %c0_7] : memref<32x32xf32, #tpu.memory_space<vmem>>, vector<32x32xf32>
    %cst_8 = arith.constant dense<0.000000e+00> : vector<32x256xf32>
    %11 = tpu.matmul %10, %9, %cst_8 {dimension_numbers = #tpu.dot_dimension_numbers<[1], [0], [0], [1], [0, 0, 1, 1], [], []>} : vector<32x32xf32>, vector<32x256xf32>, vector<32x256xf32> -> vector<32x256xf32>
    %c0_9 = arith.constant 0 : index
    %c0_10 = arith.constant 0 : index
    %12 = vector.load %arg6[%c0_9, %c0_10] : memref<32x1xf32, #tpu.memory_space<vmem>>, vector<32x1xf32>
    %13 = vector.broadcast %12 : vector<32x1xf32> to vector<32x256xf32>
    %14 = arith.addf %11, %13 : vector<32x256xf32>
    %c0_11 = arith.constant 0 : index
    %c0_12 = arith.constant 0 : index
    %c0_13 = arith.constant 0 : index
    %15 = vector.load %arg7[%c0_11, %c0_12, %c0_13] : memref<1x32x256xf32, #tpu.memory_space<vmem>>, vector<1x32x256xf32>
    %16 = vector.shape_cast %15 : vector<1x32x256xf32> to vector<32x256xf32>
    %17 = vector.shape_cast %14 : vector<32x256xf32> to vector<1x32x256xf32>
    tpu.vector_store %arg7[%c0_11, %c0_12, %c0_13], %17 {strides = array<i32>} : memref<1x32x256xf32, #tpu.memory_space<vmem>>, vector<1x32x256xf32>,
    %cst_14 = arith.constant dense<0.000000e+00> : vector<32xf32>
    %18 = vector.multi_reduction <add>, %14, %cst_14 [1] : vector<32x256xf32> to vector<32xf32>
    %19 = vector.shape_cast %18 : vector<32xf32> to vector<32x1xf32>
    %20 = vector.shape_cast %19 : vector<32x1xf32> to vector<1x1x32x1xf32>
    %c0_15 = arith.constant 0 : index
    %c0_16 = arith.constant 0 : index
    %c0_17 = arith.constant 0 : index
    %c0_18 = arith.constant 0 : index
    %21 = vector.load %arg8[%c0_15, %c0_16, %c0_17, %c0_18] : memref<1x1x32x1xf32, #tpu.memory_space<vmem>>, vector<1x1x32x1xf32>
    tpu.vector_store %arg8[%c0_15, %c0_16, %c0_17, %c0_18], %20 {strides = array<i32>} : memref<1x1x32x1xf32, #tpu.memory_space<vmem>>, vector<1x1x32x1xf32>,
    %22 = arith.mulf %14, %14 : vector<32x256xf32>
    %cst_19 = arith.constant dense<0.000000e+00> : vector<32xf32>
    %23 = vector.multi_reduction <add>, %22, %cst_19 [1] : vector<32x256xf32> to vector<32xf32>
    %24 = vector.shape_cast %23 : vector<32xf32> to vector<32x1xf32>
    %25 = vector.shape_cast %24 : vector<32x1xf32> to vector<1x1x32x1xf32>
    %c0_20 = arith.constant 0 : index
    %c0_21 = arith.constant 0 : index
    %c0_22 = arith.constant 0 : index
    %c0_23 = arith.constant 0 : index
    %26 = vector.load %arg9[%c0_20, %c0_21, %c0_22, %c0_23] : memref<1x1x32x1xf32, #tpu.memory_space<vmem>>, vector<1x1x32x1xf32>
    tpu.vector_store %arg9[%c0_20, %c0_21, %c0_22, %c0_23], %25 {strides = array<i32>} : memref<1x1x32x1xf32, #tpu.memory_space<vmem>>, vector<1x1x32x1xf32>,
    return
  }
  func.func @transform_0(%arg0: i32, %arg1: i32) -> (i32, i32, i32) {
    %c0_i32 = arith.constant 0 : i32
    %c0_i32_0 = arith.constant 0 : i32
    return %arg0, %c0_i32, %arg1 : i32, i32, i32
  }
  func.func @transform_1(%arg0: i32, %arg1: i32) -> (i32, i32) {
    %c0_i32 = arith.constant 0 : i32
    %c0_i32_0 = arith.constant 0 : i32
    %c0_i32_1 = arith.constant 0 : i32
    return %c0_i32, %c0_i32_0 : i32, i32
  }
  func.func @transform_2(%arg0: i32, %arg1: i32) -> (i32, i32) {
    %c0_i32 = arith.constant 0 : i32
    %c0_i32_0 = arith.constant 0 : i32
    %c0_i32_1 = arith.constant 0 : i32
    return %c0_i32, %c0_i32_0 : i32, i32
  }
  func.func @transform_3(%arg0: i32, %arg1: i32) -> (i32, i32) {
    %c0_i32 = arith.constant 0 : i32
    %c0_i32_0 = arith.constant 0 : i32
    %c0_i32_1 = arith.constant 0 : i32
    return %c0_i32, %c0_i32_0 : i32, i32
  }
  func.func @transform_4(%arg0: i32, %arg1: i32) -> (i32, i32) {
    %c0_i32 = arith.constant 0 : i32
    %c0_i32_0 = arith.constant 0 : i32
    %c0_i32_1 = arith.constant 0 : i32
    return %c0_i32, %c0_i32_0 : i32, i32
  }
  func.func @transform_5(%arg0: i32, %arg1: i32) -> (i32, i32, i32) {
    %c0_i32 = arith.constant 0 : i32
    %c0_i32_0 = arith.constant 0 : i32
    return %arg0, %c0_i32, %arg1 : i32, i32, i32
  }
  func.func @transform_6(%arg0: i32, %arg1: i32) -> (i32, i32, i32, i32) {
    %c0_i32 = arith.constant 0 : i32
    %c0_i32_0 = arith.constant 0 : i32
    %c0_i32_1 = arith.constant 0 : i32
    return %arg0, %arg1, %c0_i32, %c0_i32_0 : i32, i32, i32, i32
  }
  func.func @transform_7(%arg0: i32, %arg1: i32) -> (i32, i32, i32, i32) {
    %c0_i32 = arith.constant 0 : i32
    %c0_i32_0 = arith.constant 0 : i32
    %c0_i32_1 = arith.constant 0 : i32
    return %arg0, %arg1, %c0_i32, %c0_i32_0 : i32, i32, i32, i32
  }
}

module attributes {stable_mosaic.version = 11 : i64} {
  func.func @_pw_kernel(%arg0: i32, %arg1: i32, %arg2: memref<1x32x256xf32, #tpu.memory_space<vmem>>, %arg3: memref<32x1xf32, #tpu.memory_space<vmem>>, %arg4: memref<32x1xf32, #tpu.memory_space<vmem>>, %arg5: memref<32x1xf32, #tpu.memory_space<vmem>>, %arg6: memref<1x1xf32, #tpu.memory_space<vmem>>, %arg7: memref<1x1x256xf32, #tpu.memory_space<vmem>>) attributes {dimension_semantics = [#tpu.dimension_semantics<parallel>, #tpu.dimension_semantics<parallel>], iteration_bounds = array<i64: 2, 1>, scalar_prefetch = 0 : i64, scratch_operands = 0 : i64, tpu.core_type = #tpu.core_type<tc>, window_params = [{transform_indices = @transform_0, window_bounds = array<i64: 1, 32, 256>}, {pipeline_mode = #tpu.pipeline_mode<synchronous>, transform_indices = @transform_1, window_bounds = array<i64: 32, 1>}, {pipeline_mode = #tpu.pipeline_mode<synchronous>, transform_indices = @transform_2, window_bounds = array<i64: 32, 1>}, {pipeline_mode = #tpu.pipeline_mode<synchronous>, transform_indices = @transform_3, window_bounds = array<i64: 32, 1>}, {pipeline_mode = #tpu.pipeline_mode<synchronous>, transform_indices = @transform_4, window_bounds = array<i64: 1, 1>}, {transform_indices = @transform_5, window_bounds = array<i64: 1, 1, 256>}]} {
    %c0 = arith.constant 0 : index
    %c0_0 = arith.constant 0 : index
    %c0_1 = arith.constant 0 : index
    %0 = vector.load %arg2[%c0, %c0_0, %c0_1] : memref<1x32x256xf32, #tpu.memory_space<vmem>>, vector<1x32x256xf32>
    %1 = vector.shape_cast %0 : vector<1x32x256xf32> to vector<32x256xf32>
    %c0_2 = arith.constant 0 : index
    %c0_3 = arith.constant 0 : index
    %2 = vector.load %arg3[%c0_2, %c0_3] : memref<32x1xf32, #tpu.memory_space<vmem>>, vector<32x1xf32>
    %3 = vector.broadcast %2 : vector<32x1xf32> to vector<32x256xf32>
    %4 = arith.mulf %1, %3 : vector<32x256xf32>
    %c0_4 = arith.constant 0 : index
    %c0_5 = arith.constant 0 : index
    %5 = vector.load %arg4[%c0_4, %c0_5] : memref<32x1xf32, #tpu.memory_space<vmem>>, vector<32x1xf32>
    %6 = vector.broadcast %5 : vector<32x1xf32> to vector<32x256xf32>
    %7 = arith.addf %4, %6 : vector<32x256xf32>
    %cst = arith.constant 0.000000e+00 : f32
    %8 = vector.broadcast %cst : f32 to vector<32x256xf32>
    %9 = arith.maximumf %7, %8 : vector<32x256xf32>
    %c0_6 = arith.constant 0 : index
    %c0_7 = arith.constant 0 : index
    %10 = vector.load %arg5[%c0_6, %c0_7] : memref<32x1xf32, #tpu.memory_space<vmem>>, vector<32x1xf32>
    %11 = vector.broadcast %10 : vector<32x1xf32> to vector<32x256xf32>
    %12 = arith.mulf %9, %11 : vector<32x256xf32>
    %cst_8 = arith.constant dense<0.000000e+00> : vector<256xf32>
    %13 = vector.multi_reduction <add>, %12, %cst_8 [0] : vector<32x256xf32> to vector<256xf32>
    %14 = vector.shape_cast %13 : vector<256xf32> to vector<1x256xf32>
    %c0_9 = arith.constant 0 : index
    %c0_10 = arith.constant 0 : index
    %15 = vector.load %arg6[%c0_9, %c0_10] : memref<1x1xf32, #tpu.memory_space<vmem>>, vector<1x1xf32>
    %16 = vector.broadcast %15 : vector<1x1xf32> to vector<1x256xf32>
    %17 = arith.addf %14, %16 : vector<1x256xf32>
    %c0_11 = arith.constant 0 : index
    %c0_12 = arith.constant 0 : index
    %c0_13 = arith.constant 0 : index
    %18 = vector.load %arg7[%c0_11, %c0_12, %c0_13] : memref<1x1x256xf32, #tpu.memory_space<vmem>>, vector<1x1x256xf32>
    %19 = vector.shape_cast %18 : vector<1x1x256xf32> to vector<1x256xf32>
    %20 = vector.shape_cast %17 : vector<1x256xf32> to vector<1x1x256xf32>
    tpu.vector_store %arg7[%c0_11, %c0_12, %c0_13], %20 {strides = array<i32>} : memref<1x1x256xf32, #tpu.memory_space<vmem>>, vector<1x1x256xf32>,
    return
  }
  func.func @transform_0(%arg0: i32, %arg1: i32) -> (i32, i32, i32) {
    %c0_i32 = arith.constant 0 : i32
    %c0_i32_0 = arith.constant 0 : i32
    return %arg0, %c0_i32, %arg1 : i32, i32, i32
  }
  func.func @transform_1(%arg0: i32, %arg1: i32) -> (i32, i32) {
    %c0_i32 = arith.constant 0 : i32
    %c0_i32_0 = arith.constant 0 : i32
    %c0_i32_1 = arith.constant 0 : i32
    return %c0_i32, %c0_i32_0 : i32, i32
  }
  func.func @transform_2(%arg0: i32, %arg1: i32) -> (i32, i32) {
    %c0_i32 = arith.constant 0 : i32
    %c0_i32_0 = arith.constant 0 : i32
    %c0_i32_1 = arith.constant 0 : i32
    return %c0_i32, %c0_i32_0 : i32, i32
  }
  func.func @transform_3(%arg0: i32, %arg1: i32) -> (i32, i32) {
    %c0_i32 = arith.constant 0 : i32
    %c0_i32_0 = arith.constant 0 : i32
    %c0_i32_1 = arith.constant 0 : i32
    return %c0_i32, %c0_i32_0 : i32, i32
  }
  func.func @transform_4(%arg0: i32, %arg1: i32) -> (i32, i32) {
    %c0_i32 = arith.constant 0 : i32
    %c0_i32_0 = arith.constant 0 : i32
    %c0_i32_1 = arith.constant 0 : i32
    return %c0_i32, %c0_i32_0 : i32, i32
  }
  func.func @transform_5(%arg0: i32, %arg1: i32) -> (i32, i32, i32) {
    %c0_i32 = arith.constant 0 : i32
    %c0_i32_0 = arith.constant 0 : i32
    return %arg0, %c0_i32, %arg1 : i32, i32, i32
  }
}

</mosaic_0001>

<bundles_post_ra>
// kernel: local_refine_forward.6
= control target key start
LH: loop header
LB: loop body
LE: loop exit
PB: predicated region body
PF: predicated region fallthrough
CT: control target
= control target key end

     0   :  { %s883_s24 = smov 0   ;;  %s885_s25 = smov 0   ;;  %s975_s0 = inlined_call_operand.vmem [shape: f32[2,5,256], index: 0, kind: input, shape index: {}]   ;;  %s976_s1 = inlined_call_operand.vmem [shape: f32[5,1], index: 1, kind: input, shape index: {}]   ;;  %s977_s2 = inlined_call_operand.vmem [shape: f32[5,1], index: 2, kind: input, shape index: {}]   ;;  %s978_s3 = inlined_call_operand.vmem [shape: f32[32,5], index: 3, kind: input, shape index: {}]   ;;  %s979_s4 = inlined_call_operand.vmem [shape: f32[32,1], index: 4, kind: input, shape index: {}]   ;;  %s980_s5 = inlined_call_operand.vmem [shape: f32[2,32,256], index: 5, kind: output, shape index: {0}]   ;;  %s981_s6 = inlined_call_operand.vmem [shape: f32[2,1,32,1], index: 6, kind: output, shape index: {1}]   ;;  %s982_s7 = inlined_call_operand.vmem [shape: f32[2,1,32,1], index: 7, kind: output, shape index: {2}]  }
   0x1   :  { %s887_s26 = smov 0  }
   0x2 LB: > { %s30_s27 = sadd.s32 1, %s835_s25  ;;  %p766_p0 = scmp.ge.s32.totalorder %s839_s26, 1  ;;  %s839_s26 = sphi %s887_s26, %s18_s26   ;;  %s835_s25 = sphi %s885_s25, %s984_s25   ;;  %s831_s24 = sphi %s883_s24, %s983_s24  }
   0x3   : > { %p32_p1 = scmp.ge.s32.totalorder %s30_s27, 2  ;;  %p267_p2 = scmp.lt.s32.totalorder %s839_s26, 3 }
   0x5   : > { %s986_s27 = smov (%p32_p1, %s30_s27), 0  ;;  %p268_p3 = pnand %p766_p0, %p267_p2 }
   0x6   : > { %v365_v0 = vld [vmem:[%s976_s1] sm:$0x1f] (!%p268_p3)  ;;  %v841_v1 = vmov (!%p268_p3), 0   ;;  %v389_v3 = vld [vmem:[%s979_s4 + $0x10] sm:$0xff] (!%p268_p3)  ;;  %v842_v4 = vmov (!%p268_p3), 0.0   ;;  %v388_v6 = vld [vmem:[%s979_s4 + $0x8] sm:$0xff] (!%p268_p3) }
   0x7   : > { %271 = sbr.rel (%p268_p3) target bundleno = 522 (0x20a), region = 40  ;;  %815 = vset.pattern.permute.xlu0 (!%p268_p3), %v841_v1  ;;  %816 = vset.pattern.permute.xlu1 (!%p268_p3), %v841_v1  ;;  %v373_v2 = vld [vmem:[%s977_s2] sm:$0x1f] (!%p268_p3)  ;;  %v390_v7 = vld [vmem:[%s979_s4 + $0x18] sm:$0xff] (!%p268_p3)  ;;  %p326_p4 = scmp.lt.s32.totalorder (!%p268_p3), %s831_s24, 1  ;;  %vm424_vm0 = vcmask (!%p268_p3), 1044480  }
   0x8   : > { %368 = vperm.xlu0 (!%p268_p3), %815, %v365_v0   ;;  %495 = vmatprep.mubr.f32.mxu0 (!%p268_p3), %v842_v4  ;;  %v387_v5 = vld [vmem:[%s979_s4] sm:$0xff] (!%p268_p3)  ;;  %vm411_vm1 = vcmask (!%p268_p3), 39936   ;;  %v385_v19 = vld [vmem:[%s978_s3 + $0x10] sm:$0xff] (!%p268_p3)  ;;  %v384_v20 = vld [vmem:[%s978_s3 + $0x8] sm:$0xff] (!%p268_p3)  ;;  %vm540_vm2 = vcmask (!%p268_p3), 7168  }
   0x9   : > { %507 = vmatprep.mubr.f32.mxu1 (!%p268_p3), %v842_v4  ;;  %393 = vperm.xlu1 (!%p268_p3), %816, %v387_v5   ;;  %v383_v18 = vld [vmem:[%s978_s3] sm:$0xff] (!%p268_p3)  ;;  %v386_v21 = vld [vmem:[%s978_s3 + $0x18] sm:$0xff] (!%p268_p3) }
   0xc   : > { %376 = vperm.xlu0 (!%p268_p3), %815, %v373_v2  }
   0xd   : > { %398 = vperm.xlu1 (!%p268_p3), %816, %v388_v6  }
   0xe   : > { %s988_s24 = smov (!%p326_p4, %s831_s24), 1 }
   0xf   : > { %s783_s17 = sshll.u32 %s988_s24, 4  ;;  %s784_s10 = sshll.u32 %s988_s24, 6 }
  0x10   : > { %403 = vperm.xlu0 %815, %v389_v3   ;;  %s333_s20 = scalar_lea.vmem %s975_s0, %s783_s17  ;;  %s941_s13 = scalar_lea.vmem %s980_s5, %s784_s10 }
  0x11   : > { %408 = vperm.xlu1 %816, %v390_v7   ;;  %v363_v9 = vld [vmem:[%s333_s20] sm:$0x1f]  ;;  %v364_v10 = vld [vmem:[%s333_s20 + $0x8] sm:$0x1f]  ;;  %s785_s14 = sshll.u32 %s988_s24, 5 }
  0x12   : > { %s353_s17 = scalar_lea.vmem %s981_s6, %s785_s14  ;;  %s362_s20 = scalar_lea.vmem %s982_s7, %s785_s14 }
  0x87   : > { %v369_v8 = vpop.permute.xlu0 %368 }
  0x88   : > { %v371_v11 = vmul.f32 %v369_v8, %v363_v9  ;;  %v372_v12 = vmul.f32 %v369_v8, %v364_v10  ;;  %v394_v22 = vpop.permute.xlu1 %393 }
  0x8b   : > { %v377_v13 = vpop.permute.xlu0 %376 }
  0x8c   : > { %v379_v14 = vadd.f32 %v377_v13, %v371_v11  ;;  %v380_v15 = vadd.f32 %v377_v13, %v372_v12  ;;  %v399_v23 = vpop.permute.xlu1 %398 }
  0x8e   : > { %v381_v16 = vmax.f32 %v379_v14, 0.0  ;;  %v382_v17 = vmax.f32 %v380_v15, 0.0 }
  0x8f   : > { %v404_v24 = vpop.permute.xlu0 %403 }
  0x90   : > { %775 = vmatprep.subr.msk.mxu0 %vm424_vm0, %v382_v17  ;;  %787 = vmatprep.subr.msk.mxu1 %vm424_vm0, %v382_v17  ;;  %v409_v33 = vpop.permute.xlu1 %408 }
  0x91   : > { %776 = vmatpush1.msk.msra.mxu0 %vm424_vm0, %v381_v16  ;;  %788 = vmatpush1.msk.msra.mxu1 %vm424_vm0, %v381_v16 }
  0x92   : > { %777 = vmatmul.mubr.msk.f32.vlgmr.msra.gmra.mrb[0].mxu0 %vm411_vm1, %v383_v18  ;;  %779 = vmatmul.mubr.msk.f32.vlgmr.msra.gmra.mrb[0].mxu1 %vm411_vm1, %v385_v19 }
  0x93   : > { %501 = vmatprep.mubr.f32.mxu0 %v842_v4  ;;  %513 = vmatprep.mubr.f32.mxu1 %v842_v4 }
  0x96   : > { %778 = vmatmul.mubr.msk.f32.gmra.mrb[2].mxu0 %vm411_vm1, %v384_v20  ;;  %780 = vmatmul.mubr.msk.f32.gmra.mrb[2].mxu1 %vm411_vm1, %v386_v21 }
 0x165   : > { %v497_v25 = vpop.f32.mrb[0].mxu0  ;;  %v509_v26 = vpop.f32.mrb[0].mxu1 }
 0x166   : > { %v498_v27 = vadd.f32 %v497_v25, %v394_v22  ;;  %v510_v28 = vadd.f32 %v509_v26, %v404_v24  ;;  %v499_v29 = vpop.f32.mrb[1].mxu0  ;;  %v511_v30 = vpop.f32.mrb[1].mxu1 }
 0x167   : > { %v500_v31 = vadd.f32 %v499_v29, %v394_v22  ;;  %v512_v32 = vadd.f32 %v511_v30, %v404_v24 }
 0x168   : > { %520 = vst [vmem:[%s941_s13] sm:$0xff] %v498_v27  ;;  %524 = vst [vmem:[%s941_s13 + $0x20] sm:$0xff] %v510_v28  ;;  %v545_v34 = vmul.f32 %v498_v27, %v498_v27  ;;  %v549_v35 = vmul.f32 %v510_v28, %v510_v28 }
 0x169   : > { %521 = vst [vmem:[%s941_s13 + $0x8] sm:$0xff] %v500_v31  ;;  %525 = vst [vmem:[%s941_s13 + $0x28] sm:$0xff] %v512_v32  ;;  %v503_v36 = vpop.f32.mrb[2].mxu0  ;;  %v515_v37 = vpop.f32.mrb[2].mxu1  ;;  %v528_v38 = vadd.f32 %v500_v31, %v498_v27  ;;  %v546_v39 = vmul.f32 %v500_v31, %v500_v31  ;;  %v534_v40 = vadd.f32 %v512_v32, %v510_v28 }
 0x16a   : > { %v550_v41 = vmul.f32 %v512_v32, %v512_v32  ;;  %v504_v42 = vadd.f32 %v503_v36, %v399_v23  ;;  %v516_v43 = vadd.f32 %v515_v37, %v409_v33  ;;  %v505_v44 = vpop.f32.mrb[3].mxu0  ;;  %v517_v45 = vpop.f32.mrb[3].mxu1 }
 0x16b   : > { %v506_v46 = vadd.f32 %v505_v44, %v399_v23  ;;  %v518_v47 = vadd.f32 %v517_v45, %v409_v33  ;;  %529 = vadd.xlane.f32.xlu0 %v528_v38  ;;  %v553_v48 = vadd.f32 %v546_v39, %v545_v34 }
 0x16c   : > { %v559_v49 = vadd.f32 %v550_v41, %v549_v35  ;;  %522 = vst [vmem:[%s941_s13 + $0x10] sm:$0xff] %v504_v42  ;;  %526 = vst [vmem:[%s941_s13 + $0x30] sm:$0xff] %v516_v43  ;;  %v547_v50 = vmul.f32 %v504_v42, %v504_v42  ;;  %v551_v51 = vmul.f32 %v516_v43, %v516_v43 }
 0x16d   : > { %523 = vst [vmem:[%s941_s13 + $0x18] sm:$0xff] %v506_v46  ;;  %527 = vst [vmem:[%s941_s13 + $0x38] sm:$0xff] %v518_v47  ;;  %554 = vadd.xlane.f32.xlu1 %v553_v48  ;;  %v531_v52 = vadd.f32 %v506_v46, %v504_v42  ;;  %v537_v53 = vadd.f32 %v518_v47, %v516_v43  ;;  %v548_v54 = vmul.f32 %v506_v46, %v506_v46 }
 0x16e   : > { %v552_v55 = vmul.f32 %v518_v47, %v518_v47 }
 0x16f   : > { %535 = vadd.xlane.f32.xlu0 %v534_v40  ;;  %v556_v56 = vadd.f32 %v548_v54, %v547_v50 }
 0x170   : > { %v562_v57 = vadd.f32 %v552_v55, %v551_v51 }
 0x171   : > { %532 = vadd.xlane.f32.xlu1 %v531_v52 }
 0x173   : > { %538 = vadd.xlane.f32.xlu0 %v537_v53 }
 0x175   : > { %560 = vadd.xlane.f32.xlu1 %v559_v49 }
 0x177   : > { %557 = vadd.xlane.f32.xlu0 %v556_v56 }
 0x17b   : > { %563 = vadd.xlane.f32.xlu0 %v562_v57 }
 0x1f8   : > { %v530_v58 = vpop.xlane.xlu0 %529 }
 0x1f9   : > { %541 = vst.msk [vmem:[%s353_s17] sm:$0xff] %vm540_vm2, %v530_v58 }
 0x1fa   : > { %v555_v59 = vpop.xlane.xlu1 %554 }
 0x1fb   : > { %565 = vst.msk [vmem:[%s362_s20] sm:$0xff] %vm540_vm2, %v555_v59 }
 0x1fc   : > { %v536_v60 = vpop.xlane.xlu0 %535 }
 0x1fd   : > { %543 = vst.msk [vmem:[%s353_s17 + $0x10] sm:$0xff] %vm540_vm2, %v536_v60 }
 0x1fe   : > { %v533_v61 = vpop.xlane.xlu1 %532 }
 0x1ff   : > { %542 = vst.msk [vmem:[%s353_s17 + $0x8] sm:$0xff] %vm540_vm2, %v533_v61 }
 0x200   : > { %v539_v62 = vpop.xlane.xlu0 %538 }
 0x201   : > { %544 = vst.msk [vmem:[%s353_s17 + $0x18] sm:$0xff] %vm540_vm2, %v539_v62 }
 0x202   : > { %v561_v63 = vpop.xlane.xlu1 %560 }
 0x203   : > { %567 = vst.msk [vmem:[%s362_s20 + $0x10] sm:$0xff] %vm540_vm2, %v561_v63 }
 0x204   : > { %v558_v0 = vpop.xlane.xlu0 %557 }
 0x205   : > { %566 = vst.msk [vmem:[%s362_s20 + $0x8] sm:$0xff] %vm540_vm2, %v558_v0 }
 0x208   : > { %v564_v1 = vpop.xlane.xlu0 %563 }
 0x209   : > { %568 = vst.msk [vmem:[%s362_s20 + $0x18] sm:$0xff] %vm540_vm2, %v564_v1 }
 0x20a PF: > { %s18_s26 = sadd.s32 1, %s839_s26   ;;  %s983_s24 = smov %s835_s25 }
 0x20b   : > { %p15_p5 = scmp.ge.s32.totalorder %s18_s26, 4   ;;  %s984_s25 = smov %s986_s27 }
 0x20d   :  { %17 = sbr.rel (!%p15_p5) target bundleno = 2 (0x2), region = 94 }

// kernel: local_refine_forward.5
= control target key start
LH: loop header
LB: loop body
LE: loop exit
PB: predicated region body
PF: predicated region fallthrough
CT: control target
= control target key end

     0   :  { %s2715_s0 = inlined_call_operand.hbm [shape: f32[2,5,16,16], index: 0, kind: input, shape index: {}]   ;;  %s2716_s1 = inlined_call_operand.vmem [shape: f32[125], index: 1, kind: input, shape index: {}]   ;;  %s2717_s2 = inlined_call_operand.vmem [shape: f32[5], index: 2, kind: input, shape index: {}]   ;;  %s2718_s3 = inlined_call_operand.vmem [shape: f32[5], index: 3, kind: input, shape index: {}]   ;;  %s2719_s4 = inlined_call_operand.vmem [shape: f32[5], index: 4, kind: input, shape index: {}]   ;;  %s2720_s5 = inlined_call_operand.vmem [shape: f32[2,5,16,16], index: 5, kind: output, shape index: {0}]   ;;  %s2721_s6 = inlined_call_operand.vmem [shape: f32[2,5,1,1], index: 6, kind: output, shape index: {1}]   ;;  %s2722_s7 = inlined_call_operand.vmem [shape: f32[2,5,1,1], index: 7, kind: output, shape index: {2}]  }
   0x1   :  { %2729 = sst [smem:[#allocation18_spill]] %s2716_s1 }
   0x2   :  { %2730 = sst [smem:[#allocation19_spill]] %s2717_s2 }
   0x3   :  { %2731 = sst [smem:[#allocation20_spill]] %s2718_s3 }
   0x4   :  { %2732 = sst [smem:[#allocation21_spill]] %s2719_s4 }
   0x5   :  { %13 = vsyncpa [#allocation4], 0 }
   0x6   :  { %15 = vsyncpa [#allocation4 + $0x1], 0 }
   0x7   :  { %16 = vsyncpa [#allocation5], 0 }
   0x8   :  { %17 = vsyncpa [#allocation8], 0 }
   0x9   :  { %18 = vsyncpa [#allocation11], 0  ;;  %s1975_s24 = smov 0   ;;  %s1977_s25 = smov 0  }
   0xa   :  { %s1979_s26 = smov 0   ;;  %s1981_s27 = smov 0  }
   0xb   :  { %s1983_s28 = smov 0   ;;  %s1985_s29 = smov 0  }
   0xc   :  { %s1987_s30 = smov 0   ;;  %s1989_s8 = smov 0  }
   0xd LB: > { %2733 = sst [smem:[#allocation16_spill]] %s1912_s29  ;;  %s1608_s9 = sadd.s32 4294967295, %s1920_s8   ;;  %s1920_s8 = sphi %s1989_s8, %s24_s8   ;;  %s1916_s30 = sphi %s1987_s30, %s2754_s30   ;;  %s1912_s29 = sphi %s1985_s29, %s2749_s29   ;;  %s1908_s28 = sphi %s1983_s28, %s2753_s28   ;;  %s1904_s27 = sphi %s1981_s27, %s2748_s27   ;;  %s1900_s26 = sphi %s1979_s26, %s2752_s26   ;;  %s1896_s25 = sphi %s1977_s25, %s2751_s25   ;;  %s1892_s24 = sphi %s1975_s24, %s2750_s24  }
   0xe   : > { %p58_p0 = scmp.ne.s32.totalorder %s1896_s25, %s1892_s24  ;;  %p2015_p1 = scmp.eq.s32.totalorder %s1608_s9, 0 }
   0xf   : > { %p1610_p2 = scmp.ge.s32.totalorder %s1920_s8, 1  ;;  %p237_p3 = scmp.lt.s32.totalorder %s1920_s8, 11 }
  0x10   : > { %s2734_s10 = scalar_select %p2015_p1, 1, 0 }
  0x11   : > { %p2023_p4 = por %p2015_p1, %p58_p0  ;;  %s2736_s2 = sld [smem:[#allocation19_spill]] }
  0x12   : > { %p2030_p5 = pnand %p1610_p2, %p237_p3  ;;  %s2739_s1 = sld [smem:[#allocation18_spill]] }
  0x13   : > { %s2735_s11 = scalar_select %p2023_p4, 1, 0 }
  0x14   : > { %s2737_s15 = scalar_select %p2030_p5, 1, 0 }
  0x15   : > { %p1650_p6 = pneg %p2030_p5 }
  0x17   : > { %s261_s14 = sshll.u32 %s2736_s2, 4  ;;  %p2038_p7 = pnand %p1650_p6, %p2015_p1  ;;  %s262_s14 = int_to_ptr.vmem [resolvable:$true] %s261_s14 }
  0x18   : > { %s250_s19 = sshll.u32 %s2739_s1, 4  ;;  %s1752_s20 = scalar_lea.vmem %s262_s14, 16  ;;  %s251_s19 = int_to_ptr.vmem [resolvable:$true] %s250_s19 }
  0x19   : > { %p1753_p8 = scmp.ne.s32.totalorder %s262_s14, %s1752_s20  ;;  %p1754_p9 = pneg %p2038_p7 }
  0x1a   : > { %p1760_p12 = scmp.lt.s32.totalorder %s262_s14, %s262_s14  ;;  %p1761_p13 = scmp.lt.s32.totalorder %s1752_s20, %s1752_s20 }
  0x1b   : > { %p1755_p10 = pnand %p1754_p9, %p1753_p8 }
  0x1c   : > { %p1762_p0 = por %p1761_p13, %p1760_p12 }
  0x1d   : > { %p1756_p11 = pneg %p1755_p10 }
  0x1f   : > { %p1763_p2 = pnand %p1762_p0, %p1756_p11 }
  0x21   : > { %1766 = shalt.err (!%p1763_p2)
}
  0x22   : > { %s1922_s21 = smov [#allocation7]   ;;  %s1767_s22 = scalar_lea.vmem %s251_s19, 16 }
  0x23   : > { %1656 = dma.vmem_to_smem (!%p2038_p7), %s262_s14, 16, %s1922_s21, [#allocation8]  }
  0x24   : > { %p1768_p3 = scmp.ne.s32.totalorder %s251_s19, %s1767_s22  ;;  %p1775_p4 = scmp.lt.s32.totalorder %s251_s19, %s251_s19 }
  0x25   : > { %p1776_p5 = scmp.lt.s32.totalorder %s1767_s22, %s1767_s22 }
  0x26   : > { %p1770_p6 = pnand %p1768_p3, %p1754_p9 }
  0x27   : > { %p1777_p8 = por %p1776_p5, %p1775_p4 }
  0x28   : > { %p1771_p1 = pneg %p1770_p6 }
  0x2a   : > { %p1778_p10 = pnand %p1777_p8, %p1771_p1 }
  0x2c   : > { %1781 = shalt.err (!%p1778_p10)
}
  0x2d   : > { %s1923_s23 = smov [#allocation6]   ;;  %s2740_s3 = sld [smem:[#allocation20_spill]] }
  0x2e   : > { %1653 = dma.vmem_to_smem (!%p2038_p7), %s251_s19, 16, %s1923_s23, [#allocation5]  }
  0x2f   : > { %s2741_s4 = sld [smem:[#allocation21_spill]] }
  0x33   : > { %s272_s12 = sshll.u32 %s2740_s3, 4  ;;  %s273_s12 = int_to_ptr.vmem [resolvable:$true] %s272_s12 }
  0x34   : > { %s1782_s18 = scalar_lea.vmem %s273_s12, 16  ;;  %p1790_p5 = scmp.lt.s32.totalorder %s273_s12, %s273_s12 }
  0x35   : > { %s283_s17 = sshll.u32 %s2741_s4, 4  ;;  %p1783_p11 = scmp.ne.s32.totalorder %s273_s12, %s1782_s18  ;;  %s284_s17 = int_to_ptr.vmem [resolvable:$true] %s283_s17 }
  0x36   : > { %p1791_p12 = scmp.lt.s32.totalorder %s1782_s18, %s1782_s18 }
  0x37   : > { %p1785_p1 = pnand %p1783_p11, %p1754_p9 }
  0x38   : > { %p1792_p13 = por %p1791_p12, %p1790_p5 }
  0x39   : > { %p1786_p4 = pneg %p1785_p1 }
  0x3b   : > { %p1793_p0 = pnand %p1792_p13, %p1786_p4 }
  0x3d   : > { %1796 = shalt.err (!%p1793_p0)
}
  0x3e   : > { %s1924_s19 = smov [#allocation9]   ;;  %s1797_s20 = scalar_lea.vmem %s284_s17, 16 }
  0x3f   : > { %1659 = dma.vmem_to_smem (!%p2038_p7), %s273_s12, 16, %s1924_s19, [#allocation8]  }
  0x40   : > { %p1798_p2 = scmp.ne.s32.totalorder %s284_s17, %s1797_s20  ;;  %p1805_p8 = scmp.lt.s32.totalorder %s284_s17, %s284_s17 }
  0x41   : > { %p1806_p10 = scmp.lt.s32.totalorder %s1797_s20, %s1797_s20 }
  0x42   : > { %p1800_p3 = pnand %p1798_p2, %p1754_p9 }
  0x43   : > { %p1807_p11 = por %p1806_p10, %p1805_p8 }
  0x44   : > { %p1801_p6 = pneg %p1800_p3 }
  0x46   : > { %p1808_p1 = pnand %p1807_p11, %p1801_p6 }
  0x48   : > { %1811 = shalt.err (!%p1808_p1)
}
  0x49   : > { %s1925_s21 = smov [#allocation10]   ;;  %s33_s22 = sadd.s32 1, %s1912_s29 }
  0x4a   : > { %1662 = dma.vmem_to_smem (!%p2038_p7), %s284_s17, 16, %s1925_s21, [#allocation11]  }
  0x4b   : > { %s36_s23 = sadd.s32 1, %s1916_s30  ;;  %p34_p9 = scmp.ge.s32.totalorder %s33_s22, 5 }
  0x4c   : > { %s45_s24 = sadd.s32 1, %s1900_s26  ;;  %p52_p4 = scmp.ne.s32.totalorder %s1900_s26, %s1896_s25 }
  0x4d   : > { %p53_p5 = scmp.eq.s32.totalorder %s1920_s8, 0  ;;  %s2756_s22 = smov (%p34_p9, %s33_s22), 0 }
  0x4e   : > { %2742 = sst [smem:[#allocation17_spill]] %s2756_s22  ;;  %s2758_s23 = smov (!%p34_p9, %s36_s23), %s1916_s30 }
  0x4f   : > { %s41_s16 = ssub.s32 %s1912_s29, %s2756_s22  ;;  %p2084_p12 = por %p53_p5, %p52_p4 }
  0x50   : > { %p38_p13 = scmp.ge.s32.totalorder %s2758_s23, 2  ;;  %p1671_p7 = scmp.lt.s32.totalorder %s1920_s8, 10 }
  0x51   : > { %s294_s12 = sand.u32 1, %s1900_s26   ;;  %s1617_s13 = sshll.u32 %s1912_s29, 1 }
  0x52   : > { %s2760_s23 = smov (%p38_p13, %s2758_s23), 0  ;;  %s1616_s14 = sshll.u32 %s294_s12, 4 }
  0x53   : > { %s40_s17 = ssub.s32 %s1916_s30, %s2760_s23  ;;  %s1629_s19 = smul.u32 10, %s1916_s30 }
  0x54   : > { %s42_s18 = sor.u32 %s41_s16, %s40_s17  ;;  %s298_s20 = scalar_lea.vmem [#allocation3], %s1616_s14 }
  0x55   : > { %p43_p0 = scmp.eq.s32.totalorder %s42_s18, 0  ;;  %s307_s21 = sshll.u32 %s298_s20, 4  ;;  %s2096_s21 = int_to_ptr.vmem [resolvable:$true] %s307_s21 }
  0x56   : > { %s304_s1 = sadd.s32 %s1629_s19, %s1617_s13  ;;  %p2105_p2 = pnand %p1671_p7, %p2084_p12 }
  0x57   : > { %s2099_s2 = scalar_select %p43_p0, %s1900_s26, %s45_s24  }
  0x58   : > { %s1618_s3 = sshll.u32 %s304_s1, 7  ;;  %s2114_s24 = scalar_lea.sflag [#allocation4], %s294_s12 }
  0x59   : > { %s2112_s16 = scalar_lea.hbm %s2715_s0, %s1618_s3  ;;  %p1814_p6 = pneg %p2105_p2 }
  0x5a   : > { %s1812_s1 = scalar_lea.hbm %s2112_s16, 256  ;;  %s1817_s22 = scalar_lea.hbm %s2715_s0, 2560 }
  0x5b   : > { %p1813_p3 = scmp.ne.s32.totalorder %s2112_s16, %s1812_s1  ;;  %p1818_p11 = scmp.lt.u32.totalorder %s2112_s16, %s2715_s0 }
  0x5c   : > { %p1819_p1 = scmp.lt.u32.totalorder %s1817_s22, %s1812_s1  ;;  %p1821_p4 = scmp.lt.u32.totalorder %s1812_s1, %s2112_s16 }
  0x5d   : > { %p1815_p8 = pnand %p1814_p6, %p1813_p3 }
  0x5e   : > { %p1820_p9 = por %p1819_p1, %p1818_p11 }
  0x5f   : > { %p1816_p10 = pneg %p1815_p8 }
  0x60   : > { %p1822_p5 = por %p1821_p4, %p1820_p9 }
  0x62   : > { %p1823_p12 = pnand %p1822_p5, %p1816_p10 }
  0x64   : > { %1826 = shalt.err (!%p1823_p12)
}
  0x65   : > { %s1827_s12 = scalar_lea.vmem %s2096_s21, 256  ;;  %s1926_s14 = smov [#allocation3]  }
  0x66   : > { %p1828_p13 = scmp.ne.s32.totalorder %s2096_s21, %s1827_s12  ;;  %s1832_s17 = sshll.u32 %s1926_s14, 4  ;;  %s1833_s17 = int_to_ptr.vmem [resolvable:$false] %s1832_s17 }
  0x67   : > { %s1834_s18 = scalar_lea.vmem %s1833_s17, 512  ;;  %p1835_p3 = scmp.lt.s32.totalorder %s2096_s21, %s1833_s17 }
  0x68   : > { %p1830_p7 = pnand %p1828_p13, %p1814_p6  ;;  %p1836_p8 = scmp.lt.s32.totalorder %s1834_s18, %s1827_s12 }
  0x6a   : > { %p1831_p0 = pneg %p1830_p7  ;;  %p1837_p11 = por %p1836_p8, %p1835_p3 }
  0x6c   : > { %p1838_p1 = pnand %p1837_p11, %p1831_p0 }
  0x6e   : > { %1841 = shalt.err (!%p1838_p1)
}
  0x6f   : > { %s1927_s19 = smov 128   ;;  %s1928_s20 = smov 8  }
  0x70   : > { %1666 = dma.hbm_to_vmem [thread:$0]  (!%p2105_p2), %s2112_s16, 256, %s2096_s21, %s2114_s24, %s1927_s19, %s1927_s19, %s1928_s20  }
  0x71   : > { %p2745_p6 = scmp.ne.s32.totalorder %s2737_s15, 0 }
  0x72   : > { %s321_s1 = sand.u32 (!%p2745_p6), 1, %s1896_s25   ;;  %p2746_p10 = scmp.ne.s32.totalorder (!%p2745_p6), %s2735_s11, 0 }
  0x73   : > { %319 = sbr.rel (%p2745_p6) target bundleno = 704 (0x2c0), region = 40  ;;  %s1620_s9 = sshll.u32 (!%p2745_p6), %s321_s1, 4 }
  0x74   : > { %s322_s29 = scalar_lea.sflag (!%p2745_p6), [#allocation4], %s321_s1  ;;  %s325_s22 = scalar_lea.vmem (!%p2745_p6), [#allocation3], %s1620_s9 }
  0x7a   : > { %1875 = dma.done.wait (%p2746_p10), %s322_s29, 256  }
  0x7b   : > { %1877 = vsyncadd (%p2746_p10), %s322_s29, 4294967040  ;;  %p2747_p9 = scmp.ne.s32.totalorder %s2734_s10, 0 }
  0x7d   : > { %1879 = dma.done.wait (%p2747_p9), [#allocation5], 16  }
  0x7e   : > { %1881 = vsyncadd (%p2747_p9), [#allocation5], 4294967280 }
  0x7f   : > { %1883 = dma.done.wait (%p2747_p9), [#allocation8], 32  }
  0x80   : > { %1885 = vsyncadd (%p2747_p9), [#allocation8], 4294967264 }
  0x81   : > { %1887 = dma.done.wait (%p2747_p9), [#allocation11], 16  }
  0x82   : > { %1889 = vsyncadd (%p2747_p9), [#allocation11], 4294967280 }
  0x83   : > { %346 = sfence }
  0x84   : > { %s2162_s4 = smul.u32 25, %s1904_s27  ;;  %vm417_vm0 = vcmask 195584   ;;  %vm425_vm1 = vcmask 130048   ;;  %v414_v0 = vld [vmem:[%s325_s22] sm:$0xff]  ;;  %v1929_v1 = vmov 0.0   ;;  %v415_v2 = vld [vmem:[%s325_s22 + $0x8] sm:$0xff] }
  0x85   : > { %419 = vst [vmem:[#allocation2 + $0x10] sm:$0xff] %v1929_v1  ;;  %416 = vst [vmem:[#allocation2] sm:$0xff] %v1929_v1  ;;  %s1930_s12 = smov 127   ;;  %vm583_vm2 = vcmask 1046528   ;;  %vm758_vm3 = vcmask 1045504   ;;  %vm917_vm4 = vcmask 1044480  }
  0x86   : > { %421 = vst [vmem:[#allocation2 + $0x20] sm:$0xff] %v1929_v1  ;;  %423 = vst [vmem:[#allocation2 + $0x30] sm:$0xff] %v1929_v1  ;;  %s449_s10 = sadd.s32 1, %s2162_s4  ;;  %s429_s11 = sld [smem:[#allocation6 + %s2162_s4]]  ;;  %vm1098_vm5 = vcmask 1043456   ;;  %vm476_vm6 = vcmask 1039360  }
  0x87   : > { %418 = vst.msk [vmem:[#allocation2 + $0x8] sm:$0xff] %vm417_vm0, %v1929_v1  ;;  %420 = vst.msk [vmem:[#allocation2 + $0x18] sm:$0xff] %vm417_vm0, %v1929_v1  ;;  %s450_s15 = sld [smem:[#allocation6 + %s449_s10]]  ;;  %s492_s21 = sadd.s32 2, %s2162_s4  ;;  %vm1286_vm7 = vcmask 15360   ;;  %vm1293_vm8 = vcmask 130054  }
  0x88   : > { %422 = vst.msk [vmem:[#allocation2 + $0x28] sm:$0xff] %vm417_vm0, %v1929_v1  ;;  %424 = vst.msk [vmem:[#allocation2 + $0x38] sm:$0xff] %vm417_vm0, %v1929_v1  ;;  %s564_s16 = sadd.s32 5, %s2162_s4  ;;  %s493_s24 = sld [smem:[#allocation6 + %s492_s21]]  ;;  %vm1296_vm9 = vcmask 128000   ;;  %vm1349_vm10 = vcmask 1041408  }
  0x89   : > { %426 = vst.msk [vmem:[#allocation2 + $0x18] sm:$0xff] %vm425_vm1, %v414_v0  ;;  %427 = vst.msk [vmem:[#allocation2 + $0x28] sm:$0xff] %vm425_vm1, %v415_v2  ;;  %s565_s3 = sld [smem:[#allocation6 + %s564_s16]]  ;;  %s516_s13 = sadd.s32 3, %s2162_s4  ;;  %vm1364_vm11 = vcmask 0  }
  0x8a   : > { %s517_s14 = sld [smem:[#allocation6 + %s516_s13]]  ;;  %s540_s17 = sadd.s32 4, %s2162_s4 }
  0x8b   : > { %s606_s18 = sadd.s32 6, %s2162_s4  ;;  %s541_s19 = sld [smem:[#allocation6 + %s540_s17]] }
  0x8c   : > { %v430_v3 = vld [vmem:[#allocation2] sm:$0xc0]  ;;  %v2170_v4 = vstv %s429_s11  ;;  %s607_s20 = sld [smem:[#allocation6 + %s606_s18]]  ;;  %s821_s1 = sadd.s32 12, %s2162_s4 }
  0x8d   : > { %v451_v6 = vstv %s450_s15  ;;  %v2173_v7 = vmul.f32 %v2170_v4, %v430_v3  ;;  %v434_v14 = vld [vmem:[#allocation2 + $0x20] sm:$0x3f]  ;;  %v566_v18 = vld [vmem:[#allocation2] sm:$0x80]  ;;  %s846_s9 = sadd.s32 13, %s2162_s4  ;;  %s871_s29 = sadd.s32 14, %s2162_s4 }
  0x8e   : > { %v431_v5 = vld [vmem:[#allocation2 + $0x8] sm:$0xc0]  ;;  %v454_v10 = vmul.f32 0.0, %v451_v6  ;;  %v452_v11 = vmul.f32 %v451_v6, %v430_v3  ;;  %v2193_v17 = vmul.f32 %v2170_v4, %v434_v14  ;;  %v456_v21 = vmul.f32 %v451_v6, %v434_v14  ;;  %s2213_s22 = sld [smem:[#allocation6 + %s821_s1]]  ;;  %s1931_s15 = smov 126  }
  0x8f   : > { %v2178_v9 = vmul.f32 %v2170_v4, %v431_v5  ;;  %v453_v12 = vmul.f32 %v451_v6, %v431_v5  ;;  %v2195_v19 = vstv %s565_s3  ;;  %v494_v24 = vstv %s493_s24  ;;  %s2215_s10 = sld [smem:[#allocation6 + %s846_s9]]  ;;  %s896_s21 = sadd.s32 15, %s2162_s4  ;;  %v2224_v33 = vld [vmem:[#allocation2 + $0x8] sm:$0x80]  ;;  %v2230_v37 = vld [vmem:[#allocation2 + $0x20] sm:$0x7f] }
  0x90   : > { %v2175_v8 = vld [vmem:[#allocation2 + $0x18] sm:$0xff]  ;;  %468 = vrot.lane.b32.xlu1 %v454_v10, %s1930_s12  ;;  %464 = vrot.lane.b32.xlu0 %v452_v11, %s1930_s12  ;;  %v2184_v15 = vld [vmem:[#allocation2 + $0x28] sm:$0x3f]  ;;  %v2205_v23 = vmul.f32 %v2195_v19, %v566_v18  ;;  %v495_v25 = vmul.f32 %v494_v24, %v431_v5  ;;  %v518_v27 = vstv %s517_s14  ;;  %s2217_s11 = sld [smem:[#allocation6 + %s871_s29]]  ;;  %s658_s16 = sadd.s32 7, %s2162_s4 }
  0x91   : > { %v455_v13 = vmul.f32 %v451_v6, %v2175_v8  ;;  %v2190_v16 = vmul.f32 %v2170_v4, %v2175_v8  ;;  %v2199_v20 = vmul.f32 %v2170_v4, %v2184_v15  ;;  %v457_v22 = vmul.f32 %v451_v6, %v2184_v15  ;;  %s1932_s24 = smov 125   ;;  %s2232_s3 = sld [smem:[#allocation6 + %s896_s21]]  ;;  %v2242_v45 = vld [vmem:[#allocation2 + $0x28] sm:$0xff] }
  0x92   : > { %v496_v26 = vmul.f32 %v494_v24, %v2175_v8  ;;  %v497_v28 = vmul.f32 %v494_v24, %v2184_v15  ;;  %v519_v29 = vmul.f32 %v518_v27, %v431_v5  ;;  %v542_v30 = vstv %s541_s19  ;;  %s2240_s13 = sld [smem:[#allocation6 + %s658_s16]]  ;;  %v2259_v52 = vld [vmem:[#allocation2 + $0x28] sm:$0x7f]  ;;  %s687_s14 = sadd.s32 8, %s2162_s4 }
  0x93   : > { %v608_v31 = vstv %s607_s20  ;;  %v520_v32 = vmul.f32 %v518_v27, %v2175_v8  ;;  %v521_v34 = vmul.f32 %v518_v27, %v2184_v15  ;;  %v543_v35 = vmul.f32 %v542_v30, %v431_v5  ;;  %s1933_s17 = smov 124   ;;  %s688_s18 = sld [smem:[#allocation6 + %s687_s14]]  ;;  %v2299_v5 = vld [vmem:[#allocation2 + $0x30] sm:$0x1] }
  0x94   : > { %466 = vrot.lane.b32.xlu0 %v453_v12, %s1930_s12  ;;  %470 = vrot.lane.b32.xlu1 %v455_v13, %s1930_s12  ;;  %v609_v36 = vmul.f32 %v608_v31, %v566_v18  ;;  %v611_v38 = vmul.f32 0.0, %v608_v31  ;;  %v823_v39 = vstv %s2213_s22  ;;  %v544_v42 = vmul.f32 %v542_v30, %v2175_v8  ;;  %s1079_s19 = sadd.s32 20, %s2162_s4  ;;  %s716_s20 = sadd.s32 9, %s2162_s4 }
  0x95   : > { %v848_v40 = vstv %s2215_s10  ;;  %v610_v43 = vmul.f32 %v608_v31, %v2224_v33  ;;  %v612_v44 = vmul.f32 %v608_v31, %v2175_v8  ;;  %v2245_v46 = vmul.f32 %v823_v39, %v2175_v8  ;;  %s1080_s1 = sld [smem:[#allocation6 + %s1079_s19]]  ;;  %s777_s29 = sadd.s32 11, %s2162_s4 }
  0x96   : > { %v873_v41 = vstv %s2217_s11  ;;  %v613_v47 = vmul.f32 %v608_v31, %v2230_v37  ;;  %v2249_v48 = vmul.f32 %v823_v39, %v2242_v45  ;;  %v2252_v49 = vmul.f32 %v848_v40, %v2175_v8  ;;  %s717_s9 = sld [smem:[#allocation6 + %s716_s20]]  ;;  %s745_s22 = sadd.s32 10, %s2162_s4 }
  0x97   : > { %v2255_v50 = vmul.f32 %v848_v40, %v2242_v45  ;;  %v621_v51 = vrot.slane %v609_v36, 1  ;;  %v828_v53 = vrot.slane %v2245_v46, 2  ;;  %v2263_v54 = vmul.f32 %v873_v41, %v2175_v8  ;;  %s778_s10 = sld [smem:[#allocation6 + %s777_s29]]  ;;  %s940_s21 = sadd.s32 16, %s2162_s4 }
  0x98   : > { %472 = vrot.lane.b32.xlu0 %v456_v21, %s1930_s12  ;;  %474 = vrot.lane.b32.xlu1 %v457_v22, %s1930_s12  ;;  %v2266_v55 = vmul.f32 %v873_v41, %v2242_v45  ;;  %v622_v56 = vrot.slane %v611_v38, 1  ;;  %v829_v57 = vrot.slane %v2249_v48, 2  ;;  %v853_v58 = vrot.slane %v2252_v49, 2  ;;  %s746_s11 = sld [smem:[#allocation6 + %s745_s22]]  ;;  %s1021_s14 = sadd.s32 18, %s2162_s4 }
  0x99   : > { %v854_v59 = vrot.slane %v2255_v50, 2  ;;  %v878_v60 = vrot.slane %v2263_v54, 2  ;;  %v545_v62 = vmul.f32 %v542_v30, %v2184_v15  ;;  %v624_v1 = vrot.slane %v610_v43, 1  ;;  %s941_s16 = sld [smem:[#allocation6 + %s940_s21]]  ;;  %s1050_s19 = sadd.s32 19, %s2162_s4 }
  0x9a   : > { %v879_v61 = vrot.slane %v2266_v55, 2  ;;  %v2280_v63 = vsel %vm758_vm3, %v828_v53, %v829_v57  ;;  %v614_v2 = vmul.f32 %v608_v31, %v2259_v52  ;;  %v2302_v6 = vstv %s2232_s3  ;;  %v2323_v31 = vld [vmem:[#allocation2 + $0x30] sm:$0x3]  ;;  %s992_s3 = sadd.s32 17, %s2162_s4  ;;  %s1051_s20 = sld [smem:[#allocation6 + %s1050_s19]] }
  0x9b   : > { %v2287_v0 = vsel %vm758_vm3, %v853_v58, %v854_v59  ;;  %v623_v10 = vsel %vm583_vm2, %v621_v51, %v622_v56  ;;  %v625_v11 = vrot.slane %v612_v44, 1  ;;  %v627_v12 = vrot.slane %v613_v47, 1  ;;  %s1173_s29 = sadd.s32 22, %s2162_s4  ;;  %s1231_s21 = sadd.s32 24, %s2162_s4 }
  0x9c   : > { %501 = vrot.lane.b32.xlu0 %v495_v25, %s1931_s15  ;;  %503 = vrot.lane.b32.xlu1 %v496_v26, %s1931_s15  ;;  %v2297_v3 = vsel %vm758_vm3, %v878_v60, %v879_v61  ;;  %v2308_v13 = vmul.f32 %v2302_v6, %v2299_v5  ;;  %v660_v14 = vstv %s2240_s13  ;;  %v629_v15 = vrot.slane %v614_v2, 1  ;;  %s993_s13 = sld [smem:[#allocation6 + %s992_s3]]  ;;  %p391_p2 = scmp.lt.s32.totalorder %s1908_s28, 1 }
  0x9d   : > { %v626_v18 = vsel %vm583_vm2, %v624_v1, %v625_v11  ;;  %v628_v21 = vsel %vm583_vm2, %v622_v56, %v627_v12  ;;  %v661_v22 = vmul.f32 %v660_v14, %v2224_v33  ;;  %v662_v24 = vmul.f32 %v660_v14, %v2175_v8  ;;  %s1174_s22 = sld [smem:[#allocation6 + %s1173_s29]]  ;;  %p393_p4 = scmp.lt.s32.totalorder %s1904_s27, 4 }
  0x9e   : > { %v689_v25 = vstv %s688_s18  ;;  %v630_v26 = vsel %vm583_vm2, %v625_v11, %v629_v15  ;;  %v573_v40 = vmul.f32 0.0, %v2195_v19  ;;  %v718_v41 = vstv %s717_s9  ;;  %s1022_s18 = sld [smem:[#allocation6 + %s1021_s14]]  ;;  %s2762_s28 = smov (!%p391_p2, %s1908_s28), 1 }
  0x9f   : > { %v667_v27 = vrot.slane %v661_v22, 1  ;;  %v690_v30 = vmul.f32 %v689_v25, %v2224_v33  ;;  %v584_v47 = vrot.slane %v2205_v23, 1  ;;  %v719_v56 = vmul.f32 %v718_v41, %v2224_v33 }
  0xa0   : > { %505 = vrot.lane.b32.xlu0 %v497_v28, %s1931_s15  ;;  %525 = vrot.lane.b32.xlu1 %v519_v29, %s1932_s24  ;;  %v668_v28 = vrot.slane %v662_v24, 1  ;;  %v663_v29 = vmul.f32 %v660_v14, %v2259_v52  ;;  %v585_v1 = vrot.slane %v573_v40, 1  ;;  %v2347_v2 = vmul.f32 %v2195_v19, %v2230_v37 }
  0xa1   : > { %v572_v11 = vmul.f32 %v2195_v19, %v2224_v33  ;;  %v721_v14 = vmul.f32 %v718_v41, %v2259_v52  ;;  %v725_v37 = vrot.slane %v719_v56, 1  ;;  %v924_v46 = vrot.slane %v2308_v13, 3 }
  0xa2   : > { %v669_v38 = vsel %vm583_vm2, %v667_v27, %v668_v28  ;;  %v670_v39 = vrot.slane %v663_v29, 1  ;;  %v749_v27 = vstv %s746_s11 }
  0xa3   : > { %v587_v22 = vrot.slane %v572_v11, 1  ;;  %v728_v29 = vrot.slane %v721_v14, 1  ;;  %v898_v11 = vld [vmem:[#allocation2 + $0x10] sm:$0xfe]  ;;  %v907_v14 = vmul.f32 0.0, %v2302_v6 }
  0xa4   : > { %527 = vrot.lane.b32.xlu0 %v520_v32, %s1932_s24  ;;  %529 = vrot.lane.b32.xlu1 %v521_v34, %s1932_s24  ;;  %v2325_v32 = vstv %s1080_s1  ;;  %v691_v34 = vmul.f32 %v689_v25, %v2175_v8  ;;  %v671_v51 = vsel %vm583_vm2, %v668_v28, %v670_v39  ;;  %s1121_s1 = sadd.s32 21, %s2162_s4 }
  0xa5   : > { %v2333_v36 = vmul.f32 %v2325_v32, %v2323_v31  ;;  %s1122_s9 = sld [smem:[#allocation6 + %s1121_s1]] }
  0xa6   : > { %v697_v43 = vrot.slane %v691_v34, 1 }
  0xa8   : > { %549 = vrot.lane.b32.xlu0 %v543_v35, %s1933_s17  ;;  %551 = vrot.lane.b32.xlu1 %v544_v42, %s1933_s17  ;;  %v692_v35 = vmul.f32 %v689_v25, %v2259_v52  ;;  %v696_v42 = vrot.slane %v690_v30, 1  ;;  %v2369_v25 = vmul.f32 %v2195_v19, %v2259_v52 }
  0xaa   : > { %v699_v44 = vrot.slane %v692_v35, 1  ;;  %v698_v23 = vsel %vm583_vm2, %v696_v42, %v697_v43  ;;  %v592_v34 = vrot.slane %v2369_v25, 1  ;;  %v750_v35 = vmul.f32 0.0, %v749_v27 }
  0xac   : > { %553 = vrot.lane.b32.xlu0 %v545_v62, %s1933_s17  ;;  %631 = vrot.lane.b32.xlu1 %v623_v10, %s1930_s12  ;;  %v720_v62 = vmul.f32 %v718_v41, %v2175_v8  ;;  %v2350_v10 = vsel %vm583_vm2, %v584_v47, %v585_v1  ;;  %v2392_v41 = vrot.slane %v750_v35, 2 }
  0xb0   : > { %633 = vrot.lane.b32.xlu0 %v626_v18, %s1930_s12  ;;  %635 = vrot.lane.b32.xlu1 %v628_v21, %s1930_s12  ;;  %v726_v18 = vrot.slane %v720_v62, 1  ;;  %v574_v21 = vmul.f32 %v2195_v19, %v2175_v8  ;;  %v2382_v19 = vmul.f32 %v749_v27, %v2242_v45 }
  0xb2   : > { %v588_v24 = vrot.slane %v574_v21, 1  ;;  %v727_v28 = vsel %vm583_vm2, %v725_v37, %v726_v18  ;;  %v729_v47 = vsel %vm583_vm2, %v726_v18, %v728_v29  ;;  %v908_v18 = vmul.f32 %v2302_v6, %v2242_v45 }
  0xb4   : > { %637 = vrot.lane.b32.xlu0 %v630_v26, %s1930_s12  ;;  %639 = vrot.lane.b32.xlu1 %v627_v12, %s1930_s12  ;;  %v700_v12 = vsel %vm583_vm2, %v697_v43, %v699_v44  ;;  %v779_v26 = vstv %s778_s10  ;;  %v2375_v30 = vsel %vm583_vm2, %v587_v22, %v588_v24  ;;  %v763_v43 = vrot.slane %v2382_v19, 2  ;;  %s1202_s10 = sadd.s32 23, %s2162_s4  ;;  %s1232_s4 = sld [smem:[#allocation6 + %s1231_s21]] }
  0xb5   : > { %v780_v52 = vmul.f32 0.0, %v779_v26  ;;  %v781_v40 = vmul.f32 %v779_v26, %v2175_v8  ;;  %v920_v22 = vrot.slane %v907_v14, 3  ;;  %s1203_s11 = sld [smem:[#allocation6 + %s1202_s10]] }
  0xb7   : > { %v789_v56 = vrot.slane %v781_v40, 2  ;;  %v942_v40 = vstv %s941_s16  ;;  %s1630_s16 = smul.u32 10, %s2762_s28 }
  0xb8   : > { %641 = vrot.lane.b32.xlu0 %v629_v15, %s1930_s12  ;;  %672 = vrot.lane.b32.xlu1 %v669_v38, %s1931_s15  ;;  %v590_v15 = vrot.slane %v2347_v2, 1  ;;  %v2379_v38 = vmul.f32 %v749_v27, %v2175_v8  ;;  %v788_v8 = vrot.slane %v780_v52, 2  ;;  %v2429_v27 = vld [vmem:[#allocation2 + $0x38] sm:$0x1]  ;;  %v2450_v52 = vsel %vm917_vm4, %v920_v22, %v924_v46 }
  0xb9   : > { %v910_v35 = vmul.f32 %v2302_v6, %v2429_v27  ;;  %v945_v48 = vmul.f32 0.0, %v942_v40  ;;  %v946_v50 = vmul.f32 %v942_v40, %v2242_v45 }
  0xba   : > { %v2365_v33 = vsel %vm583_vm2, %v585_v1, %v590_v15  ;;  %v760_v42 = vrot.slane %v2379_v38, 2 }
  0xbc   : > { %674 = vrot.lane.b32.xlu0 %v671_v51, %s1931_s15  ;;  %676 = vrot.lane.b32.xlu1 %v670_v39, %s1931_s15  ;;  %v2387_v39 = vsel %vm583_vm2, %v588_v24, %v592_v34  ;;  %v783_v51 = vmul.f32 %v779_v26, %v2242_v45  ;;  %v922_v26 = vrot.slane %v908_v18, 3  ;;  %v2494_v18 = vld [vmem:[#allocation2 + $0x18] sm:$0xfc] }
  0xbd   : > { %v2499_v46 = vmul.f32 %v2325_v32, %v2494_v18 }
  0xbe   : > { %v792_v62 = vrot.slane %v783_v51, 2 }
  0xc0   : > { %701 = vrot.lane.b32.xlu0 %v698_v23, %s1932_s24  ;;  %703 = vrot.lane.b32.xlu1 %v700_v12, %s1932_s24  ;;  %v793_v1 = vsel %vm758_vm3, %v789_v56, %v792_v62  ;;  %v2413_v23 = vld [vmem:[#allocation2 + $0x18] sm:$0xfe]  ;;  %v2416_v12 = vmul.f32 %v2302_v6, %v898_v11 }
  0xc1   : > { %v2423_v37 = vmul.f32 %v2302_v6, %v2413_v23  ;;  %v943_v6 = vmul.f32 %v942_v40, %v898_v11 }
  0xc2   : > { %v918_v21 = vrot.slane %v2416_v12, 3 }
  0xc3   : > { %v919_v24 = vrot.slane %v2423_v37, 3  ;;  %v955_v49 = vrot.slane %v943_v6, 3  ;;  %v2503_v6 = vld [vmem:[#allocation2 + $0x38] sm:$0x3] }
  0xc4   : > { %705 = vrot.lane.b32.xlu0 %v699_v44, %s1932_s24  ;;  %730 = vrot.lane.b32.xlu1 %v727_v28, %s1933_s17  ;;  %v2403_v44 = vsel %vm758_vm3, %v760_v42, %v763_v43  ;;  %v2439_v28 = vsel %vm917_vm4, %v918_v21, %v920_v22 }
  0xc8   : > { %732 = vrot.lane.b32.xlu0 %v729_v47, %s1933_s17  ;;  %734 = vrot.lane.b32.xlu1 %v728_v29, %s1933_s17  ;;  %v2444_v29 = vsel %vm917_vm4, %v919_v24, %v922_v26  ;;  %v994_v47 = vstv %s993_s13 }
  0xc9   : > { %v995_v55 = vmul.f32 %v994_v47, %v2413_v23 }
  0xcb   : > { %v1001_v11 = vrot.slane %v995_v55, 3 }
  0xcc   : > { %794 = vrot.lane.b32.xlu0 %v788_v8, %s1930_s12  ;;  %796 = vrot.lane.b32.xlu1 %v789_v56, %s1930_s12  ;;  %v996_v56 = vmul.f32 %v994_v47, %v2242_v45 }
  0xce   : > { %v1002_v22 = vrot.slane %v996_v56, 3 }
  0xd0   : > { %798 = vrot.lane.b32.xlu0 %v788_v8, %s1930_s12  ;;  %800 = vrot.lane.b32.xlu1 %v793_v1, %s1930_s12 }
  0xd4   : > { %802 = vrot.lane.b32.xlu0 %v788_v8, %s1930_s12  ;;  %804 = vrot.lane.b32.xlu1 %v792_v62, %s1930_s12  ;;  %v997_v62 = vmul.f32 %v994_v47, %v2429_v27 }
  0xd8   : > { %831 = vrot.lane.b32.xlu0 %v828_v53, %s1931_s15  ;;  %833 = vrot.lane.b32.xlu1 %v2280_v63, %s1931_s15  ;;  %v926_v53 = vrot.slane %v910_v35, 3 }
  0xda   : > { %v2459_v63 = vsel %vm917_vm4, %v922_v26, %v926_v53  ;;  %v1004_v26 = vrot.slane %v997_v62, 3 }
  0xdc   : > { %835 = vrot.lane.b32.xlu0 %v829_v57, %s1931_s15  ;;  %856 = vrot.lane.b32.xlu1 %v853_v58, %s1932_s24  ;;  %v944_v57 = vmul.f32 %v942_v40, %v2413_v23  ;;  %v957_v58 = vrot.slane %v945_v48, 3 }
  0xde   : > { %v956_v54 = vrot.slane %v944_v57, 3  ;;  %v1089_v57 = vmul.f32 %v2325_v32, %v2242_v45 }
  0xe0   : > { %858 = vrot.lane.b32.xlu0 %v2287_v0, %s1932_s24  ;;  %860 = vrot.lane.b32.xlu1 %v854_v59, %s1932_s24  ;;  %v947_v59 = vmul.f32 %v942_v40, %v2299_v5  ;;  %v958_v0 = vsel %vm917_vm4, %v955_v49, %v957_v58 }
  0xe2   : > { %v961_v13 = vrot.slane %v947_v59, 3  ;;  %v1005_v59 = vsel %vm917_vm4, %v1002_v22, %v1004_v26  ;;  %v1123_v26 = vstv %s1122_s9 }
  0xe4   : > { %881 = vrot.lane.b32.xlu0 %v878_v60, %s1933_s17  ;;  %883 = vrot.lane.b32.xlu1 %v2297_v3, %s1933_s17  ;;  %v948_v60 = vmul.f32 %v942_v40, %v2429_v27  ;;  %v959_v3 = vrot.slane %v946_v50, 3  ;;  %v962_v8 = vsel %vm917_vm4, %v957_v58, %v961_v13  ;;  %v1052_v40 = vstv %s1051_s20 }
  0xe5   : > { %v1091_v58 = vmul.f32 %v2325_v32, %v2503_v6  ;;  %v1003_v50 = vsel %vm917_vm4, %v1001_v11, %v1002_v22  ;;  %v1103_v13 = vrot.slane %v1089_v57, 4  ;;  %v1054_v55 = vmul.f32 %v1052_v40, %v2242_v45  ;;  %v2542_v22 = vld [vmem:[#allocation2 + $0x10] sm:$0xfc] }
  0xe6   : > { %v963_v5 = vrot.slane %v948_v60, 3  ;;  %v960_v51 = vsel %vm917_vm4, %v956_v54, %v959_v3  ;;  %v1100_v60 = vrot.slane %v2499_v46, 4  ;;  %v1127_v57 = vmul.f32 %v1123_v26, %v2242_v45 }
  0xe7   : > { %v1107_v47 = vrot.slane %v1091_v58, 4 }
  0xe8   : > { %885 = vrot.lane.b32.xlu0 %v879_v61, %s1933_s17  ;;  %965 = vrot.lane.b32.xlu1 %v955_v49, %s1930_s12  ;;  %v1023_v61 = vstv %s1022_s18  ;;  %v964_v1 = vsel %vm917_vm4, %v959_v3, %v963_v5  ;;  %v2508_v49 = vmul.f32 0.0, %v2325_v32  ;;  %v1105_v3 = vrot.slane %v2333_v36, 4 }
  0xe9   : > { %v1024_v14 = vmul.f32 %v1023_v61, %v2413_v23  ;;  %v1025_v35 = vmul.f32 %v1023_v61, %v2242_v45  ;;  %v1026_v53 = vmul.f32 %v1023_v61, %v2429_v27  ;;  %v1053_v5 = vmul.f32 %v1052_v40, %v2413_v23 }
  0xea   : > { %v2531_v36 = vsel %vm1098_vm5, %v1100_v60, %v1103_v13  ;;  %v2536_v56 = vsel %vm1098_vm5, %v1103_v13, %v1107_v47  ;;  %v1128_v47 = vmul.f32 %v1123_v26, %v2323_v31 }
  0xeb   : > { %v1030_v48 = vrot.slane %v1024_v14, 3  ;;  %v1033_v23 = vrot.slane %v1026_v53, 3  ;;  %v1059_v62 = vrot.slane %v1053_v5, 3  ;;  %v1126_v53 = vmul.f32 0.0, %v1123_v26 }
  0xec   : > { %967 = vrot.lane.b32.xlu0 %v956_v54, %s1930_s12  ;;  %969 = vrot.lane.b32.xlu1 %v958_v0, %s1930_s12  ;;  %v1031_v54 = vrot.slane %v1025_v35, 3  ;;  %v1101_v0 = vrot.slane %v2508_v49, 4  ;;  %v1125_v35 = vmul.f32 %v1123_v26, %v2494_v18  ;;  %v1140_v5 = vrot.slane %v1127_v57, 4 }
  0xed   : > { %v1138_v13 = vrot.slane %v1126_v53, 4 }
  0xee   : > { %v2526_v61 = vsel %vm1098_vm5, %v1101_v0, %v1105_v3  ;;  %v1137_v3 = vrot.slane %v1125_v35, 4 }
  0xf0   : > { %971 = vrot.lane.b32.xlu0 %v960_v51, %s1930_s12  ;;  %973 = vrot.lane.b32.xlu1 %v962_v8, %s1930_s12  ;;  %v1032_v51 = vsel %vm917_vm4, %v1030_v48, %v1031_v54  ;;  %v1055_v8 = vmul.f32 %v1052_v40, %v2429_v27  ;;  %v1124_v27 = vmul.f32 %v1123_v26, %v2542_v22 }
  0xf1   : > { %v1141_v35 = vsel %vm1098_vm5, %v1137_v3, %v1140_v5 }
  0xf2   : > { %v1062_v14 = vrot.slane %v1055_v8, 3  ;;  %v1175_v8 = vstv %s1174_s22 }
  0xf4   : > { %975 = vrot.lane.b32.xlu0 %v964_v1, %s1930_s12  ;;  %1006 = vrot.lane.b32.xlu1 %v1001_v11, %s1931_s15  ;;  %v1034_v1 = vsel %vm917_vm4, %v1031_v54, %v1033_v23  ;;  %v1060_v11 = vrot.slane %v1054_v55, 3  ;;  %v1136_v54 = vrot.slane %v1124_v27, 4  ;;  %v1129_v55 = vmul.f32 %v1123_v26, %v2503_v6 }
  0xf5   : > { %v1142_v26 = vrot.slane %v1128_v47, 4 }
  0xf6   : > { %v1061_v40 = vsel %vm917_vm4, %v1059_v62, %v1060_v11  ;;  %v1139_v31 = vsel %vm1098_vm5, %v1136_v54, %v1138_v13  ;;  %v1144_v53 = vrot.slane %v1129_v55, 4 }
  0xf8   : > { %1008 = vrot.lane.b32.xlu0 %v1003_v50, %s1931_s15  ;;  %1010 = vrot.lane.b32.xlu1 %v1005_v59, %s1931_s15  ;;  %v439_v59 = vmul.f32 0.0, %v2170_v4 }
  0xfc   : > { %1035 = vrot.lane.b32.xlu0 %v1030_v48, %s1932_s24  ;;  %1037 = vrot.lane.b32.xlu1 %v1032_v51, %s1932_s24  ;;  %v1063_v48 = vsel %vm917_vm4, %v1060_v11, %v1062_v14 }
 0x100   : > { %1039 = vrot.lane.b32.xlu0 %v1034_v1, %s1932_s24  ;;  %1064 = vrot.lane.b32.xlu1 %v1059_v62, %s1933_s17 }
 0x102   : > { %v469_v58 = vpop.permute.xlu1 %468  ;;  %v465_v50 = vpop.permute.xlu0 %464 }
 0x104   : > { %1066 = vrot.lane.b32.xlu0 %v1061_v40, %s1933_s17  ;;  %1068 = vrot.lane.b32.xlu1 %v1063_v48, %s1933_s17  ;;  %v1176_v40 = vmul.f32 %v1175_v8, %v2494_v18 }
 0x106   : > { %v467_v51 = vpop.permute.xlu0 %466  ;;  %v471_v23 = vpop.permute.xlu1 %470  ;;  %v1182_v47 = vrot.slane %v1176_v40, 4 }
 0x107   : > { %v477_v62 = vsel %vm476_vm6, %v465_v50, %v467_v51  ;;  %v487_v4 = vadd.f32 %v467_v51, %v2178_v9  ;;  %v478_v1 = vsel %vm476_vm6, %v469_v58, %v471_v23  ;;  %v489_v11 = vadd.f32 %v471_v23, %v2190_v16 }
 0x108   : > { %v486_v14 = vadd.f32 %v477_v62, %v2173_v7  ;;  %v488_v27 = vadd.f32 %v478_v1, %v439_v59  ;;  %1146 = vrot.lane.b32.xlu0 %v1136_v54, %s1930_s12  ;;  %1148 = vrot.lane.b32.xlu1 %v1137_v3, %s1930_s12  ;;  %v1177_v9 = vmul.f32 %v1175_v8, %v2242_v45  ;;  %v1204_v59 = vstv %s1203_s11 }
 0x109   : > { %v1178_v50 = vmul.f32 %v1175_v8, %v2503_v6  ;;  %v1143_v54 = vsel %vm1098_vm5, %v1138_v13, %v1142_v26  ;;  %v1145_v3 = vsel %vm1098_vm5, %v1140_v5, %v1144_v53  ;;  %v1205_v8 = vmul.f32 %v1204_v59, %v2494_v18 }
 0x10a   : > { %v473_v48 = vpop.permute.xlu0 %472  ;;  %v475_v16 = vpop.permute.xlu1 %474  ;;  %v1183_v55 = vrot.slane %v1177_v9, 4  ;;  %v1206_v13 = vmul.f32 %v1204_v59, %v2242_v45  ;;  %v1207_v5 = vmul.f32 %v1204_v59, %v2503_v6  ;;  %v1233_v26 = vstv %s1232_s4 }
 0x10b   : > { %v479_v7 = vsel %vm476_vm6, %v473_v48, %v475_v16  ;;  %v491_v57 = vadd.f32 %v475_v16, %v2199_v20  ;;  %v1211_v40 = vrot.slane %v1205_v8, 4  ;;  %v1234_v9 = vmul.f32 %v1233_v26, %v2494_v18 }
 0x10c   : > { %v490_v58 = vadd.f32 %v479_v7, %v2193_v17  ;;  %1150 = vrot.lane.b32.xlu0 %v1139_v31, %s1930_s12  ;;  %1152 = vrot.lane.b32.xlu1 %v1141_v35, %s1930_s12  ;;  %v1185_v17 = vrot.slane %v1178_v50, 4  ;;  %v1184_v31 = vsel %vm1098_vm5, %v1182_v47, %v1183_v55  ;;  %v1235_v16 = vmul.f32 %v1233_v26, %v2242_v45 }
 0x10d   : > { %v1212_v50 = vrot.slane %v1206_v13, 4  ;;  %v1214_v59 = vrot.slane %v1207_v5, 4  ;;  %v1236_v18 = vmul.f32 %v1233_v26, %v2503_v6 }
 0x10e   : > { %v502_v51 = vpop.permute.xlu0 %501  ;;  %v504_v23 = vpop.permute.xlu1 %503  ;;  %v1186_v7 = vsel %vm1098_vm5, %v1183_v55, %v1185_v17 }
 0x10f   : > { %v510_v62 = vadd.f32 %v502_v51, %v486_v14  ;;  %v511_v1 = vadd.f32 %v502_v51, %v487_v4  ;;  %v512_v20 = vadd.f32 %v504_v23, %v488_v27  ;;  %v513_v48 = vadd.f32 %v504_v23, %v489_v11 }
 0x110   : > { %1154 = vrot.lane.b32.xlu0 %v1143_v54, %s1930_s12  ;;  %1156 = vrot.lane.b32.xlu1 %v1145_v3, %s1930_s12  ;;  %v1213_v45 = vsel %vm1098_vm5, %v1211_v40, %v1212_v50  ;;  %v1215_v55 = vsel %vm1098_vm5, %v1212_v50, %v1214_v59  ;;  %v1243_v5 = vrot.slane %v1236_v18, 4  ;;  %s1260_s12 = sld [smem:[#allocation7 + %s1904_s27]]  ;;  %s2764_s27 = smov (!%p393_p4, %s1904_s27), 4 }
 0x111   : > { %s1625_s3 = sshll.u32 %s2764_s27, 1 }
 0x112   : > { %v506_v35 = vpop.permute.xlu0 %505  ;;  %v526_v53 = vpop.permute.xlu1 %525  ;;  %s397_s13 = sadd.s32 %s1630_s16, %s1625_s3 }
 0x113   : > { %v514_v14 = vadd.f32 %v506_v35, %v490_v58  ;;  %v515_v4 = vadd.f32 %v506_v35, %v491_v57  ;;  %v534_v27 = vadd.f32 %v526_v53, %v510_v62  ;;  %v535_v11 = vadd.f32 %v526_v53, %v511_v1  ;;  %s1626_s14 = sshll.u32 %s397_s13, 3 }
 0x114   : > { %1187 = vrot.lane.b32.xlu0 %v1182_v47, %s1931_s15  ;;  %1189 = vrot.lane.b32.xlu1 %v1184_v31, %s1931_s15  ;;  %v1240_v47 = vrot.slane %v1234_v9, 4  ;;  %v1241_v62 = vrot.slane %v1235_v16, 4  ;;  %s399_s20 = scalar_lea.vmem %s2720_s5, %s1626_s14 }
 0x116   : > { %v528_v54 = vpop.permute.xlu0 %527  ;;  %v530_v3 = vpop.permute.xlu1 %529  ;;  %v1242_v13 = vsel %vm1098_vm5, %v1240_v47, %v1241_v62  ;;  %v1244_v9 = vsel %vm1098_vm5, %v1241_v62, %v1243_v5 }
 0x117   : > { %v536_v51 = vadd.f32 %v528_v54, %v512_v20  ;;  %v537_v58 = vadd.f32 %v528_v54, %v513_v48  ;;  %v538_v57 = vadd.f32 %v530_v3, %v514_v14  ;;  %v539_v23 = vadd.f32 %v530_v3, %v515_v4 }
 0x118   : > { %1191 = vrot.lane.b32.xlu0 %v1186_v7, %s1931_s15  ;;  %1216 = vrot.lane.b32.xlu1 %v1211_v40, %s1932_s24  ;;  %s1631_s15 = smul.u32 5, %s2762_s28 }
 0x11a   : > { %v550_v1 = vpop.permute.xlu0 %549  ;;  %v552_v17 = vpop.permute.xlu1 %551 }
 0x11b   : > { %v558_v8 = vadd.f32 %v550_v1, %v534_v27  ;;  %v559_v31 = vadd.f32 %v550_v1, %v535_v11  ;;  %v560_v20 = vadd.f32 %v552_v17, %v536_v51  ;;  %v561_v48 = vadd.f32 %v552_v17, %v537_v58 }
 0x11c   : > { %1218 = vrot.lane.b32.xlu0 %v1213_v45, %s1932_s24  ;;  %1220 = vrot.lane.b32.xlu1 %v1215_v55, %s1932_s24  ;;  %s2656_s24 = sadd.s32 %s1631_s15, %s2764_s27 }
 0x11d   : > { %v600_v35 = vadd.f32 %v2350_v10, %v558_v8  ;;  %v602_v6 = vadd.f32 %v2365_v33, %v560_v20  ;;  %v601_v26 = vadd.f32 %v2375_v30, %v559_v31  ;;  %v603_v53 = vadd.f32 %v2387_v39, %v561_v48  ;;  %s406_s1 = scalar_lea.vmem %s2721_s6, %s2656_s24  ;;  %s413_s22 = scalar_lea.vmem %s2722_s7, %s2656_s24 }
 0x11e   : > { %v554_v14 = vpop.permute.xlu0 %553  ;;  %v632_v4 = vpop.permute.xlu1 %631 }
 0x11f   : > { %v562_v27 = vadd.f32 %v554_v14, %v538_v57  ;;  %v563_v11 = vadd.f32 %v554_v14, %v539_v23 }
 0x120   : > { %1245 = vrot.lane.b32.xlu0 %v1240_v47, %s1933_s17  ;;  %1247 = vrot.lane.b32.xlu1 %v1242_v13, %s1933_s17 }
 0x121   : > { %v604_v40 = vadd.f32 %v590_v15, %v562_v27  ;;  %v605_v10 = vadd.f32 %v592_v34, %v563_v11 }
 0x122   : > { %v634_v33 = vpop.permute.xlu0 %633  ;;  %v636_v30 = vpop.permute.xlu1 %635 }
 0x123   : > { %v643_v39 = vsel %vm476_vm6, %v632_v4, %v634_v33  ;;  %v653_v16 = vadd.f32 %v634_v33, %v601_v26 }
 0x124   : > { %v652_v7 = vadd.f32 %v643_v39, %v600_v35  ;;  %1249 = vrot.lane.b32.xlu0 %v1244_v9, %s1933_s17  ;;  %s1934_s17 = smov 2  }
 0x126   : > { %v638_v50 = vpop.permute.xlu0 %637  ;;  %v640_v59 = vpop.permute.xlu1 %639 }
 0x127   : > { %v644_v54 = vsel %vm476_vm6, %v636_v30, %v638_v50  ;;  %v655_v3 = vadd.f32 %v638_v50, %v603_v53 }
 0x128   : > { %v654_v2 = vadd.f32 %v644_v54, %v602_v6 }
 0x12a   : > { %v642_v15 = vpop.permute.xlu0 %641  ;;  %v673_v51 = vpop.permute.xlu1 %672 }
 0x12b   : > { %v645_v58 = vsel %vm476_vm6, %v640_v59, %v642_v15  ;;  %v657_v25 = vadd.f32 %v642_v15, %v605_v10  ;;  %v681_v34 = vadd.f32 %v673_v51, %v652_v7  ;;  %v682_v57 = vadd.f32 %v673_v51, %v653_v16 }
 0x12c   : > { %v656_v23 = vadd.f32 %v645_v58, %v604_v40 }
 0x12e   : > { %v675_v47 = vpop.permute.xlu0 %674  ;;  %v677_v62 = vpop.permute.xlu1 %676 }
 0x12f   : > { %v683_v18 = vadd.f32 %v675_v47, %v654_v2  ;;  %v684_v45 = vadd.f32 %v675_v47, %v655_v3  ;;  %v685_v55 = vadd.f32 %v677_v62, %v656_v23  ;;  %v686_v1 = vadd.f32 %v677_v62, %v657_v25 }
 0x132   : > { %v702_v17 = vpop.permute.xlu0 %701  ;;  %v704_v8 = vpop.permute.xlu1 %703 }
 0x133   : > { %v710_v31 = vadd.f32 %v702_v17, %v681_v34  ;;  %v711_v20 = vadd.f32 %v702_v17, %v682_v57  ;;  %v712_v48 = vadd.f32 %v704_v8, %v683_v18  ;;  %v713_v13 = vadd.f32 %v704_v8, %v684_v45 }
 0x136   : > { %v706_v5 = vpop.permute.xlu0 %705  ;;  %v731_v35 = vpop.permute.xlu1 %730 }
 0x137   : > { %v714_v6 = vadd.f32 %v706_v5, %v685_v55  ;;  %v715_v26 = vadd.f32 %v706_v5, %v686_v1  ;;  %v739_v53 = vadd.f32 %v731_v35, %v710_v31  ;;  %v740_v14 = vadd.f32 %v731_v35, %v711_v20 }
 0x139   : > { %v771_v4 = vadd.f32 %v2392_v41, %v739_v53  ;;  %v772_v27 = vadd.f32 %v760_v42, %v740_v14 }
 0x13a   : > { %v733_v11 = vpop.permute.xlu0 %732  ;;  %v735_v40 = vpop.permute.xlu1 %734 }
 0x13b   : > { %v741_v9 = vadd.f32 %v733_v11, %v712_v48  ;;  %v742_v10 = vadd.f32 %v733_v11, %v713_v13  ;;  %v743_v33 = vadd.f32 %v735_v40, %v714_v6  ;;  %v744_v30 = vadd.f32 %v735_v40, %v715_v26 }
 0x13d   : > { %v773_v39 = vadd.f32 %v2392_v41, %v741_v9  ;;  %v775_v16 = vadd.f32 %v2392_v41, %v743_v33  ;;  %v774_v7 = vadd.f32 %v2403_v44, %v742_v10  ;;  %v776_v50 = vadd.f32 %v763_v43, %v744_v30 }
 0x13e   : > { %v795_v59 = vpop.permute.xlu0 %794  ;;  %v797_v54 = vpop.permute.xlu1 %796 }
 0x13f   : > { %v806_v58 = vsel %vm476_vm6, %v795_v59, %v797_v54  ;;  %v816_v41 = vadd.f32 %v797_v54, %v772_v27 }
 0x140   : > { %v815_v23 = vadd.f32 %v806_v58, %v771_v4 }
 0x142   : > { %v799_v3 = vpop.permute.xlu0 %798  ;;  %v801_v38 = vpop.permute.xlu1 %800 }
 0x143   : > { %v807_v25 = vsel %vm476_vm6, %v799_v3, %v801_v38  ;;  %v818_v47 = vadd.f32 %v801_v38, %v774_v7 }
 0x144   : > { %v817_v44 = vadd.f32 %v807_v25, %v773_v39 }
 0x146   : > { %v803_v42 = vpop.permute.xlu0 %802  ;;  %v805_v2 = vpop.permute.xlu1 %804 }
 0x147   : > { %v808_v19 = vsel %vm476_vm6, %v803_v42, %v805_v2  ;;  %v820_v8 = vadd.f32 %v805_v2, %v776_v50 }
 0x148   : > { %v819_v17 = vadd.f32 %v808_v19, %v775_v16 }
 0x14a   : > { %v832_v15 = vpop.permute.xlu0 %831  ;;  %v834_v51 = vpop.permute.xlu1 %833 }
 0x14b   : > { %v840_v18 = vadd.f32 %v832_v15, %v815_v23  ;;  %v841_v45 = vadd.f32 %v832_v15, %v816_v41  ;;  %v842_v55 = vadd.f32 %v834_v51, %v817_v44  ;;  %v843_v1 = vadd.f32 %v834_v51, %v818_v47 }
 0x14e   : > { %v836_v34 = vpop.permute.xlu0 %835  ;;  %v857_v57 = vpop.permute.xlu1 %856 }
 0x14f   : > { %v865_v31 = vadd.f32 %v857_v57, %v840_v18  ;;  %v866_v20 = vadd.f32 %v857_v57, %v841_v45  ;;  %v844_v5 = vadd.f32 %v836_v34, %v819_v17  ;;  %v845_v35 = vadd.f32 %v836_v34, %v820_v8 }
 0x152   : > { %v859_v43 = vpop.permute.xlu0 %858  ;;  %v861_v62 = vpop.permute.xlu1 %860 }
 0x153   : > { %v867_v48 = vadd.f32 %v859_v43, %v842_v55  ;;  %v868_v13 = vadd.f32 %v859_v43, %v843_v1  ;;  %v869_v11 = vadd.f32 %v861_v62, %v844_v5  ;;  %v870_v40 = vadd.f32 %v861_v62, %v845_v35 }
 0x156   : > { %v882_v6 = vpop.permute.xlu0 %881  ;;  %v884_v26 = vpop.permute.xlu1 %883 }
 0x157   : > { %v890_v53 = vadd.f32 %v882_v6, %v865_v31  ;;  %v891_v14 = vadd.f32 %v882_v6, %v866_v20  ;;  %v892_v4 = vadd.f32 %v884_v26, %v867_v48  ;;  %v893_v27 = vadd.f32 %v884_v26, %v868_v13 }
 0x159   : > { %v934_v9 = vadd.f32 %v918_v21, %v890_v53  ;;  %v936_v10 = vadd.f32 %v2439_v28, %v892_v4  ;;  %v935_v33 = vadd.f32 %v919_v24, %v891_v14  ;;  %v937_v30 = vadd.f32 %v2444_v29, %v893_v27 }
 0x15a   : > { %v886_v39 = vpop.permute.xlu0 %885  ;;  %v966_v16 = vpop.permute.xlu1 %965 }
 0x15b   : > { %v894_v7 = vadd.f32 %v886_v39, %v869_v11  ;;  %v895_v50 = vadd.f32 %v886_v39, %v870_v40 }
 0x15d   : > { %v938_v59 = vadd.f32 %v2450_v52, %v894_v7  ;;  %v939_v54 = vadd.f32 %v2459_v63, %v895_v50  ;;  %v1086_v52 = vmul.f32 %v2325_v32, %v2542_v22 }
 0x15e   : > { %v968_v3 = vpop.permute.xlu0 %967  ;;  %v970_v38 = vpop.permute.xlu1 %969 }
 0x15f   : > { %v977_v28 = vsel %vm476_vm6, %v966_v16, %v968_v3  ;;  %v987_v51 = vadd.f32 %v968_v3, %v935_v33  ;;  %v1099_v62 = vrot.slane %v1086_v52, 4  ;;  %v1261_v52 = vstv %s1260_s12 }
 0x160   : > { %v986_v15 = vadd.f32 %v977_v28, %v934_v9 }
 0x161   : > { %v1102_v6 = vsel %vm1098_vm5, %v1099_v62, %v1101_v0 }
 0x162   : > { %v972_v42 = vpop.permute.xlu0 %971  ;;  %v974_v12 = vpop.permute.xlu1 %973 }
 0x163   : > { %v978_v58 = vsel %vm476_vm6, %v970_v38, %v972_v42  ;;  %v989_v44 = vadd.f32 %v972_v42, %v937_v30 }
 0x164   : > { %v988_v23 = vadd.f32 %v978_v58, %v936_v10 }
 0x166   : > { %v976_v21 = vpop.permute.xlu0 %975  ;;  %v1007_v2 = vpop.permute.xlu1 %1006 }
 0x167   : > { %v979_v29 = vsel %vm476_vm6, %v974_v12, %v976_v21  ;;  %v1015_v57 = vadd.f32 %v1007_v2, %v986_v15  ;;  %v1016_v41 = vadd.f32 %v1007_v2, %v987_v51  ;;  %v991_v47 = vadd.f32 %v976_v21, %v939_v54 }
 0x168   : > { %v990_v34 = vadd.f32 %v979_v29, %v938_v59 }
 0x16a   : > { %v1009_v37 = vpop.permute.xlu0 %1008  ;;  %v1011_v24 = vpop.permute.xlu1 %1010 }
 0x16b   : > { %v1017_v18 = vadd.f32 %v1009_v37, %v988_v23  ;;  %v1018_v45 = vadd.f32 %v1009_v37, %v989_v44  ;;  %v1019_v17 = vadd.f32 %v1011_v24, %v990_v34  ;;  %v1020_v8 = vadd.f32 %v1011_v24, %v991_v47 }
 0x16e   : > { %v1036_v63 = vpop.permute.xlu0 %1035  ;;  %v1038_v25 = vpop.permute.xlu1 %1037 }
 0x16f   : > { %v1044_v19 = vadd.f32 %v1036_v63, %v1015_v57  ;;  %v1045_v43 = vadd.f32 %v1036_v63, %v1016_v41  ;;  %v1046_v32 = vadd.f32 %v1038_v25, %v1017_v18  ;;  %v1047_v22 = vadd.f32 %v1038_v25, %v1018_v45 }
 0x172   : > { %v1040_v55 = vpop.permute.xlu0 %1039  ;;  %v1065_v1 = vpop.permute.xlu1 %1064 }
 0x173   : > { %v1073_v31 = vadd.f32 %v1065_v1, %v1044_v19  ;;  %v1074_v20 = vadd.f32 %v1065_v1, %v1045_v43  ;;  %v1048_v48 = vadd.f32 %v1040_v55, %v1019_v17  ;;  %v1049_v13 = vadd.f32 %v1040_v55, %v1020_v8 }
 0x175   : > { %v1115_v5 = vadd.f32 %v1099_v62, %v1073_v31  ;;  %v1116_v35 = vadd.f32 %v1100_v60, %v1074_v20 }
 0x176   : > { %v1067_v26 = vpop.permute.xlu0 %1066  ;;  %v1069_v53 = vpop.permute.xlu1 %1068 }
 0x177   : > { %v1075_v14 = vadd.f32 %v1067_v26, %v1046_v32  ;;  %v1076_v4 = vadd.f32 %v1067_v26, %v1047_v22  ;;  %v1077_v27 = vadd.f32 %v1069_v53, %v1048_v48  ;;  %v1078_v11 = vadd.f32 %v1069_v53, %v1049_v13 }
 0x179   : > { %v1117_v40 = vadd.f32 %v1102_v6, %v1075_v14  ;;  %v1119_v9 = vadd.f32 %v2526_v61, %v1077_v27  ;;  %v1118_v10 = vadd.f32 %v2531_v36, %v1076_v4  ;;  %v1120_v46 = vadd.f32 %v2536_v56, %v1078_v11 }
 0x17a   : > { %v1147_v49 = vpop.permute.xlu0 %1146  ;;  %v1149_v60 = vpop.permute.xlu1 %1148 }
 0x17b   : > { %v1158_v50 = vsel %vm476_vm6, %v1147_v49, %v1149_v60  ;;  %v1168_v54 = vadd.f32 %v1149_v60, %v1116_v35 }
 0x17c   : > { %v1167_v56 = vadd.f32 %v1158_v50, %v1115_v5 }
 0x17e   : > { %v1151_v0 = vpop.permute.xlu0 %1150  ;;  %v1153_v33 = vpop.permute.xlu1 %1152 }
 0x17f   : > { %v1159_v36 = vsel %vm476_vm6, %v1151_v0, %v1153_v33  ;;  %v1170_v3 = vadd.f32 %v1153_v33, %v1118_v10 }
 0x180   : > { %v1169_v12 = vadd.f32 %v1159_v36, %v1117_v40 }
 0x182   : > { %v1155_v30 = vpop.permute.xlu0 %1154  ;;  %v1157_v39 = vpop.permute.xlu1 %1156 }
 0x183   : > { %v1160_v21 = vsel %vm476_vm6, %v1155_v30, %v1157_v39  ;;  %v1172_v58 = vadd.f32 %v1157_v39, %v1120_v46 }
 0x184   : > { %v1171_v51 = vadd.f32 %v1160_v21, %v1119_v9 }
 0x186   : > { %v1188_v16 = vpop.permute.xlu0 %1187  ;;  %v1190_v7 = vpop.permute.xlu1 %1189 }
 0x187   : > { %v1196_v2 = vadd.f32 %v1188_v16, %v1167_v56  ;;  %v1197_v28 = vadd.f32 %v1188_v16, %v1168_v54  ;;  %v1198_v37 = vadd.f32 %v1190_v7, %v1169_v12  ;;  %v1199_v24 = vadd.f32 %v1190_v7, %v1170_v3 }
 0x18a   : > { %v1192_v61 = vpop.permute.xlu0 %1191  ;;  %v1217_v59 = vpop.permute.xlu1 %1216 }
 0x18b   : > { %v1225_v29 = vadd.f32 %v1217_v59, %v1196_v2  ;;  %v1226_v15 = vadd.f32 %v1217_v59, %v1197_v28  ;;  %v1200_v44 = vadd.f32 %v1192_v61, %v1171_v51  ;;  %v1201_v47 = vadd.f32 %v1192_v61, %v1172_v58 }
 0x18e   : > { %v1219_v38 = vpop.permute.xlu0 %1218  ;;  %v1221_v42 = vpop.permute.xlu1 %1220 }
 0x18f   : > { %v1227_v34 = vadd.f32 %v1219_v38, %v1198_v37  ;;  %v1228_v57 = vadd.f32 %v1219_v38, %v1199_v24  ;;  %v1229_v55 = vadd.f32 %v1221_v42, %v1200_v44  ;;  %v1230_v1 = vadd.f32 %v1221_v42, %v1201_v47 }
 0x192   : > { %v1246_v63 = vpop.permute.xlu0 %1245  ;;  %v1248_v25 = vpop.permute.xlu1 %1247 }
 0x193   : > { %v1254_v41 = vadd.f32 %v1246_v63, %v1225_v29  ;;  %v1255_v23 = vadd.f32 %v1246_v63, %v1226_v15  ;;  %v1256_v62 = vadd.f32 %v1248_v25, %v1227_v34  ;;  %v1257_v18 = vadd.f32 %v1248_v25, %v1228_v57 }
 0x195   : > { %v1262_v19 = vadd.f32 %v1261_v52, %v1254_v41  ;;  %v1263_v43 = vadd.f32 %v1261_v52, %v1255_v23  ;;  %v1264_v17 = vadd.f32 %v1261_v52, %v1256_v62  ;;  %v1265_v8 = vadd.f32 %v1261_v52, %v1257_v18 }
 0x196   : > { %v1250_v45 = vpop.permute.xlu0 %1249 }
 0x197   : > { %1276 = vrot.lane.b32.xlu0 %v1263_v43, %s1934_s17  ;;  %1274 = vrot.lane.b32.xlu1 %v1262_v19, %s1934_s17  ;;  %v1258_v31 = vadd.f32 %v1250_v45, %v1229_v55  ;;  %v1259_v20 = vadd.f32 %v1250_v45, %v1230_v1  ;;  %v1307_v48 = vmul.f32 %v1262_v19, %v1262_v19 }
 0x198   : > { %v1308_v13 = vmul.f32 %v1263_v43, %v1263_v43  ;;  %v1309_v5 = vmul.f32 %v1264_v17, %v1264_v17  ;;  %v1310_v35 = vmul.f32 %v1265_v8, %v1265_v8 }
 0x199   : > { %v1266_v32 = vadd.f32 %v1261_v52, %v1258_v31  ;;  %v1267_v22 = vadd.f32 %v1261_v52, %v1259_v20 }
 0x19b   : > { %1278 = vrot.lane.b32.xlu1 %v1264_v17, %s1934_s17  ;;  %1280 = vrot.lane.b32.xlu0 %v1265_v8, %s1934_s17  ;;  %v1311_v6 = vmul.f32 %v1266_v32, %v1266_v32  ;;  %v1312_v26 = vmul.f32 %v1267_v22, %v1267_v22 }
 0x19f   : > { %1282 = vrot.lane.b32.xlu1 %v1266_v32, %s1934_s17  ;;  %1284 = vrot.lane.b32.xlu0 %v1267_v22, %s1934_s17 }
 0x1a3   : > { %1319 = vrot.lane.b32.xlu1 %v1307_v48, %s1934_s17  ;;  %1321 = vrot.lane.b32.xlu0 %v1308_v13, %s1934_s17 }
 0x1a7   : > { %1323 = vrot.lane.b32.xlu1 %v1309_v5, %s1934_s17  ;;  %1325 = vrot.lane.b32.xlu0 %v1310_v35, %s1934_s17 }
 0x1ab   : > { %1327 = vrot.lane.b32.xlu1 %v1311_v6, %s1934_s17  ;;  %1329 = vrot.lane.b32.xlu0 %v1312_v26, %s1934_s17 }
 0x209   : > { %v1277_v53 = vpop.permute.xlu0 %1276  ;;  %v1275_v14 = vpop.permute.xlu1 %1274 }
 0x20a   : > { %v1287_v4 = vsel %vm1286_vm7, %v1275_v14, %v1277_v53 }
 0x20b   : > { %v1298_v27 = vsel %vm1293_vm8, %v1287_v4, 0.0  ;;  %1294 = vst.msk [vmem:[%s399_s20 - $0x6] sm:$0xc0] %vm1293_vm8, %v1287_v4 }
 0x20c   : > { %1299 = vadd.xlane.f32.xlu1 %v1298_v27 }
 0x20d   : > { %v1279_v11 = vpop.permute.xlu1 %1278  ;;  %v1281_v40 = vpop.permute.xlu0 %1280 }
 0x20e   : > { %v1288_v9 = vsel %vm1286_vm7, %v1279_v11, %v1281_v40 }
 0x20f   : > { %v1301_v10 = vsel %vm425_vm1, %v1288_v9, 0.0  ;;  %1295 = vst.msk [vmem:[%s399_s20 + $0x2] sm:$0xff] %vm425_vm1, %v1288_v9 }
 0x210   : > { %1302 = vadd.xlane.f32.xlu0 %v1301_v10 }
 0x211   : > { %v1283_v46 = vpop.permute.xlu1 %1282  ;;  %v1285_v49 = vpop.permute.xlu0 %1284 }
 0x212   : > { %v1289_v60 = vsel %vm1286_vm7, %v1283_v46, %v1285_v49 }
 0x213   : > { %v1304_v0 = vsel %vm1296_vm9, %v1289_v60, 0.0  ;;  %1297 = vst.msk [vmem:[%s399_s20 + $0xa] sm:$0x3f] %vm1296_vm9, %v1289_v60 }
 0x214   : > { %1305 = vadd.xlane.f32.xlu0 %v1304_v0 }
 0x215   : > { %v1320_v33 = vpop.permute.xlu1 %1319  ;;  %v1322_v30 = vpop.permute.xlu0 %1321 }
 0x216   : > { %v1331_v39 = vsel %vm1286_vm7, %v1320_v33, %v1322_v30 }
 0x217   : > { %v1337_v16 = vsel %vm1293_vm8, %v1331_v39, 0.0 }
 0x218   : > { %1338 = vadd.xlane.f32.xlu1 %v1337_v16 }
 0x219   : > { %v1324_v7 = vpop.permute.xlu1 %1323  ;;  %v1326_v50 = vpop.permute.xlu0 %1325 }
 0x21a   : > { %v1332_v61 = vsel %vm1286_vm7, %v1324_v7, %v1326_v50 }
 0x21b   : > { %v1340_v59 = vsel %vm425_vm1, %v1332_v61, 0.0 }
 0x21c   : > { %1341 = vadd.xlane.f32.xlu0 %v1340_v59 }
 0x21d   : > { %v1328_v36 = vpop.permute.xlu1 %1327  ;;  %v1330_v56 = vpop.permute.xlu0 %1329 }
 0x21e   : > { %v1333_v54 = vsel %vm1286_vm7, %v1328_v36, %v1330_v56 }
 0x21f   : > { %v1343_v3 = vsel %vm1296_vm9, %v1333_v54, 0.0 }
 0x220   : > { %1344 = vadd.xlane.f32.xlu1 %v1343_v3 }
 0x299   : > { %v1300_v42 = vpop.xlane.xlu1 %1299 }
 0x29a   : > { %v1350_v2 = vrot.slane %v1300_v42, 6 }
 0x29d   : > { %v1303_v38 = vpop.xlane.xlu0 %1302 }
 0x29e   : > { %v1351_v12 = vrot.slane %v1303_v38, 6 }
 0x2a0   : > { %v1352_v37 = vsel %vm1349_vm10, %v1350_v2, %v1351_v12 }
 0x2a1   : > { %v1306_v21 = vpop.xlane.xlu0 %1305 }
 0x2a2   : > { %v1353_v28 = vrot.slane %v1306_v21, 6 }
 0x2a4   : > { %v1354_v24 = vsel %vm1349_vm10, %v1351_v12, %v1353_v28 }
 0x2a5   : > { %v1357_v29 = vadd.f32 %v1354_v24, %v1352_v37  ;;  %v1339_v58 = vpop.xlane.xlu1 %1338 }
 0x2a6   : > { %v1369_v41 = vrot.slane %v1339_v58, 6 }
 0x2a7   : > { %v1358_v15 = vrot.slane %v1357_v29, 4 }
 0x2a9   : > { %v1359_v51 = vadd.f32 %v1358_v15, %v1357_v29  ;;  %v1342_v52 = vpop.xlane.xlu0 %1341 }
 0x2aa   : > { %v1370_v25 = vrot.slane %v1342_v52, 6 }
 0x2ab   : > { %v1360_v63 = vrot.slane %v1359_v51, 2 }
 0x2ac   : > { %v1371_v47 = vsel %vm1349_vm10, %v1369_v41, %v1370_v25 }
 0x2ad   : > { %v1361_v34 = vadd.f32 %v1360_v63, %v1359_v51  ;;  %v1345_v57 = vpop.xlane.xlu1 %1344 }
 0x2ae   : > { %v1372_v23 = vrot.slane %v1345_v57, 6 }
 0x2af   : > { %v1362_v44 = vrot.slane %v1361_v34, 1 }
 0x2b0   : > { %v1373_v19 = vsel %vm1349_vm10, %v1370_v25, %v1372_v23 }
 0x2b1   : > { %v1363_v43 = vadd.f32 %v1362_v44, %v1361_v34  ;;  %v1376_v62 = vadd.f32 %v1373_v19, %v1371_v47 }
 0x2b3   : > { %1365 = vst.msk [vmem:[%s406_s1] sm:$0x1] %vm1364_vm11, %v1363_v43  ;;  %v1377_v18 = vrot.slane %v1376_v62, 4 }
 0x2b5   : > { %v1378_v45 = vadd.f32 %v1377_v18, %v1376_v62 }
 0x2b7   : > { %v1379_v55 = vrot.slane %v1378_v45, 2 }
 0x2b9   : > { %v1380_v1 = vadd.f32 %v1379_v55, %v1378_v45 }
 0x2bb   : > { %v1381_v17 = vrot.slane %v1380_v1, 1 }
 0x2bd   : > { %v1382_v8 = vadd.f32 %v1381_v17, %v1380_v1 }
 0x2bf   : > { %1383 = vst.msk [vmem:[%s413_s22] sm:$0x1] %vm1364_vm11, %v1382_v8 }
 0x2c0 PF: > { %s24_s8 = sadd.s32 1, %s1920_s8   ;;  %s2748_s27 = sld [smem:[#allocation16_spill]] }
 0x2c1   : > { %p21_p5 = scmp.ge.s32.totalorder %s24_s8, 12   ;;  %s2749_s29 = sld [smem:[#allocation17_spill]] }
 0x2c2   : > { %s2750_s24 = smov %s1896_s25  ;;  %s2751_s25 = smov %s1900_s26 }
 0x2c3   : > { %s2752_s26 = smov %s2099_s2  ;;  %s2753_s28 = smov %s1916_s30 }
 0x2c4   : > { %s2754_s30 = smov %s2760_s23  ;;  %23 = sbr.rel (!%p21_p5) target bundleno = 13 (0xd), region = 121 }
 0x2cb   :  { %1453 = vsyncpa [#allocation4], 1 }
 0x2cc   :  { %1455 = vsyncpa [#allocation4 + $0x1], 1 }
 0x2cd   :  { %1456 = vsyncpa [#allocation5], 1 }
 0x2ce   :  { %1458 = vsyncpa [#allocation5 + $0x1], 1 }
 0x2cf   :  { %1459 = vsyncpa [#allocation8], 1 }
 0x2d0   :  { %1460 = vsyncpa [#allocation11], 1 }

// kernel: local_refine_forward.7
= control target key start
LH: loop header
LB: loop body
LE: loop exit
PB: predicated region body
PF: predicated region fallthrough
CT: control target
= control target key end

     0   :  { %13 = vsyncpa [#allocation4], 0  ;;  %s1584_s0 = inlined_call_operand.vmem [shape: f32[2,32,16,16], index: 0, kind: input, shape index: {}]   ;;  %s1585_s1 = inlined_call_operand.vmem [shape: f32[288], index: 1, kind: input, shape index: {}]   ;;  %s1586_s2 = inlined_call_operand.vmem [shape: f32[32], index: 2, kind: input, shape index: {}]   ;;  %s1587_s3 = inlined_call_operand.vmem [shape: f32[32], index: 3, kind: input, shape index: {}]   ;;  %s1588_s4 = inlined_call_operand.vmem [shape: f32[32], index: 4, kind: input, shape index: {}]   ;;  %s1589_s5 = inlined_call_operand.vmem [shape: f32[2,32,16,16], index: 5, kind: output, shape index: {0}]   ;;  %s1590_s6 = inlined_call_operand.vmem [shape: f32[2,32,1,1], index: 6, kind: output, shape index: {1}]   ;;  %s1591_s7 = inlined_call_operand.vmem [shape: f32[2,32,1,1], index: 7, kind: output, shape index: {2}]  }
   0x1   :  { %14 = vsyncpa [#allocation6], 0 }
   0x2   :  { %15 = vsyncpa [#allocation9], 0  ;;  %s1292_s24 = smov 0   ;;  %s1294_s25 = smov 0  }
   0x3   :  { %s1296_s26 = smov 0   ;;  %s1298_s27 = smov 0  }
   0x4   :  { %s1300_s28 = smov 0  }
   0x5 LB: > { %s258_s8 = sshll.u32 %s1586_s2, 4  ;;  %s1024_s9 = sadd.s32 4294967295, %s1242_s28   ;;  %s1242_s28 = sphi %s1300_s28, %s21_s28   ;;  %s1238_s27 = sphi %s1298_s27, %s1602_s27   ;;  %s1234_s26 = sphi %s1296_s26, %s1601_s26   ;;  %s1230_s25 = sphi %s1294_s25, %s1600_s25   ;;  %s1226_s24 = sphi %s1292_s24, %s1599_s24   ;;  %s259_s8 = int_to_ptr.vmem [resolvable:$true] %s258_s8 }
   0x6   : > { %p1026_p0 = scmp.ge.s32.totalorder %s1242_s28, 1  ;;  %p234_p1 = scmp.lt.s32.totalorder %s1242_s28, 65 }
   0x7   : > { %p1323_p2 = scmp.eq.s32.totalorder %s1024_s9, 0  ;;  %s30_s13 = sadd.s32 1, %s1234_s26 }
   0x8   : > { %p1327_p3 = pnand %p1026_p0, %p234_p1  ;;  %p1340_p6 = scmp.ge.s32.totalorder %s30_s13, 32 }
   0x9   : > { %s1594_s10 = scalar_select %p1323_p2, 1, 0 }
   0xa   : > { %p1063_p4 = pneg %p1327_p3  ;;  %s1132_s15 = scalar_lea.vmem %s259_s8, 16 }
   0xb   : > { %p1133_p7 = scmp.ne.s32.totalorder %s259_s8, %s1132_s15  ;;  %p1140_p11 = scmp.lt.s32.totalorder %s259_s8, %s259_s8 }
   0xc   : > { %p1335_p5 = pnand %p1323_p2, %p1063_p4  ;;  %p1141_p12 = scmp.lt.s32.totalorder %s1132_s15, %s1132_s15 }
   0xe   : > { %p1134_p8 = pneg %p1335_p5  ;;  %p1142_p13 = por %p1141_p12, %p1140_p11 }
  0x10   : > { %p1135_p9 = pnand %p1134_p8, %p1133_p7 }
  0x12   : > { %p1136_p10 = pneg %p1135_p9 }
  0x14   : > { %p1143_p0 = pnand %p1142_p13, %p1136_p10 }
  0x16   : > { %1146 = shalt.err (!%p1143_p0)
}
  0x17   : > { %s1244_s16 = smov [#allocation5]   ;;  %s1604_s13 = smov (%p1340_p6, %s30_s13), 0 }
  0x18   : > { %1069 = dma.vmem_to_smem (!%p1335_p5), %s259_s8, 16, %s1244_s16, [#allocation6]  }
  0x19   : > { %s33_s17 = sadd.s32 1, %s1238_s27  ;;  %s247_s20 = sshll.u32 %s1585_s1, 4  ;;  %s248_s20 = int_to_ptr.vmem [resolvable:$true] %s247_s20 }
  0x1a   : > { %s1606_s17 = smov (!%p1340_p6, %s33_s17), %s1238_s27  ;;  %s269_s23 = sshll.u32 %s1587_s3, 4  ;;  %s270_s23 = int_to_ptr.vmem [resolvable:$true] %s269_s23 }
  0x1b   : > { %p35_p1 = scmp.ge.s32.totalorder %s1606_s17, 2  ;;  %s1147_s29 = scalar_lea.vmem %s248_s20, 48 }
  0x1c   : > { %p1148_p4 = scmp.ne.s32.totalorder %s248_s20, %s1147_s29  ;;  %s1154_s30 = scalar_lea.vmem %s248_s20, 64 }
  0x1d   : > { %p1155_p10 = scmp.lt.s32.totalorder %s248_s20, %s248_s20  ;;  %p1156_p11 = scmp.lt.s32.totalorder %s1154_s30, %s1147_s29 }
  0x1e   : > { %p1150_p7 = pnand %p1148_p4, %p1134_p8 }
  0x1f   : > { %p1157_p12 = por %p1156_p11, %p1155_p10 }
  0x20   : > { %p1151_p9 = pneg %p1150_p7 }
  0x22   : > { %p1158_p13 = pnand %p1157_p12, %p1151_p9 }
  0x24   : > { %1161 = shalt.err (!%p1158_p13)
}
  0x25   : > { %s1245_s8 = smov [#allocation3]   ;;  %s1608_s17 = smov (%p35_p1, %s1606_s17), 0 }
  0x26   : > { %1066 = dma.vmem_to_smem (!%p1335_p5), %s248_s20, 48, %s1245_s8, [#allocation4]  }
  0x27   : > { %s1162_s9 = scalar_lea.vmem %s270_s23, 16  ;;  %p1170_p7 = scmp.lt.s32.totalorder %s270_s23, %s270_s23 }
  0x28   : > { %p1163_p6 = scmp.ne.s32.totalorder %s270_s23, %s1162_s9  ;;  %p1171_p2 = scmp.lt.s32.totalorder %s1162_s9, %s1162_s9 }
  0x2a   : > { %p1165_p0 = pnand %p1163_p6, %p1134_p8  ;;  %p1172_p10 = por %p1171_p2, %p1170_p7 }
  0x2c   : > { %p1166_p4 = pneg %p1165_p0 }
  0x2e   : > { %p1173_p9 = pnand %p1172_p10, %p1166_p4 }
  0x30   : > { %1176 = shalt.err (!%p1173_p9)
}
  0x31   : > { %s1246_s14 = smov [#allocation7]   ;;  %s280_s18 = sshll.u32 %s1588_s4, 4  ;;  %s281_s18 = int_to_ptr.vmem [resolvable:$true] %s280_s18 }
  0x32   : > { %1072 = dma.vmem_to_smem (!%p1335_p5), %s270_s23, 16, %s1246_s14, [#allocation6]  }
  0x33   : > { %s1177_s19 = scalar_lea.vmem %s281_s18, 16  ;;  %p1185_p13 = scmp.lt.s32.totalorder %s281_s18, %s281_s18 }
  0x34   : > { %p1178_p1 = scmp.ne.s32.totalorder %s281_s18, %s1177_s19  ;;  %p1186_p2 = scmp.lt.s32.totalorder %s1177_s19, %s1177_s19 }
  0x36   : > { %p1180_p11 = pnand %p1178_p1, %p1134_p8  ;;  %p1187_p6 = por %p1186_p2, %p1185_p13 }
  0x38   : > { %p1181_p12 = pneg %p1180_p11 }
  0x3a   : > { %p1188_p0 = pnand %p1187_p6, %p1181_p12 }
  0x3c   : > { %1191 = shalt.err (!%p1188_p0)
}
  0x3d   : > { %s1247_s20 = smov [#allocation8]   ;;  %305 = sbr.rel (%p1327_p3) target bundleno = 540 (0x21c), region = 40 }
  0x3e   : > { %1075 = dma.vmem_to_smem (!%p1335_p5), %s281_s18, 16, %s1247_s20, [#allocation9]  }
  0x3f   : > { %p1598_p4 = scmp.ne.s32.totalorder (!%p1327_p3), %s1594_s10, 0 }
  0x44   : > { %1213 = dma.done.wait (%p1598_p4), [#allocation4], 48  }
  0x45   : > { %1215 = vsyncadd (%p1598_p4), [#allocation4], 4294967248 }
  0x46   : > { %1217 = dma.done.wait (%p1598_p4), [#allocation6], 32  }
  0x47   : > { %1219 = vsyncadd (%p1598_p4), [#allocation6], 4294967264 }
  0x48   : > { %1221 = dma.done.wait (%p1598_p4), [#allocation9], 16  }
  0x49   : > { %1223 = vsyncadd (%p1598_p4), [#allocation9], 4294967280 }
  0x4a   : > { %323 = sfence }
  0x4b   : > { %vm417_vm0 = vcmask 195584   ;;  %s1401_s11 = smul.u32 9, %s1226_s24  ;;  %v1248_v0 = vmov 0.0   ;;  %p372_p3 = scmp.lt.s32.totalorder %s1230_s25, 1  ;;  %vm425_vm1 = vcmask 130048   ;;  %vm510_vm2 = vcmask 1046528  }
  0x4c   : > { %418 = vst.msk [vmem:[#allocation2 + $0x8] sm:$0xff] %vm417_vm0, %v1248_v0  ;;  %420 = vst.msk [vmem:[#allocation2 + $0x18] sm:$0xff] %vm417_vm0, %v1248_v0  ;;  %p374_p5 = scmp.lt.s32.totalorder %s1226_s24, 31  ;;  %s406_s23 = sld [smem:[#allocation7 + %s1226_s24]]  ;;  %vm600_vm3 = vcmask 1045504   ;;  %vm707_vm4 = vcmask 7168  }
  0x4d   : > { %416 = vst [vmem:[#allocation2] sm:$0xff] %v1248_v0  ;;  %419 = vst [vmem:[#allocation2 + $0x10] sm:$0xff] %v1248_v0  ;;  %s449_s10 = sadd.s32 1, %s1401_s11  ;;  %s473_s12 = sadd.s32 2, %s1401_s11  ;;  %vm714_vm5 = vcmask 130055   ;;  %vm717_vm6 = vcmask 129024  }
  0x4e   : > { %421 = vst [vmem:[#allocation2 + $0x20] sm:$0xff] %v1248_v0  ;;  %422 = vst.msk [vmem:[#allocation2 + $0x28] sm:$0xff] %vm417_vm0, %v1248_v0  ;;  %s450_s21 = sld [smem:[#allocation3 + %s449_s10]]  ;;  %s1610_s25 = smov (!%p372_p3, %s1230_s25), 1  ;;  %vm770_vm7 = vcmask 1040384   ;;  %vm785_vm8 = vcmask 0  }
  0x4f   : > { %423 = vst [vmem:[#allocation2 + $0x30] sm:$0xff] %v1248_v0  ;;  %424 = vst.msk [vmem:[#allocation2 + $0x38] sm:$0xff] %vm417_vm0, %v1248_v0  ;;  %s474_s22 = sld [smem:[#allocation3 + %s473_s12]]  ;;  %s1038_s29 = sshll.u32 %s1610_s25, 6 }
  0x50   : > { %s410_s30 = sld [smem:[#allocation8 + %s1226_s24]]  ;;  %s1249_s16 = smov 127  }
  0x51   : > { %s1414_s8 = scalar_select %p374_p5, %s1226_s24, 31 }
  0x52   : > { %v407_v6 = vstv %s406_s23  ;;  %s1250_s18 = smov 126   ;;  %s429_s12 = sld [smem:[#allocation3 + %s1401_s11]] }
  0x53   : > { %v431_v1 = vld [vmem:[#allocation2 + $0x8] sm:$0x80]  ;;  %s1037_s9 = sshll.u32 %s1414_s8, 1  ;;  %s554_s23 = sadd.s32 5, %s1401_s11 }
  0x54   : > { %v451_v2 = vstv %s450_s21  ;;  %s1417_s14 = sadd.s32 %s1038_s29, %s1037_s9  ;;  %s497_s21 = sadd.s32 3, %s1401_s11  ;;  %v581_v29 = vld [vmem:[#allocation2 + $0x10] sm:$0xfe] }
  0x55   : > { %v475_v3 = vstv %s474_s22  ;;  %v452_v4 = vmul.f32 %v451_v2, %v431_v1  ;;  %s1039_s15 = sshll.u32 %s1417_s14, 3  ;;  %s498_s22 = sld [smem:[#allocation3 + %s497_s21]] }
  0x56   : > { %v476_v5 = vmul.f32 %v475_v3, %v431_v1  ;;  %s380_s10 = scalar_lea.vmem %s1584_s0, %s1039_s15  ;;  %v411_v8 = vstv %s410_s30  ;;  %s529_s29 = sadd.s32 4, %s1401_s11  ;;  %v585_v50 = vld [vmem:[#allocation2 + $0x30] sm:$0x1]  ;;  %v586_v55 = vld [vmem:[#allocation2 + $0x38] sm:$0x1] }
  0x57   : > { %458 = vrot.lane.b32.xlu0 %v452_v4, %s1249_s16  ;;  %v405_v7 = vld [vmem:[%s380_s10 + $0x8] sm:$0xff]  ;;  %v404_v9 = vld [vmem:[%s380_s10] sm:$0xff]  ;;  %s579_s9 = sadd.s32 6, %s1401_s11  ;;  %s1432_s19 = sld [smem:[#allocation3 + %s554_s23]] }
  0x58   : > { %482 = vrot.lane.b32.xlu1 %v476_v5, %s1250_s18  ;;  %v409_v10 = vmul.f32 %v407_v6, %v405_v7  ;;  %v408_v11 = vmul.f32 %v407_v6, %v404_v9  ;;  %s1434_s20 = sld [smem:[#allocation3 + %s529_s29]]  ;;  %v1436_v16 = vstv %s429_s12  ;;  %s652_s30 = sadd.s32 8, %s1401_s11 }
  0x59   : > { %v1441_v17 = vmul.f32 %v1436_v16, %v431_v1  ;;  %v1445_v18 = vmul.f32 0.0, %v1436_v16  ;;  %s580_s10 = sld [smem:[#allocation3 + %s579_s9]]  ;;  %s623_s21 = sadd.s32 7, %s1401_s11 }
  0x5a   : > { %v413_v12 = vadd.f32 %v411_v8, %v409_v10  ;;  %v412_v13 = vadd.f32 %v411_v8, %v408_v11  ;;  %s653_s23 = sld [smem:[#allocation3 + %s652_s30]]  ;;  %s1043_s14 = sshll.u32 %s1610_s25, 5 }
  0x5b   : > { %v501_v19 = vstv %s498_s22  ;;  %s624_s12 = sld [smem:[#allocation3 + %s623_s21]]  ;;  %s389_s22 = scalar_lea.vmem %s1589_s5, %s1039_s15 }
  0x5c   : > { %v415_v14 = vmax.f32 %v413_v12, 0.0  ;;  %v414_v15 = vmax.f32 %v412_v13, 0.0  ;;  %v502_v20 = vmul.f32 0.0, %v501_v19  ;;  %s681_s11 = sld [smem:[#allocation5 + %s1226_s24]]  ;;  %s1251_s24 = smov 1  }
  0x5d   : > { %v556_v24 = vstv %s1432_s19  ;;  %s395_s15 = sadd.s32 %s1043_s14, %s1414_s8 }
  0x5e   : > { %427 = vst.msk [vmem:[#allocation2 + $0x28] sm:$0xff] %vm425_vm1, %v415_v14  ;;  %426 = vst.msk [vmem:[#allocation2 + $0x18] sm:$0xff] %vm425_vm1, %v414_v15  ;;  %v1448_v21 = vrot.slane %v502_v20, 1  ;;  %v531_v25 = vstv %s1434_s20  ;;  %s396_s19 = scalar_lea.vmem %s1590_s6, %s395_s15  ;;  %s403_s30 = scalar_lea.vmem %s1591_s7, %s395_s15 }
  0x5f   : > { %v587_v30 = vstv %s580_s10 }
  0x60   : > { %v654_v35 = vstv %s653_s23  ;;  %v1454_v36 = vmul.f32 %v587_v30, %v581_v29  ;;  %v590_v48 = vmul.f32 0.0, %v587_v30  ;;  %v592_v62 = vmul.f32 %v587_v30, %v585_v50 }
  0x61   : > { %v625_v39 = vstv %s624_s12  ;;  %v593_v63 = vmul.f32 %v587_v30, %v586_v55  ;;  %v657_v12 = vmul.f32 %v654_v35, %v586_v55 }
  0x62   : > { %v601_v54 = vrot.slane %v1454_v36, 2  ;;  %v603_v58 = vrot.slane %v590_v48, 2  ;;  %v628_v5 = vmul.f32 %v625_v39, %v586_v55 }
  0x63   : > { %v609_v4 = vrot.slane %v593_v63, 2 }
  0x64   : > { %v1482_v1 = vsel %vm600_vm3, %v601_v54, %v603_v58  ;;  %v635_v11 = vrot.slane %v628_v5, 2 }
  0x65   : > { %v435_v22 = vld [vmem:[#allocation2 + $0x28] sm:$0x7f]  ;;  %v433_v23 = vld [vmem:[#allocation2 + $0x18] sm:$0xff] }
  0x66   : > { %v454_v26 = vmul.f32 %v451_v2, %v435_v22  ;;  %v453_v27 = vmul.f32 %v451_v2, %v433_v23  ;;  %v478_v28 = vmul.f32 %v475_v3, %v435_v22  ;;  %v477_v31 = vmul.f32 %v475_v3, %v433_v23  ;;  %v500_v34 = vld [vmem:[#allocation2 + $0x28] sm:$0xff]  ;;  %v582_v38 = vld [vmem:[#allocation2 + $0x18] sm:$0xfe] }
  0x67   : > { %v557_v32 = vmul.f32 %v556_v24, %v433_v23  ;;  %v532_v33 = vmul.f32 %v531_v25, %v433_v23  ;;  %v558_v37 = vmul.f32 %v556_v24, %v500_v34  ;;  %v1457_v40 = vmul.f32 %v1436_v16, %v435_v22 }
  0x68   : > { %462 = vrot.lane.b32.xlu1 %v454_v26, %s1249_s16  ;;  %460 = vrot.lane.b32.xlu0 %v453_v27, %s1249_s16  ;;  %v1460_v41 = vmul.f32 %v1436_v16, %v433_v23  ;;  %v533_v44 = vmul.f32 %v531_v25, %v500_v34  ;;  %v1464_v45 = vmul.f32 %v501_v19, %v433_v23  ;;  %v607_v3 = vrot.slane %v592_v62, 2  ;;  %v430_v27 = vld [vmem:[#allocation2] sm:$0x80] }
  0x69   : > { %v561_v42 = vrot.slane %v557_v32, 1  ;;  %v536_v43 = vrot.slane %v532_v33, 1  ;;  %v1466_v46 = vmul.f32 %v501_v19, %v500_v34  ;;  %v1468_v47 = vmul.f32 %v587_v30, %v582_v38 }
  0x6a   : > { %v591_v49 = vmul.f32 %v587_v30, %v500_v34  ;;  %v655_v51 = vmul.f32 %v654_v35, %v582_v38  ;;  %v626_v52 = vmul.f32 %v625_v39, %v582_v38  ;;  %v512_v53 = vrot.slane %v1464_v45, 1  ;;  %v434_v38 = vld [vmem:[#allocation2 + $0x20] sm:$0x7f] }
  0x6b   : > { %v515_v56 = vrot.slane %v1466_v46, 1  ;;  %v602_v57 = vrot.slane %v1468_v47, 2  ;;  %v562_v60 = vrot.slane %v558_v37, 1  ;;  %v537_v61 = vrot.slane %v533_v44, 1 }
  0x6c   : > { %486 = vrot.lane.b32.xlu1 %v478_v28, %s1250_s18  ;;  %484 = vrot.lane.b32.xlu0 %v477_v31, %s1250_s18  ;;  %v605_v59 = vrot.slane %v591_v49, 2  ;;  %v661_v6 = vrot.slane %v655_v51, 2  ;;  %v632_v7 = vrot.slane %v626_v52, 2  ;;  %v1492_v8 = vsel %vm600_vm3, %v603_v58, %v607_v3 }
  0x6d   : > { %v516_v0 = vsel %vm510_vm2, %v512_v53, %v515_v56  ;;  %v627_v10 = vmul.f32 %v625_v39, %v500_v34  ;;  %v538_v13 = vsel %vm510_vm2, %v536_v43, %v537_v61  ;;  %v563_v14 = vsel %vm510_vm2, %v561_v42, %v562_v60 }
  0x6e   : > { %v1487_v2 = vsel %vm600_vm3, %v602_v57, %v605_v59  ;;  %v1495_v9 = vsel %vm600_vm3, %v605_v59, %v609_v4  ;;  %v656_v19 = vmul.f32 %v654_v35, %v500_v34  ;;  %v664_v24 = vrot.slane %v657_v12, 2 }
  0x6f   : > { %v633_v15 = vrot.slane %v627_v10, 2  ;;  %v437_v28 = vmul.f32 %v1436_v16, %v430_v27  ;;  %v441_v39 = vmul.f32 %v1436_v16, %v434_v38 }
  0x70   : > { %564 = vrot.lane.b32.xlu1 %v561_v42, %s1250_s18  ;;  %539 = vrot.lane.b32.xlu0 %v536_v43, %s1249_s16  ;;  %v662_v23 = vrot.slane %v656_v19, 2 }
  0x71   : > { %v634_v20 = vsel %vm600_vm3, %v632_v7, %v633_v15  ;;  %v636_v22 = vsel %vm600_vm3, %v633_v15, %v635_v11  ;;  %v682_v15 = vstv %s681_s11 }
  0x72   : > { %v665_v25 = vsel %vm600_vm3, %v662_v23, %v664_v24  ;;  %v663_v26 = vsel %vm600_vm3, %v661_v6, %v662_v23 }
  0x74   : > { %568 = vrot.lane.b32.xlu1 %v562_v60, %s1250_s18  ;;  %543 = vrot.lane.b32.xlu0 %v537_v61, %s1249_s16 }
  0x78   : > { %666 = vrot.lane.b32.xlu1 %v661_v6, %s1250_s18  ;;  %637 = vrot.lane.b32.xlu0 %v632_v7, %s1249_s16 }
  0x7c   : > { %541 = vrot.lane.b32.xlu1 %v538_v13, %s1249_s16  ;;  %566 = vrot.lane.b32.xlu0 %v563_v14, %s1250_s18 }
  0x80   : > { %639 = vrot.lane.b32.xlu1 %v634_v20, %s1249_s16  ;;  %641 = vrot.lane.b32.xlu0 %v636_v22, %s1249_s16 }
  0x84   : > { %670 = vrot.lane.b32.xlu1 %v665_v25, %s1250_s18  ;;  %668 = vrot.lane.b32.xlu0 %v663_v26, %s1250_s18 }
  0xc9   : > { %v459_v29 = vpop.permute.xlu0 %458 }
  0xca   : > { %v483_v30 = vpop.permute.xlu1 %482  ;;  %v467_v31 = vadd.f32 %v459_v29, %v437_v28  ;;  %v468_v32 = vadd.f32 %v459_v29, %v1441_v17 }
  0xcc   : > { %v491_v33 = vadd.f32 %v483_v30, %v467_v31  ;;  %v492_v34 = vadd.f32 %v483_v30, %v468_v32 }
  0xce   : > { %v523_v35 = vadd.f32 %v1448_v21, %v491_v33  ;;  %v524_v37 = vadd.f32 %v512_v53, %v492_v34 }
  0xda   : > { %v463_v42 = vpop.permute.xlu1 %462  ;;  %v461_v43 = vpop.permute.xlu0 %460 }
  0xdb   : > { %v471_v44 = vadd.f32 %v463_v42, %v441_v39  ;;  %v472_v45 = vadd.f32 %v463_v42, %v1457_v40  ;;  %v469_v48 = vadd.f32 %v461_v43, %v1445_v18  ;;  %v470_v49 = vadd.f32 %v461_v43, %v1460_v41 }
  0xde   : > { %v487_v50 = vpop.permute.xlu1 %486  ;;  %v485_v17 = vpop.permute.xlu0 %484 }
  0xdf   : > { %v495_v51 = vadd.f32 %v487_v50, %v471_v44  ;;  %v496_v52 = vadd.f32 %v487_v50, %v472_v45  ;;  %v493_v55 = vadd.f32 %v485_v17, %v469_v48  ;;  %v494_v58 = vadd.f32 %v485_v17, %v470_v49 }
  0xe1   : > { %v527_v53 = vadd.f32 %v1448_v21, %v495_v51  ;;  %v528_v16 = vadd.f32 %v515_v56, %v496_v52  ;;  %v525_v59 = vadd.f32 %v1448_v21, %v493_v55  ;;  %v526_v60 = vadd.f32 %v516_v0, %v494_v58 }
  0xe2   : > { %v565_v40 = vpop.permute.xlu1 %564  ;;  %v540_v61 = vpop.permute.xlu0 %539 }
  0xe3   : > { %v548_v18 = vadd.f32 %v540_v61, %v523_v35  ;;  %v549_v62 = vadd.f32 %v540_v61, %v524_v37 }
  0xe5   : > { %v573_v41 = vadd.f32 %v565_v40, %v548_v18  ;;  %v574_v63 = vadd.f32 %v565_v40, %v549_v62 }
  0xe6   : > { %v569_v3 = vpop.permute.xlu1 %568  ;;  %v544_v4 = vpop.permute.xlu0 %543 }
  0xe7   : > { %v552_v5 = vadd.f32 %v544_v4, %v527_v53  ;;  %v553_v6 = vadd.f32 %v544_v4, %v528_v16  ;;  %v617_v7 = vadd.f32 %v601_v54, %v573_v41  ;;  %v618_v46 = vadd.f32 %v602_v57, %v574_v63 }
  0xe9   : > { %v577_v56 = vadd.f32 %v569_v3, %v552_v5  ;;  %v578_v21 = vadd.f32 %v569_v3, %v553_v6 }
  0xea   : > { %v667_v0 = vpop.permute.xlu1 %666  ;;  %v638_v10 = vpop.permute.xlu0 %637 }
  0xeb   : > { %v646_v11 = vadd.f32 %v638_v10, %v617_v7  ;;  %v647_v12 = vadd.f32 %v638_v10, %v618_v46  ;;  %v621_v13 = vadd.f32 %v1492_v8, %v577_v56  ;;  %v622_v14 = vadd.f32 %v1495_v9, %v578_v21 }
  0xed   : > { %v675_v19 = vadd.f32 %v667_v0, %v646_v11  ;;  %v676_v20 = vadd.f32 %v667_v0, %v647_v12 }
  0xee   : > { %v542_v22 = vpop.permute.xlu1 %541  ;;  %v567_v23 = vpop.permute.xlu0 %566 }
  0xef   : > { %v550_v36 = vadd.f32 %v542_v22, %v525_v59  ;;  %v551_v54 = vadd.f32 %v542_v22, %v526_v60  ;;  %v684_v24 = vadd.f32 %v682_v15, %v676_v20  ;;  %v683_v47 = vadd.f32 %v682_v15, %v675_v19 }
  0xf1   : > { %v575_v57 = vadd.f32 %v567_v23, %v550_v36  ;;  %v576_v25 = vadd.f32 %v567_v23, %v551_v54  ;;  %697 = vrot.lane.b32.xlu1 %v684_v24, %s1251_s24  ;;  %695 = vrot.lane.b32.xlu0 %v683_v47, %s1251_s24  ;;  %v729_v28 = vmul.f32 %v684_v24, %v684_v24 }
  0xf2   : > { %v640_v26 = vpop.permute.xlu1 %639  ;;  %v642_v8 = vpop.permute.xlu0 %641  ;;  %v728_v29 = vmul.f32 %v683_v47, %v683_v47 }
  0xf3   : > { %v619_v9 = vadd.f32 %v1482_v1, %v575_v57  ;;  %v620_v27 = vadd.f32 %v1487_v2, %v576_v25  ;;  %v650_v34 = vadd.f32 %v642_v8, %v621_v13  ;;  %v651_v35 = vadd.f32 %v642_v8, %v622_v14 }
  0xf5   : > { %v648_v30 = vadd.f32 %v640_v26, %v619_v9  ;;  %v649_v31 = vadd.f32 %v640_v26, %v620_v27  ;;  %742 = vrot.lane.b32.xlu1 %v729_v28, %s1251_s24  ;;  %740 = vrot.lane.b32.xlu0 %v728_v29, %s1251_s24 }
  0xf6   : > { %v671_v32 = vpop.permute.xlu1 %670  ;;  %v669_v33 = vpop.permute.xlu0 %668 }
  0xf7   : > { %v677_v37 = vadd.f32 %v669_v33, %v648_v30  ;;  %v678_v38 = vadd.f32 %v669_v33, %v649_v31  ;;  %v679_v39 = vadd.f32 %v671_v32, %v650_v34  ;;  %v680_v42 = vadd.f32 %v671_v32, %v651_v35 }
  0xf9   : > { %v685_v43 = vadd.f32 %v682_v15, %v677_v37  ;;  %v686_v1 = vadd.f32 %v682_v15, %v678_v38  ;;  %v687_v2 = vadd.f32 %v682_v15, %v679_v39  ;;  %v688_v44 = vadd.f32 %v682_v15, %v680_v42 }
  0xfb   : > { %699 = vrot.lane.b32.xlu0 %v685_v43, %s1251_s24  ;;  %701 = vrot.lane.b32.xlu1 %v686_v1, %s1251_s24  ;;  %v730_v45 = vmul.f32 %v685_v43, %v685_v43  ;;  %v731_v48 = vmul.f32 %v686_v1, %v686_v1  ;;  %v732_v49 = vmul.f32 %v687_v2, %v687_v2 }
  0xfc   : > { %v733_v50 = vmul.f32 %v688_v44, %v688_v44 }
  0xff   : > { %703 = vrot.lane.b32.xlu0 %v687_v2, %s1251_s24  ;;  %705 = vrot.lane.b32.xlu1 %v688_v44, %s1251_s24 }
 0x103   : > { %744 = vrot.lane.b32.xlu0 %v730_v45, %s1251_s24  ;;  %746 = vrot.lane.b32.xlu1 %v731_v48, %s1251_s24 }
 0x107   : > { %748 = vrot.lane.b32.xlu0 %v732_v49, %s1251_s24  ;;  %750 = vrot.lane.b32.xlu1 %v733_v50, %s1251_s24 }
 0x163   : > { %v698_v17 = vpop.permute.xlu1 %697  ;;  %v696_v51 = vpop.permute.xlu0 %695 }
 0x164   : > { %v708_v52 = vsel %vm707_vm4, %v696_v51, %v698_v17 }
 0x165   : > { %v719_v55 = vsel %vm714_vm5, %v708_v52, 0.0  ;;  %715 = vst.msk [vmem:[%s389_s22 - $0x7] sm:$0x80] %vm714_vm5, %v708_v52 }
 0x166   : > { %720 = vadd.xlane.f32.xlu0 %v719_v55 }
 0x167   : > { %v743_v58 = vpop.permute.xlu1 %742  ;;  %v741_v53 = vpop.permute.xlu0 %740 }
 0x168   : > { %v752_v16 = vsel %vm707_vm4, %v741_v53, %v743_v58 }
 0x169   : > { %v758_v59 = vsel %vm714_vm5, %v752_v16, 0.0 }
 0x16a   : > { %759 = vadd.xlane.f32.xlu0 %v758_v59 }
 0x16d   : > { %v700_v60 = vpop.permute.xlu0 %699  ;;  %v702_v40 = vpop.permute.xlu1 %701 }
 0x16e   : > { %v709_v61 = vsel %vm707_vm4, %v700_v60, %v702_v40 }
 0x16f   : > { %716 = vst.msk [vmem:[%s389_s22 + $0x1] sm:$0xff] %vm425_vm1, %v709_v61  ;;  %v722_v18 = vsel %vm425_vm1, %v709_v61, 0.0 }
 0x170   : > { %723 = vadd.xlane.f32.xlu1 %v722_v18 }
 0x171   : > { %v704_v62 = vpop.permute.xlu0 %703  ;;  %v706_v41 = vpop.permute.xlu1 %705 }
 0x172   : > { %v710_v63 = vsel %vm707_vm4, %v704_v62, %v706_v41 }
 0x173   : > { %v725_v3 = vsel %vm717_vm6, %v710_v63, 0.0  ;;  %718 = vst.msk [vmem:[%s389_s22 + $0x9] sm:$0x7f] %vm717_vm6, %v710_v63 }
 0x174   : > { %726 = vadd.xlane.f32.xlu0 %v725_v3 }
 0x175   : > { %v745_v4 = vpop.permute.xlu0 %744  ;;  %v747_v5 = vpop.permute.xlu1 %746 }
 0x176   : > { %v753_v6 = vsel %vm707_vm4, %v745_v4, %v747_v5 }
 0x177   : > { %v761_v7 = vsel %vm425_vm1, %v753_v6, 0.0 }
 0x178   : > { %762 = vadd.xlane.f32.xlu1 %v761_v7 }
 0x179   : > { %v749_v46 = vpop.permute.xlu0 %748  ;;  %v751_v56 = vpop.permute.xlu1 %750 }
 0x17a   : > { %v754_v21 = vsel %vm707_vm4, %v749_v46, %v751_v56 }
 0x17b   : > { %v764_v0 = vsel %vm717_vm6, %v754_v21, 0.0 }
 0x17c   : > { %765 = vadd.xlane.f32.xlu0 %v764_v0 }
 0x1f3   : > { %v721_v10 = vpop.xlane.xlu0 %720 }
 0x1f4   : > { %v771_v15 = vrot.slane %v721_v10, 7 }
 0x1f7   : > { %v760_v11 = vpop.xlane.xlu0 %759 }
 0x1f8   : > { %v790_v25 = vrot.slane %v760_v11, 7 }
 0x1fd   : > { %v724_v12 = vpop.xlane.xlu1 %723 }
 0x1fe   : > { %v772_v13 = vrot.slane %v724_v12, 7 }
 0x200   : > { %v773_v20 = vsel %vm770_vm7, %v771_v15, %v772_v13 }
 0x201   : > { %v727_v14 = vpop.xlane.xlu0 %726 }
 0x202   : > { %v774_v19 = vrot.slane %v727_v14, 7 }
 0x204   : > { %v775_v22 = vsel %vm770_vm7, %v772_v13, %v774_v19 }
 0x205   : > { %v778_v23 = vadd.f32 %v775_v22, %v773_v20  ;;  %v763_v36 = vpop.xlane.xlu1 %762 }
 0x206   : > { %v791_v24 = vrot.slane %v763_v36, 7 }
 0x207   : > { %v779_v54 = vrot.slane %v778_v23, 4 }
 0x208   : > { %v792_v9 = vsel %vm770_vm7, %v790_v25, %v791_v24 }
 0x209   : > { %v780_v47 = vadd.f32 %v779_v54, %v778_v23  ;;  %v766_v57 = vpop.xlane.xlu0 %765 }
 0x20a   : > { %v793_v26 = vrot.slane %v766_v57, 7 }
 0x20b   : > { %v781_v8 = vrot.slane %v780_v47, 2 }
 0x20c   : > { %v794_v27 = vsel %vm770_vm7, %v791_v24, %v793_v26 }
 0x20d   : > { %v782_v28 = vadd.f32 %v781_v8, %v780_v47  ;;  %v797_v29 = vadd.f32 %v794_v27, %v792_v9 }
 0x20f   : > { %v783_v30 = vrot.slane %v782_v28, 1  ;;  %v798_v31 = vrot.slane %v797_v29, 4 }
 0x211   : > { %v784_v32 = vadd.f32 %v783_v30, %v782_v28  ;;  %v799_v33 = vadd.f32 %v798_v31, %v797_v29 }
 0x213   : > { %786 = vst.msk [vmem:[%s396_s19] sm:$0x1] %vm785_vm8, %v784_v32  ;;  %v800_v34 = vrot.slane %v799_v33, 2 }
 0x215   : > { %v801_v35 = vadd.f32 %v800_v34, %v799_v33 }
 0x217   : > { %v802_v37 = vrot.slane %v801_v35, 1 }
 0x219   : > { %v803_v38 = vadd.f32 %v802_v37, %v801_v35 }
 0x21b   : > { %804 = vst.msk [vmem:[%s403_s30] sm:$0x1] %vm785_vm8, %v803_v38 }
 0x21c PF: > { %s21_s28 = sadd.s32 1, %s1242_s28   ;;  %s1599_s24 = smov %s1234_s26 }
 0x21d   : > { %p18_p8 = scmp.ge.s32.totalorder %s21_s28, 66   ;;  %s1600_s25 = smov %s1238_s27 }
 0x21e   : > { %s1601_s26 = smov %s1604_s13  ;;  %s1602_s27 = smov %s1608_s17 }
 0x21f   :  { %20 = sbr.rel (!%p18_p8) target bundleno = 5 (0x5), region = 111 }
 0x226   :  { %874 = vsyncpa [#allocation4], 1 }
 0x227   :  { %876 = vsyncpa [#allocation4 + $0x1], 1 }
 0x228   :  { %877 = vsyncpa [#allocation6], 1 }
 0x229   :  { %878 = vsyncpa [#allocation9], 1 }

// kernel: local_refine_forward.8
= control target key start
LH: loop header
LB: loop body
LE: loop exit
PB: predicated region body
PF: predicated region fallthrough
CT: control target
= control target key end

     0   :  { %s944_s24 = smov 0   ;;  %s946_s25 = smov 0   ;;  %s1065_s0 = inlined_call_operand.vmem [shape: f32[2,32,256], index: 0, kind: input, shape index: {}]   ;;  %s1066_s1 = inlined_call_operand.vmem [shape: f32[32,1], index: 1, kind: input, shape index: {}]   ;;  %s1067_s2 = inlined_call_operand.vmem [shape: f32[32,1], index: 2, kind: input, shape index: {}]   ;;  %s1068_s3 = inlined_call_operand.vmem [shape: f32[32,32], index: 3, kind: input, shape index: {}]   ;;  %s1069_s4 = inlined_call_operand.vmem [shape: f32[32,1], index: 4, kind: input, shape index: {}]   ;;  %s1070_s5 = inlined_call_operand.vmem [shape: f32[2,32,256], index: 5, kind: output, shape index: {0}]   ;;  %s1071_s6 = inlined_call_operand.vmem [shape: f32[2,1,32,1], index: 6, kind: output, shape index: {1}]   ;;  %s1072_s7 = inlined_call_operand.vmem [shape: f32[2,1,32,1], index: 7, kind: output, shape index: {2}]  }
   0x1   :  { %s948_s26 = smov 0  }
   0x2 LB: > { %s30_s27 = sadd.s32 1, %s896_s25  ;;  %p819_p0 = scmp.ge.s32.totalorder %s900_s26, 1  ;;  %s900_s26 = sphi %s948_s26, %s18_s26   ;;  %s896_s25 = sphi %s946_s25, %s1074_s25   ;;  %s892_s24 = sphi %s944_s24, %s1073_s24  }
   0x3   : > { %p32_p1 = scmp.ge.s32.totalorder %s30_s27, 2  ;;  %p267_p2 = scmp.lt.s32.totalorder %s900_s26, 3 }
   0x5   : > { %s1076_s27 = smov (%p32_p1, %s30_s27), 0  ;;  %p268_p3 = pnand %p819_p0, %p267_p2 }
   0x6   : > { %v403_v0 = vld [vmem:[%s1067_s2] sm:$0xff] (!%p268_p3)  ;;  %v902_v2 = vmov (!%p268_p3), 0   ;;  %v404_v3 = vld [vmem:[%s1067_s2 + $0x8] sm:$0xff] (!%p268_p3)  ;;  %v374_v5 = vld [vmem:[%s1066_s1 + $0x18] sm:$0xff] (!%p268_p3)  ;;  %v903_v13 = vmov (!%p268_p3), 0.0   ;;  %p326_p4 = scmp.lt.s32.totalorder (!%p268_p3), %s892_s24, 1 }
   0x7   : > { %271 = sbr.rel (%p268_p3) target bundleno = 534 (0x216), region = 40  ;;  %v371_v1 = vld [vmem:[%s1066_s1] sm:$0xff] (!%p268_p3)  ;;  %877 = vset.pattern.permute.xlu1 (!%p268_p3), %v902_v2  ;;  %876 = vset.pattern.permute.xlu0 (!%p268_p3), %v902_v2  ;;  %v372_v4 = vld [vmem:[%s1066_s1 + $0x8] sm:$0xff] (!%p268_p3)  ;;  %v373_v6 = vld [vmem:[%s1066_s1 + $0x10] sm:$0xff] (!%p268_p3)  ;;  %vm471_vm0 = vcmask (!%p268_p3), 261120   ;;  %vm593_vm1 = vcmask (!%p268_p3), 7168  }
   0x8   : > { %409 = vperm.xlu1 (!%p268_p3), %877, %v403_v0   ;;  %377 = vperm.xlu0 (!%p268_p3), %876, %v371_v1   ;;  %v406_v7 = vld [vmem:[%s1067_s2 + $0x18] sm:$0xff] (!%p268_p3)  ;;  %v405_v8 = vld [vmem:[%s1067_s2 + $0x10] sm:$0xff] (!%p268_p3)  ;;  %v448_v9 = vld [vmem:[%s1069_s4 + $0x8] sm:$0xff] (!%p268_p3) }
   0x9   : > { %v447_v10 = vld [vmem:[%s1069_s4] sm:$0xff] (!%p268_p3)  ;;  %v450_v11 = vld [vmem:[%s1069_s4 + $0x18] sm:$0xff] (!%p268_p3)  ;;  %v449_v12 = vld [vmem:[%s1069_s4 + $0x10] sm:$0xff] (!%p268_p3)  ;;  %548 = vmatprep.mubr.f32.mxu0 (!%p268_p3), %v903_v13  ;;  %560 = vmatprep.mubr.f32.mxu1 (!%p268_p3), %v903_v13 }
   0xa   : > { %v443_v58 = vld [vmem:[%s1068_s3] sm:$0xff] (!%p268_p3)  ;;  %v445_v59 = vld [vmem:[%s1068_s3 + $0x10] sm:$0xff] (!%p268_p3)  ;;  %v444_v60 = vld [vmem:[%s1068_s3 + $0x8] sm:$0xff] (!%p268_p3) }
   0xb   : > { %v446_v61 = vld [vmem:[%s1068_s3 + $0x18] sm:$0xff] (!%p268_p3) }
   0xc   : > { %414 = vperm.xlu1 (!%p268_p3), %877, %v404_v3   ;;  %382 = vperm.xlu0 (!%p268_p3), %876, %v372_v4  }
   0xe   : > { %s1078_s24 = smov (!%p326_p4, %s892_s24), 1 }
   0xf   : > { %s834_s10 = sshll.u32 %s1078_s24, 6  ;;  %s836_s29 = sshll.u32 %s1078_s24, 5 }
  0x10   : > { %392 = vperm.xlu1 %877, %v374_v5   ;;  %387 = vperm.xlu0 %876, %v373_v6   ;;  %s333_s13 = scalar_lea.vmem %s1065_s0, %s834_s10  ;;  %s1031_s28 = scalar_lea.vmem %s1070_s5, %s834_s10 }
  0x11   : > { %v363_v14 = vld [vmem:[%s333_s13] sm:$0xff]  ;;  %v364_v15 = vld [vmem:[%s333_s13 + $0x8] sm:$0xff]  ;;  %v365_v20 = vld [vmem:[%s333_s13 + $0x10] sm:$0xff]  ;;  %s353_s9 = scalar_lea.vmem %s1071_s6, %s836_s29  ;;  %s362_s12 = scalar_lea.vmem %s1072_s7, %s836_s29 }
  0x12   : > { %v366_v21 = vld [vmem:[%s333_s13 + $0x18] sm:$0xff]  ;;  %v369_v30 = vld [vmem:[%s333_s13 + $0x30] sm:$0xff]  ;;  %v367_v34 = vld [vmem:[%s333_s13 + $0x20] sm:$0xff] }
  0x13   : > { %v370_v32 = vld [vmem:[%s333_s13 + $0x38] sm:$0xff]  ;;  %v368_v35 = vld [vmem:[%s333_s13 + $0x28] sm:$0xff] }
  0x14   : > { %424 = vperm.xlu1 %877, %v406_v7   ;;  %419 = vperm.xlu0 %876, %v405_v8  }
  0x18   : > { %458 = vperm.xlu1 %877, %v448_v9   ;;  %453 = vperm.xlu0 %876, %v447_v10  }
  0x1c   : > { %468 = vperm.xlu1 %877, %v450_v11   ;;  %463 = vperm.xlu0 %876, %v449_v12  }
  0x87   : > { %v410_v16 = vpop.permute.xlu1 %409  ;;  %v378_v17 = vpop.permute.xlu0 %377 }
  0x88   : > { %v395_v18 = vmul.f32 %v378_v17, %v363_v14  ;;  %v396_v19 = vmul.f32 %v378_v17, %v364_v15 }
  0x8a   : > { %v427_v26 = vadd.f32 %v410_v16, %v395_v18  ;;  %v428_v27 = vadd.f32 %v410_v16, %v396_v19 }
  0x8b   : > { %v415_v22 = vpop.permute.xlu1 %414  ;;  %v383_v23 = vpop.permute.xlu0 %382 }
  0x8c   : > { %v397_v24 = vmul.f32 %v383_v23, %v365_v20  ;;  %v398_v25 = vmul.f32 %v383_v23, %v366_v21  ;;  %v436_v36 = vmax.f32 %v428_v27, 0.0  ;;  %v435_v38 = vmax.f32 %v427_v26, 0.0 }
  0x8e   : > { %v429_v28 = vadd.f32 %v415_v22, %v397_v24  ;;  %v430_v29 = vadd.f32 %v415_v22, %v398_v25 }
  0x8f   : > { %v393_v31 = vpop.permute.xlu1 %392  ;;  %v388_v33 = vpop.permute.xlu0 %387 }
  0x90   : > { %v438_v37 = vmax.f32 %v430_v29, 0.0  ;;  %v437_v39 = vmax.f32 %v429_v28, 0.0  ;;  %v401_v40 = vmul.f32 %v393_v31, %v369_v30  ;;  %v402_v41 = vmul.f32 %v393_v31, %v370_v32 }
  0x91   : > { %v399_v42 = vmul.f32 %v388_v33, %v367_v34  ;;  %v400_v43 = vmul.f32 %v388_v33, %v368_v35 }
  0x92   : > { %v838_v46 = vpack.c.bf16 %v438_v37, %v436_v36  ;;  %v840_v47 = vpack.c.bf16 %v437_v39, %v435_v38 }
  0x93   : > { %v425_v44 = vpop.permute.xlu1 %424  ;;  %v420_v45 = vpop.permute.xlu0 %419 }
  0x94   : > { %v433_v48 = vadd.f32 %v425_v44, %v401_v40  ;;  %v434_v49 = vadd.f32 %v425_v44, %v402_v41  ;;  %v431_v50 = vadd.f32 %v420_v45, %v399_v42  ;;  %v432_v51 = vadd.f32 %v420_v45, %v400_v43  ;;  %839 = vmatprep.subr.bf16.mxu0 %v838_v46 }
  0x95   : > { %846 = vmatprep.subr.bf16.mxu1 %v838_v46  ;;  %841 = vmatpush1.bf16.msra.mxu0 %v840_v47 }
  0x96   : > { %v441_v52 = vmax.f32 %v433_v48, 0.0  ;;  %v442_v53 = vmax.f32 %v434_v49, 0.0  ;;  %v439_v54 = vmax.f32 %v431_v50, 0.0  ;;  %v440_v55 = vmax.f32 %v432_v51, 0.0  ;;  %848 = vmatpush1.bf16.msra.mxu1 %v840_v47 }
  0x97   : > { %v454_v62 = vpop.permute.xlu0 %453  ;;  %v459_v63 = vpop.permute.xlu1 %458 }
  0x98   : > { %v842_v56 = vpack.c.bf16 %v442_v53, %v440_v55  ;;  %v844_v57 = vpack.c.bf16 %v441_v52, %v439_v54 }
  0x9a   : > { %843 = vmatprep.subr.bf16.mxu0 %v842_v56  ;;  %847 = vmatprep.subr.bf16.mxu1 %v842_v56 }
  0x9b   : > { %845 = vmatpush1.bf16.msra.mxu0 %v844_v57  ;;  %849 = vmatpush1.bf16.msra.mxu1 %v844_v57  ;;  %v464_v0 = vpop.permute.xlu0 %463  ;;  %v469_v9 = vpop.permute.xlu1 %468 }
  0x9e   : > { %828 = vmatmul.mubr.msk.f32.vlgmr.msra.gmra.mrb[0].mxu0 %vm471_vm0, %v443_v58  ;;  %830 = vmatmul.mubr.msk.f32.vlgmr.msra.gmra.mrb[0].mxu1 %vm471_vm0, %v445_v59 }
  0x9f   : > { %554 = vmatprep.mubr.f32.mxu0 %v903_v13  ;;  %566 = vmatprep.mubr.f32.mxu1 %v903_v13 }
  0xa2   : > { %829 = vmatmul.mubr.msk.f32.gmra.mrb[2].mxu0 %vm471_vm0, %v444_v60  ;;  %831 = vmatmul.mubr.msk.f32.gmra.mrb[2].mxu1 %vm471_vm0, %v446_v61 }
 0x171   : > { %v550_v1 = vpop.f32.mrb[0].mxu0  ;;  %v562_v2 = vpop.f32.mrb[0].mxu1 }
 0x172   : > { %v551_v3 = vadd.f32 %v550_v1, %v454_v62  ;;  %v563_v4 = vadd.f32 %v562_v2, %v464_v0  ;;  %v552_v5 = vpop.f32.mrb[1].mxu0  ;;  %v564_v6 = vpop.f32.mrb[1].mxu1 }
 0x173   : > { %v553_v7 = vadd.f32 %v552_v5, %v454_v62  ;;  %v565_v8 = vadd.f32 %v564_v6, %v464_v0 }
 0x174   : > { %573 = vst [vmem:[%s1031_s28] sm:$0xff] %v551_v3  ;;  %577 = vst [vmem:[%s1031_s28 + $0x20] sm:$0xff] %v563_v4  ;;  %v598_v10 = vmul.f32 %v551_v3, %v551_v3  ;;  %v602_v11 = vmul.f32 %v563_v4, %v563_v4 }
 0x175   : > { %574 = vst [vmem:[%s1031_s28 + $0x8] sm:$0xff] %v553_v7  ;;  %578 = vst [vmem:[%s1031_s28 + $0x28] sm:$0xff] %v565_v8  ;;  %v556_v12 = vpop.f32.mrb[2].mxu0  ;;  %v568_v13 = vpop.f32.mrb[2].mxu1  ;;  %v581_v14 = vadd.f32 %v553_v7, %v551_v3  ;;  %v599_v15 = vmul.f32 %v553_v7, %v553_v7  ;;  %v587_v16 = vadd.f32 %v565_v8, %v563_v4 }
 0x176   : > { %v603_v17 = vmul.f32 %v565_v8, %v565_v8  ;;  %v557_v18 = vadd.f32 %v556_v12, %v459_v63  ;;  %v569_v19 = vadd.f32 %v568_v13, %v469_v9  ;;  %v558_v20 = vpop.f32.mrb[3].mxu0  ;;  %v570_v21 = vpop.f32.mrb[3].mxu1 }
 0x177   : > { %v559_v22 = vadd.f32 %v558_v20, %v459_v63  ;;  %v571_v23 = vadd.f32 %v570_v21, %v469_v9  ;;  %582 = vadd.xlane.f32.xlu0 %v581_v14  ;;  %v606_v24 = vadd.f32 %v599_v15, %v598_v10 }
 0x178   : > { %v612_v25 = vadd.f32 %v603_v17, %v602_v11  ;;  %575 = vst [vmem:[%s1031_s28 + $0x10] sm:$0xff] %v557_v18  ;;  %579 = vst [vmem:[%s1031_s28 + $0x30] sm:$0xff] %v569_v19  ;;  %v600_v26 = vmul.f32 %v557_v18, %v557_v18  ;;  %v604_v27 = vmul.f32 %v569_v19, %v569_v19 }
 0x179   : > { %576 = vst [vmem:[%s1031_s28 + $0x18] sm:$0xff] %v559_v22  ;;  %580 = vst [vmem:[%s1031_s28 + $0x38] sm:$0xff] %v571_v23  ;;  %607 = vadd.xlane.f32.xlu1 %v606_v24  ;;  %v584_v28 = vadd.f32 %v559_v22, %v557_v18  ;;  %v590_v29 = vadd.f32 %v571_v23, %v569_v19  ;;  %v601_v30 = vmul.f32 %v559_v22, %v559_v22 }
 0x17a   : > { %v605_v31 = vmul.f32 %v571_v23, %v571_v23 }
 0x17b   : > { %588 = vadd.xlane.f32.xlu0 %v587_v16  ;;  %v609_v32 = vadd.f32 %v601_v30, %v600_v26 }
 0x17c   : > { %v615_v33 = vadd.f32 %v605_v31, %v604_v27 }
 0x17d   : > { %585 = vadd.xlane.f32.xlu1 %v584_v28 }
 0x17f   : > { %591 = vadd.xlane.f32.xlu0 %v590_v29 }
 0x181   : > { %613 = vadd.xlane.f32.xlu1 %v612_v25 }
 0x183   : > { %610 = vadd.xlane.f32.xlu0 %v609_v32 }
 0x187   : > { %616 = vadd.xlane.f32.xlu0 %v615_v33 }
 0x204   : > { %v583_v34 = vpop.xlane.xlu0 %582 }
 0x205   : > { %594 = vst.msk [vmem:[%s353_s9] sm:$0xff] %vm593_vm1, %v583_v34 }
 0x206   : > { %v608_v35 = vpop.xlane.xlu1 %607 }
 0x207   : > { %618 = vst.msk [vmem:[%s362_s12] sm:$0xff] %vm593_vm1, %v608_v35 }
 0x208   : > { %v589_v36 = vpop.xlane.xlu0 %588 }
 0x209   : > { %596 = vst.msk [vmem:[%s353_s9 + $0x10] sm:$0xff] %vm593_vm1, %v589_v36 }
 0x20a   : > { %v586_v37 = vpop.xlane.xlu1 %585 }
 0x20b   : > { %595 = vst.msk [vmem:[%s353_s9 + $0x8] sm:$0xff] %vm593_vm1, %v586_v37 }
 0x20c   : > { %v592_v38 = vpop.xlane.xlu0 %591 }
 0x20d   : > { %597 = vst.msk [vmem:[%s353_s9 + $0x18] sm:$0xff] %vm593_vm1, %v592_v38 }
 0x20e   : > { %v614_v39 = vpop.xlane.xlu1 %613 }
 0x20f   : > { %620 = vst.msk [vmem:[%s362_s12 + $0x10] sm:$0xff] %vm593_vm1, %v614_v39 }
 0x210   : > { %v611_v40 = vpop.xlane.xlu0 %610 }
 0x211   : > { %619 = vst.msk [vmem:[%s362_s12 + $0x8] sm:$0xff] %vm593_vm1, %v611_v40 }
 0x214   : > { %v617_v41 = vpop.xlane.xlu0 %616 }
 0x215   : > { %621 = vst.msk [vmem:[%s362_s12 + $0x18] sm:$0xff] %vm593_vm1, %v617_v41 }
 0x216 PF: > { %s18_s26 = sadd.s32 1, %s900_s26   ;;  %s1073_s24 = smov %s896_s25 }
 0x217   : > { %p15_p5 = scmp.ge.s32.totalorder %s18_s26, 4   ;;  %s1074_s25 = smov %s1076_s27 }
 0x219   :  { %17 = sbr.rel (!%p15_p5) target bundleno = 2 (0x2), region = 94 }

// kernel: local_refine_forward.9
= control target key start
LH: loop header
LB: loop body
LE: loop exit
PB: predicated region body
PF: predicated region fallthrough
CT: control target
= control target key end

     0   :  { %s608_s20 = smov 0   ;;  %s610_s21 = smov 0   ;;  %s685_s0 = inlined_call_operand.vmem [shape: f32[2,32,256], index: 0, kind: input, shape index: {}]   ;;  %s686_s1 = inlined_call_operand.vmem [shape: f32[32,1], index: 1, kind: input, shape index: {}]   ;;  %s687_s2 = inlined_call_operand.vmem [shape: f32[32,1], index: 2, kind: input, shape index: {}]   ;;  %s688_s3 = inlined_call_operand.vmem [shape: f32[32,1], index: 3, kind: input, shape index: {}]   ;;  %s689_s4 = inlined_call_operand.<no memory space> [shape: f32[1,1], index: 4, kind: input, shape index: {}]   ;;  %s690_s5 = inlined_call_operand.vmem [shape: f32[2,1,256], index: 5, kind: output, shape index: {}]  }
   0x1   :  { %v10_v0 = vstv %s689_s4  ;;  %s612_s22 = smov 0  }
   0x2   :  { %11 = vst [vmem:[#allocation2] sm:$0x1] %v10_v0 }
   0x3 LB: > { %s29_s4 = sadd.s32 1, %s567_s21  ;;  %p514_p0 = scmp.ge.s32.totalorder %s571_s22, 1  ;;  %s571_s22 = sphi %s612_s22, %s17_s22   ;;  %s567_s21 = sphi %s610_s21, %s692_s21   ;;  %s563_s20 = sphi %s608_s20, %s691_s20  }
   0x4   : > { %p31_p1 = scmp.ge.s32.totalorder %s29_s4, 2  ;;  %p210_p2 = scmp.lt.s32.totalorder %s571_s22, 3 }
   0x6   : > { %s694_s4 = smov (%p31_p1, %s29_s4), 0  ;;  %p211_p3 = pnand %p514_p0, %p210_p2 }
   0x7   : > { %v274_v1 = vld [vmem:[%s686_s1 + $0x10] sm:$0xff] (!%p211_p3)  ;;  %v272_v2 = vld [vmem:[%s686_s1] sm:$0xff] (!%p211_p3)  ;;  %v573_v3 = vmov (!%p211_p3), 0   ;;  %v273_v5 = vld [vmem:[%s686_s1 + $0x8] sm:$0xff] (!%p211_p3)  ;;  %p246_p4 = scmp.lt.s32.totalorder (!%p211_p3), %s563_s20, 1 }
   0x8   : > { %214 = sbr.rel (%p211_p3) target bundleno = 184 (0xb8), region = 40  ;;  %548 = vset.pattern.permute.xlu1 (!%p211_p3), %v573_v3  ;;  %547 = vset.pattern.permute.xlu0 (!%p211_p3), %v573_v3  ;;  %v304_v4 = vld [vmem:[%s687_s2] sm:$0xff] (!%p211_p3)  ;;  %v275_v6 = vld [vmem:[%s686_s1 + $0x18] sm:$0xff] (!%p211_p3)  ;;  %v305_v7 = vld [vmem:[%s687_s2 + $0x8] sm:$0xff] (!%p211_p3) }
   0x9   : > { %288 = vperm.xlu1 (!%p211_p3), %548, %v274_v1   ;;  %278 = vperm.xlu0 (!%p211_p3), %547, %v272_v2   ;;  %v307_v8 = vld [vmem:[%s687_s2 + $0x18] sm:$0xff] (!%p211_p3)  ;;  %v306_v9 = vld [vmem:[%s687_s2 + $0x10] sm:$0xff] (!%p211_p3)  ;;  %v345_v10 = vld [vmem:[%s688_s3 + $0x8] sm:$0xff] (!%p211_p3) }
   0xa   : > { %v344_v11 = vld [vmem:[%s688_s3] sm:$0xff] (!%p211_p3)  ;;  %v347_v12 = vld [vmem:[%s688_s3 + $0x18] sm:$0xff] (!%p211_p3)  ;;  %v346_v13 = vld [vmem:[%s688_s3 + $0x10] sm:$0xff] (!%p211_p3) }
   0xb   : > { %v394_v14 = vld [vmem:[#allocation2] sm:$0x1] (!%p211_p3) }
   0xd   : > { %310 = vperm.xlu1 (!%p211_p3), %548, %v304_v4   ;;  %283 = vperm.xlu0 (!%p211_p3), %547, %v273_v5  }
   0xf   : > { %s696_s20 = smov (!%p246_p4, %s563_s20), 1 }
  0x10   : > { %s520_s25 = sshll.u32 %s696_s20, 6  ;;  %s517_s29 = sshll.u32 %s696_s20, 1 }
  0x11   : > { %293 = vperm.xlu1 %548, %v275_v6   ;;  %315 = vperm.xlu0 %547, %v305_v7   ;;  %s253_s28 = scalar_lea.vmem %s685_s0, %s520_s25  ;;  %s262_s7 = scalar_lea.vmem %s690_s5, %s517_s29 }
  0x12   : > { %v264_v19 = vld [vmem:[%s253_s28] sm:$0xff]  ;;  %v265_v20 = vld [vmem:[%s253_s28 + $0x8] sm:$0xff]  ;;  %v266_v21 = vld [vmem:[%s253_s28 + $0x10] sm:$0xff] }
  0x13   : > { %v267_v22 = vld [vmem:[%s253_s28 + $0x18] sm:$0xff]  ;;  %v268_v29 = vld [vmem:[%s253_s28 + $0x20] sm:$0xff]  ;;  %v269_v30 = vld [vmem:[%s253_s28 + $0x28] sm:$0xff] }
  0x14   : > { %v270_v33 = vld [vmem:[%s253_s28 + $0x30] sm:$0xff]  ;;  %v271_v34 = vld [vmem:[%s253_s28 + $0x38] sm:$0xff] }
  0x15   : > { %325 = vperm.xlu1 %548, %v307_v8   ;;  %320 = vperm.xlu0 %547, %v306_v9   ;;  %v400_v9 = vlaneseq }
  0x17   : > { %vm426_vm0 = vcmp.lt.s32.totalorder %v400_v9, 256 }
  0x19   : > { %355 = vperm.xlu1 %548, %v345_v10   ;;  %350 = vperm.xlu0 %547, %v344_v11  }
  0x1d   : > { %365 = vperm.xlu1 %548, %v347_v12   ;;  %360 = vperm.xlu0 %547, %v346_v13  }
  0x21   : > { %397 = vperm.xlu0 %547, %v394_v14   ;;  %v401_v14 = vshrl.u32 %v400_v9, 7 }
  0x88   : > { %v289_v15 = vpop.permute.xlu1 %288  ;;  %v279_v16 = vpop.permute.xlu0 %278 }
  0x89   : > { %v296_v23 = vmul.f32 %v279_v16, %v264_v19  ;;  %v297_v24 = vmul.f32 %v279_v16, %v265_v20  ;;  %v300_v39 = vmul.f32 %v289_v15, %v268_v29  ;;  %v301_v40 = vmul.f32 %v289_v15, %v269_v30 }
  0x8a   : > { %v574_v15 = vmov 1966171168   ;;  %v402_v19 = vsub.s32 0, %v401_v14 }
  0x8b   : > { %v410_v16 = vunpack.c.l.s4 %v574_v15 }
  0x8c   : > { %v311_v17 = vpop.permute.xlu1 %310  ;;  %v284_v18 = vpop.permute.xlu0 %283 }
  0x8d   : > { %v298_v27 = vmul.f32 %v284_v18, %v266_v21  ;;  %v299_v28 = vmul.f32 %v284_v18, %v267_v22  ;;  %v328_v31 = vadd.f32 %v311_v17, %v296_v23  ;;  %v329_v32 = vadd.f32 %v311_v17, %v297_v24 }
  0x8e   : > { %v411_v23 = vunpack.c.0.s8 %v410_v16 }
  0x8f   : > { %v336_v41 = vmax.f32 %v328_v31, 0.0  ;;  %v337_v42 = vmax.f32 %v329_v32, 0.0 }
  0x90   : > { %v294_v25 = vpop.permute.xlu1 %293  ;;  %v316_v26 = vpop.permute.xlu0 %315  ;;  %v414_v29 = vsub.s32 %v411_v23, %v401_v14 }
  0x91   : > { %v330_v35 = vadd.f32 %v316_v26, %v298_v27  ;;  %v331_v36 = vadd.f32 %v316_v26, %v299_v28  ;;  %v302_v43 = vmul.f32 %v294_v25, %v270_v33  ;;  %v303_v44 = vmul.f32 %v294_v25, %v271_v34 }
  0x93   : > { %v338_v45 = vmax.f32 %v330_v35, 0.0  ;;  %v339_v46 = vmax.f32 %v331_v36, 0.0 }
  0x94   : > { %v326_v37 = vpop.permute.xlu1 %325  ;;  %v321_v38 = vpop.permute.xlu0 %320 }
  0x95   : > { %v332_v47 = vadd.f32 %v321_v38, %v300_v39  ;;  %v333_v48 = vadd.f32 %v321_v38, %v301_v40  ;;  %v334_v49 = vadd.f32 %v326_v37, %v302_v43  ;;  %v335_v50 = vadd.f32 %v326_v37, %v303_v44 }
  0x97   : > { %v340_v57 = vmax.f32 %v332_v47, 0.0  ;;  %v341_v58 = vmax.f32 %v333_v48, 0.0  ;;  %v342_v59 = vmax.f32 %v334_v49, 0.0  ;;  %v343_v60 = vmax.f32 %v335_v50, 0.0 }
  0x98   : > { %v356_v51 = vpop.permute.xlu1 %355  ;;  %v351_v52 = vpop.permute.xlu0 %350 }
  0x99   : > { %v370_v53 = vmul.f32 %v356_v51, %v338_v45  ;;  %v371_v54 = vmul.f32 %v356_v51, %v339_v46  ;;  %v368_v55 = vmul.f32 %v351_v52, %v336_v41  ;;  %v369_v56 = vmul.f32 %v351_v52, %v337_v42 }
  0x9b   : > { %v376_v63 = vadd.f32 %v370_v53, %v368_v55  ;;  %v385_v0 = vadd.f32 %v371_v54, %v369_v56 }
  0x9c   : > { %v366_v61 = vpop.permute.xlu1 %365  ;;  %v361_v62 = vpop.permute.xlu0 %360 }
  0x9d   : > { %v372_v1 = vmul.f32 %v361_v62, %v340_v57  ;;  %v373_v2 = vmul.f32 %v361_v62, %v341_v58  ;;  %v374_v3 = vmul.f32 %v366_v61, %v342_v59  ;;  %v375_v4 = vmul.f32 %v366_v61, %v343_v60 }
  0x9f   : > { %v377_v5 = vadd.f32 %v376_v63, %v372_v1  ;;  %v386_v6 = vadd.f32 %v385_v0, %v373_v2 }
  0xa0   : > { %v398_v22 = vpop.permute.xlu0 %397 }
  0xa1   : > { %v378_v7 = vadd.f32 %v377_v5, %v374_v3  ;;  %v387_v8 = vadd.f32 %v386_v6, %v375_v4  ;;  %v403_v28 = vrot.slane %v398_v22, %v402_v19 }
  0xa3   : > { %v379_v10 = vrot.slane %v378_v7, 4  ;;  %v388_v11 = vrot.slane %v387_v8, 4 }
  0xa5   : > { %v380_v12 = vadd.f32 %v379_v10, %v378_v7  ;;  %v389_v13 = vadd.f32 %v388_v11, %v387_v8 }
  0xa7   : > { %v381_v17 = vrot.slane %v380_v12, 2  ;;  %v390_v18 = vrot.slane %v389_v13, 2 }
  0xa9   : > { %v382_v20 = vadd.f32 %v381_v17, %v380_v12  ;;  %v391_v21 = vadd.f32 %v390_v18, %v389_v13 }
  0xab   : > { %v383_v24 = vrot.slane %v382_v20, 1  ;;  %v392_v25 = vrot.slane %v391_v21, 1 }
  0xad   : > { %v384_v26 = vadd.f32 %v383_v24, %v382_v20  ;;  %v393_v27 = vadd.f32 %v392_v25, %v391_v21 }
  0xaf   : > { %v404_v30 = vadd.f32 %v403_v28, %v384_v26  ;;  %v405_v31 = vadd.f32 %v403_v28, %v393_v27 }
  0xb1   : > { %v408_v32 = vcombine.low %v404_v30, %v405_v31 }
  0xb3   : > { %v415_v33 = vrot.slane %v408_v32, %v414_v29 }
  0xb5   : > { %v422_v34 = vrot.slane %v415_v33, %v414_v29 }
  0xb7   : > { %428 = vst.msk [vmem:[%s262_s7] sm:$0x3] %vm426_vm0, %v422_v34 }
  0xb8 PF: > { %s17_s22 = sadd.s32 1, %s571_s22   ;;  %s691_s20 = smov %s567_s21 }
  0xb9   : > { %p14_p5 = scmp.ge.s32.totalorder %s17_s22, 4   ;;  %s692_s21 = smov %s694_s4 }
  0xbb   :  { %16 = sbr.rel (!%p14_p5) target bundleno = 3 (0x3), region = 70 }

</bundles_post_ra>
